<compile_context>
chip_gen: v7x
topology: tpu7x:2x2x1
jax: 0.10.0
libtpu: 0.0.40
codegen_flags: <defaults>
</compile_context>

<pallas_src>
import functools
import math

import jax
import jax.numpy as jnp
from jax.experimental import pallas as pl
from jax.experimental.pallas import tpu as pltpu

# ----------------------------- small config (structurally == module) -----------------------------
DIM = 128            # latent dim              (module default: 1024)
DEPTH = 5            # total attn+ff layers    (module default: 10); must be a multiple of 5
DIM_HEAD = 32        # per-head dim            (module default: 64)
HEADS = 4            # attention heads         (module default: 16)
NUM_ID_TOKEN = 5
NUM_QUERIES = 8      # (module default: 32)
OUTPUT_DIM = 256     # (module default: 2048)
FF_MULT = 4
VIT_DIM = 128        # stands in for the hard-coded 1024 input width of mapping_i
ID_EMBED_DIM = 160   # stands in for the hard-coded 1280 input width of id_embedding_mapping
MAP_HIDDEN = 128     # stands in for the hard-coded 1024 hidden width of the mapping MLPs
INNER = DIM_HEAD * HEADS

LN_EPS = 1e-5        # torch.nn.LayerNorm default
LEAKY_SLOPE = 0.01   # torch.nn.LeakyReLU default
_INV_SQRT2 = 1.0 / math.sqrt(2.0)


# ---------------------------------------- Pallas kernels ----------------------------------------
def _layer_norm(t, g, b):
    """LayerNorm over the last dim; g/b are (1, D) rows, t is (M, D) f32."""
    mu = jnp.mean(t, axis=-1, keepdims=True)
    var = jnp.mean(jnp.square(t - mu), axis=-1, keepdims=True)
    return (t - mu) * jax.lax.rsqrt(var + LN_EPS) * g + b


def _fused_layer_kernel(ctx_ref, lat_ref, ln_ref, wq_ref, wkv_ref, wo_ref,
                        w1_ref, w2_ref, o_ref, *, heads, dim_head):
    """One full transformer layer (PerceiverAttention + FeedForward, both residuals)
    for a single batch element.  ctx_ref: (1, Lc, D); lat_ref: (1, Ll, D);
    ln_ref: (6, D) rows = [n1_g, n1_b, n2_g, n2_b, ff_g, ff_b]."""
    f32 = jnp.float32
    inner = heads * dim_head

    ctx = ctx_ref[0].astype(f32)                     # (Lc, D)
    lat = lat_ref[0].astype(f32)                     # (Ll, D)
    ln = ln_ref[...].astype(f32)                     # (6, D)

    # ---- PerceiverAttention ----
    ctx_ln = _layer_norm(ctx, ln[0:1, :], ln[1:2, :])
    lat_ln = _layer_norm(lat, ln[2:3, :], ln[3:4, :])

    # full 1/sqrt(Dh) scale folded into q (== (q*s)@(k*s)^T with s = Dh^-0.25)
    q = jnp.dot(lat_ln, wq_ref[...], preferred_element_type=f32) * (dim_head ** -0.5)

    # kv projection applied to ctx and latents separately (kv concat never materialized)
    wk = wkv_ref[:, :inner]
    wv = wkv_ref[:, inner:]
    k_ctx = jnp.dot(ctx_ln, wk, preferred_element_type=f32)     # (Lc, inner)
    v_ctx = jnp.dot(ctx_ln, wv, preferred_element_type=f32)
    k_lat = jnp.dot(lat_ln, wk, preferred_element_type=f32)     # (Ll, inner)
    v_lat = jnp.dot(lat_ln, wv, preferred_element_type=f32)

    dn = (((1,), (1,)), ((), ()))                                # q @ k^T without transpose
    attn = None
    for h in range(heads):                                       # static unroll over heads
        sl = slice(h * dim_head, (h + 1) * dim_head)
        qh = q[:, sl]                                            # (Ll, Dh)
        s_c = jax.lax.dot_general(qh, k_ctx[:, sl], dn, preferred_element_type=f32)  # (Ll, Lc)
        s_l = jax.lax.dot_general(qh, k_lat[:, sl], dn, preferred_element_type=f32)  # (Ll, Ll)
        # softmax over [ctx keys ; latent keys] done piecewise (no concat needed)
        m = jnp.maximum(jnp.max(s_c, axis=-1, keepdims=True),
                        jnp.max(s_l, axis=-1, keepdims=True))
        p_c = jnp.exp(s_c - m)
        p_l = jnp.exp(s_l - m)
        denom = jnp.sum(p_c, axis=-1, keepdims=True) + jnp.sum(p_l, axis=-1, keepdims=True)
        o_h = (jnp.dot(p_c, v_ctx[:, sl], preferred_element_type=f32)
               + jnp.dot(p_l, v_lat[:, sl], preferred_element_type=f32))
        o_h = o_h * pl.reciprocal(denom, approx=True)            # (Ll, Dh)
        # out-projection by linearity: sum_h o_h @ wo[h*Dh:(h+1)*Dh, :]
        contrib = jnp.dot(o_h, wo_ref[h * dim_head:(h + 1) * dim_head, :],
                          preferred_element_type=f32)            # (Ll, D)
        attn = contrib if attn is None else attn + contrib

    h1 = lat + attn                                              # residual 1

    # ---- FeedForward: LN -> Linear(no bias) -> GELU -> Linear(no bias) ----
    h_ln = _layer_norm(h1, ln[4:5, :], ln[5:6, :])
    u = jnp.dot(h_ln, w1_ref[...], preferred_element_type=f32)
    u = 0.5 * u * (1.0 + jax.lax.erf(u * _INV_SQRT2))            # exact (erf) GELU
    ff = jnp.dot(u, w2_ref[...], preferred_element_type=f32)

    o_ref[0] = (h1 + ff).astype(o_ref.dtype)                     # residual 2


def _mapping_mlp_kernel(x_ref, w1_ref, b1_ref, ln1_ref, w2_ref, b2_ref, ln2_ref,
                        w3_ref, b3_ref, o_ref):
    """Fused Linear->LN->LeakyReLU->Linear->LN->LeakyReLU->Linear for one group."""
    f32 = jnp.float32
    x = x_ref[0].astype(f32)                                     # (M, Kin)

    def ln_leaky(t, gb):                                         # gb: (2, H)
        y = _layer_norm(t, gb[0:1, :], gb[1:2, :])
        return jnp.where(y >= 0, y, LEAKY_SLOPE * y)

    h = jnp.dot(x, w1_ref[0], preferred_element_type=f32) + b1_ref[0]
    h = ln_leaky(h, ln1_ref[0].astype(f32))
    h = jnp.dot(h, w2_ref[0], preferred_element_type=f32) + b2_ref[0]
    h = ln_leaky(h, ln2_ref[0].astype(f32))
    o = jnp.dot(h, w3_ref[0], preferred_element_type=f32) + b3_ref[0]
    o_ref[0] = o.astype(o_ref.dtype)


def _matmul_kernel(x_ref, w_ref, o_ref):
    """Bias-free matmul (final proj_out)."""
    o_ref[...] = jnp.dot(x_ref[...], w_ref[...],
                         preferred_element_type=jnp.float32).astype(o_ref.dtype)


# ------------------------------------- pallas_call wrappers -------------------------------------
def fused_layer(layer_p, ctx, latents):
    """One PerceiverAttention + FeedForward layer (with residuals) in a single pallas_call."""
    B, Lc, D = ctx.shape
    _, Ll, _ = latents.shape
    a, f = layer_p["attn"], layer_p["ff"]
    ln = jnp.stack([a["n1_g"], a["n1_b"], a["n2_g"], a["n2_b"], f["g"], f["b"]], axis=0)
    return pl.pallas_call(
        functools.partial(_fused_layer_kernel, heads=HEADS, dim_head=DIM_HEAD),
        out_shape=jax.ShapeDtypeStruct((B, Ll, D), latents.dtype),
        grid=(B,),
        in_specs=[
            pl.BlockSpec((1, Lc, D), lambda b: (b, 0, 0)),
            pl.BlockSpec((1, Ll, D), lambda b: (b, 0, 0)),
            pl.BlockSpec((6, D), lambda b: (0, 0)),
            pl.BlockSpec((D, INNER), lambda b: (0, 0)),
            pl.BlockSpec((D, 2 * INNER), lambda b: (0, 0)),
            pl.BlockSpec((INNER, D), lambda b: (0, 0)),
            pl.BlockSpec((D, FF_MULT * D), lambda b: (0, 0)),
            pl.BlockSpec((FF_MULT * D, D), lambda b: (0, 0)),
        ],
        out_specs=pl.BlockSpec((1, Ll, D), lambda b: (b, 0, 0)),
        compiler_params=pltpu.CompilerParams(dimension_semantics=("parallel",)),
    )(ctx, latents, ln, a["wq"], a["wkv"], a["wo"], f["w1"], f["w2"])


def mapping_mlp_stacked(x3, p):
    """x3: (G, M, Kin) -> (G, M, Dout); p holds per-group stacked weights; one call, grid=(G,)."""
    G, M, Kin = x3.shape
    H = p["w1"].shape[2]
    Dout = p["w3"].shape[2]
    return pl.pallas_call(
        _mapping_mlp_kernel,
        out_shape=jax.ShapeDtypeStruct((G, M, Dout), x3.dtype),
        grid=(G,),
        in_specs=[
            pl.BlockSpec((1, M, Kin), lambda i: (i, 0, 0)),
            pl.BlockSpec((1, Kin, H), lambda i: (i, 0, 0)),
            pl.BlockSpec((1, 1, H), lambda i: (i, 0, 0)),
            pl.BlockSpec((1, 2, H), lambda i: (i, 0, 0)),
            pl.BlockSpec((1, H, H), lambda i: (i, 0, 0)),
            pl.BlockSpec((1, 1, H), lambda i: (i, 0, 0)),
            pl.BlockSpec((1, 2, H), lambda i: (i, 0, 0)),
            pl.BlockSpec((1, H, Dout), lambda i: (i, 0, 0)),
            pl.BlockSpec((1, 1, Dout), lambda i: (i, 0, 0)),
        ],
        out_specs=pl.BlockSpec((1, M, Dout), lambda i: (i, 0, 0)),
        compiler_params=pltpu.CompilerParams(dimension_semantics=("parallel",)),
    )(x3, p["w1"], p["b1"], p["ln1"], p["w2"], p["b2"], p["ln2"], p["w3"], p["b3"])


def matmul_nobias(x2, w):
    """x2: (M, K) @ w: (K, N) -> (M, N); no bias tensor is allocated."""
    M, K = x2.shape
    N = w.shape[1]
    return pl.pallas_call(
        _matmul_kernel,
        out_shape=jax.ShapeDtypeStruct((M, N), x2.dtype),
        grid=(1,),
        in_specs=[pl.BlockSpec((M, K), lambda i: (0, 0)),
                  pl.BlockSpec((K, N), lambda i: (0, 0))],
        out_specs=pl.BlockSpec((M, N), lambda i: (0, 0)),
    )(x2, w)


def _stack_mlp_params(plist):
    """Stack a list of mapping-MLP param dicts along a leading group axis."""
    return {
        "w1": jnp.stack([p["w1"] for p in plist]),
        "b1": jnp.stack([p["b1"].reshape(1, -1) for p in plist]),
        "ln1": jnp.stack([jnp.stack([p["ln1_g"], p["ln1_b"]]) for p in plist]),
        "w2": jnp.stack([p["w2"] for p in plist]),
        "b2": jnp.stack([p["b2"].reshape(1, -1) for p in plist]),
        "ln2": jnp.stack([jnp.stack([p["ln2_g"], p["ln2_b"]]) for p in plist]),
        "w3": jnp.stack([p["w3"] for p in plist]),
        "b3": jnp.stack([p["b3"].reshape(1, -1) for p in plist]),
    }


# --------------------------------------- model (glue in JAX) ---------------------------------------
def local_facial_extractor(params, x, y):
    """x: (B, ID_EMBED_DIM); y: list of 5 tensors (B, S_vit, VIT_DIM) -> (B, NUM_QUERIES, OUTPUT_DIM)."""
    B = x.shape[0]
    S_vit = y[0].shape[1]
    latents = jnp.tile(params["latents"], (B, 1, 1))                    # (B, NQ, DIM)

    # id-embedding mapping MLP (single fused kernel, group dim = 1)
    xid = mapping_mlp_stacked(x[None, :, :], _stack_mlp_params([params["id_map"]]))
    xid = xid[0].reshape(B, NUM_ID_TOKEN, DIM)                          # (B, NIT, DIM)
    latents = jnp.concatenate([latents, xid], axis=1)                   # (B, NQ+NIT, DIM)

    # all 5 vit mapping MLPs in ONE pallas_call (they are data-independent)
    y_stacked = jnp.stack([yi.reshape(B * S_vit, VIT_DIM) for yi in y], axis=0)  # (5, B*S, VIT)
    vit_all = mapping_mlp_stacked(y_stacked, _stack_mlp_params(params["maps"]))  # (5, B*S, DIM)

    depth_per = DEPTH // 5
    for i in range(5):
        vit_feature = vit_all[i].reshape(B, S_vit, DIM)
        ctx_feature = jnp.concatenate([xid, vit_feature], axis=1)       # (B, NIT+S_vit, DIM)
        for j in range(depth_per):
            layer = params["layers"][i * depth_per + j]
            latents = fused_layer(layer, ctx_feature, latents)          # attn+ff+residuals fused

    latents = latents[:, :NUM_QUERIES]
    out = matmul_nobias(latents.reshape(B * NUM_QUERIES, DIM), params["proj_out"])
    return out.reshape(B, NUM_QUERIES, OUTPUT_DIM)


# ---------------------------------------- parameter init ----------------------------------------
def init_params(key):
    keys = iter(jax.random.split(key, 256))

    def uni(shape, fan_in):
        bound = 1.0 / math.sqrt(fan_in)
        return jax.random.uniform(next(keys), shape, jnp.float32, -bound, bound)

    scale = DIM ** (-0.5)
    params = {
        "latents": scale * jax.random.normal(next(keys), (1, NUM_QUERIES, DIM), jnp.float32),
        "proj_out": scale * jax.random.normal(next(keys), (DIM, OUTPUT_DIM), jnp.float32),
    }

    layers = []
    for _ in range(DEPTH):
        attn = {
            "n1_g": jnp.ones((DIM,), jnp.float32), "n1_b": jnp.zeros((DIM,), jnp.float32),
            "n2_g": jnp.ones((DIM,), jnp.float32), "n2_b": jnp.zeros((DIM,), jnp.float32),
            "wq": uni((DIM, INNER), DIM),
            "wkv": uni((DIM, 2 * INNER), DIM),
            "wo": uni((INNER, DIM), INNER),
        }
        ff = {
            "g": jnp.ones((DIM,), jnp.float32), "b": jnp.zeros((DIM,), jnp.float32),
            "w1": uni((DIM, FF_MULT * DIM), DIM),
            "w2": uni((FF_MULT * DIM, DIM), FF_MULT * DIM),
        }
        layers.append({"attn": attn, "ff": ff})
    params["layers"] = layers

    def mlp_params(din, dhid, dout):
        return {
            "w1": uni((din, dhid), din), "b1": uni((dhid,), din),
            "ln1_g": jnp.ones((dhid,), jnp.float32), "ln1_b": jnp.zeros((dhid,), jnp.float32),
            "w2": uni((dhid, dhid), dhid), "b2": uni((dhid,), dhid),
            "ln2_g": jnp.ones((dhid,), jnp.float32), "ln2_b": jnp.zeros((dhid,), jnp.float32),
            "w3": uni((dhid, dout), dhid), "b3": uni((dout,), dhid),
        }

    params["maps"] = [mlp_params(VIT_DIM, MAP_HIDDEN, DIM) for _ in range(5)]
    params["id_map"] = mlp_params(ID_EMBED_DIM, MAP_HIDDEN, DIM * NUM_ID_TOKEN)
    return params


# --------------------------------------------- main ---------------------------------------------
if __name__ == "__main__":
    key = jax.random.PRNGKey(0)
    pkey, xkey, ykey = jax.random.split(key, 3)

    params = init_params(pkey)

    B, S_VIT = 2, 8
    x = jax.random.normal(xkey, (B, ID_EMBED_DIM), jnp.float32)
    ykeys = jax.random.split(ykey, 5)
    y = [jax.random.normal(ykeys[i], (B, S_VIT, VIT_DIM), jnp.float32) for i in range(5)]

    fwd = jax.jit(local_facial_extractor)
    out = fwd(params, x, y)
    out = jax.block_until_ready(out)

    assert out.shape == (B, NUM_QUERIES, OUTPUT_DIM), out.shape
    assert out.dtype == jnp.float32
    assert bool(jnp.all(jnp.isfinite(out)))
    print("KERNEL_OK")
</pallas_src>

<mosaic_0001>
module attributes {stable_mosaic.version = 11 : i64} {
  func.func @_mapping_mlp_kernel(%arg0: i32, %arg1: memref<1x16x128xf32, #tpu.memory_space<vmem>>, %arg2: memref<1x128x128xf32, #tpu.memory_space<vmem>>, %arg3: memref<1x1x128xf32, #tpu.memory_space<vmem>>, %arg4: memref<1x2x128xf32, #tpu.memory_space<vmem>>, %arg5: memref<1x128x128xf32, #tpu.memory_space<vmem>>, %arg6: memref<1x1x128xf32, #tpu.memory_space<vmem>>, %arg7: memref<1x2x128xf32, #tpu.memory_space<vmem>>, %arg8: memref<1x128x128xf32, #tpu.memory_space<vmem>>, %arg9: memref<1x1x128xf32, #tpu.memory_space<vmem>>, %arg10: memref<1x16x128xf32, #tpu.memory_space<vmem>>) attributes {dimension_semantics = [#tpu.dimension_semantics<parallel>], iteration_bounds = array<i64: 5>, scalar_prefetch = 0 : i64, scratch_operands = 0 : i64, tpu.core_type = #tpu.core_type<tc>, window_params = [{transform_indices = @transform_0, window_bounds = array<i64: 1, 16, 128>}, {transform_indices = @transform_1, window_bounds = array<i64: 1, 128, 128>}, {transform_indices = @transform_2, window_bounds = array<i64: 1, 1, 128>}, {transform_indices = @transform_3, window_bounds = array<i64: 1, 2, 128>}, {transform_indices = @transform_4, window_bounds = array<i64: 1, 128, 128>}, {transform_indices = @transform_5, window_bounds = array<i64: 1, 1, 128>}, {transform_indices = @transform_6, window_bounds = array<i64: 1, 2, 128>}, {transform_indices = @transform_7, window_bounds = array<i64: 1, 128, 128>}, {transform_indices = @transform_8, window_bounds = array<i64: 1, 1, 128>}, {transform_indices = @transform_9, window_bounds = array<i64: 1, 16, 128>}]} {
    %c0 = arith.constant 0 : index
    %c0_0 = arith.constant 0 : index
    %c0_1 = arith.constant 0 : index
    %0 = vector.load %arg1[%c0, %c0_0, %c0_1] : memref<1x16x128xf32, #tpu.memory_space<vmem>>, vector<1x16x128xf32>
    %1 = vector.shape_cast %0 : vector<1x16x128xf32> to vector<16x128xf32>
    %c0_2 = arith.constant 0 : index
    %c0_3 = arith.constant 0 : index
    %c0_4 = arith.constant 0 : index
    %2 = vector.load %arg2[%c0_2, %c0_3, %c0_4] : memref<1x128x128xf32, #tpu.memory_space<vmem>>, vector<1x128x128xf32>
    %3 = vector.shape_cast %2 : vector<1x128x128xf32> to vector<128x128xf32>
    %cst = arith.constant dense<0.000000e+00> : vector<16x128xf32>
    %4 = tpu.matmul %1, %3, %cst {dimension_numbers = #tpu.dot_dimension_numbers<[1], [0], [0], [1], [0, 0, 1, 1], [], []>} : vector<16x128xf32>, vector<128x128xf32>, vector<16x128xf32> -> vector<16x128xf32>
    %c0_5 = arith.constant 0 : index
    %c0_6 = arith.constant 0 : index
    %c0_7 = arith.constant 0 : index
    %5 = vector.load %arg3[%c0_5, %c0_6, %c0_7] : memref<1x1x128xf32, #tpu.memory_space<vmem>>, vector<1x1x128xf32>
    %6 = vector.shape_cast %5 : vector<1x1x128xf32> to vector<1x128xf32>
    %7 = vector.broadcast %6 : vector<1x128xf32> to vector<16x128xf32>
    %8 = arith.addf %4, %7 : vector<16x128xf32>
    %c0_8 = arith.constant 0 : index
    %c0_9 = arith.constant 0 : index
    %c0_10 = arith.constant 0 : index
    %9 = vector.load %arg4[%c0_8, %c0_9, %c0_10] : memref<1x2x128xf32, #tpu.memory_space<vmem>>, vector<1x2x128xf32>
    %10 = vector.shape_cast %9 : vector<1x2x128xf32> to vector<2x128xf32>
    %11 = vector.extract_strided_slice %10 {offsets = [0, 0], sizes = [1, 128], strides = [1, 1]} : vector<2x128xf32> to vector<1x128xf32>
    %12 = vector.extract_strided_slice %10 {offsets = [1, 0], sizes = [1, 128], strides = [1, 1]} : vector<2x128xf32> to vector<1x128xf32>
    %cst_11 = arith.constant dense<0.000000e+00> : vector<16xf32>
    %13 = vector.multi_reduction <add>, %8, %cst_11 [1] : vector<16x128xf32> to vector<16xf32>
    %14 = vector.shape_cast %13 : vector<16xf32> to vector<16x1xf32>
    %cst_12 = arith.constant 1.280000e+02 : f32
    %15 = vector.broadcast %cst_12 : f32 to vector<16x1xf32>
    %16 = arith.divf %14, %15 : vector<16x1xf32>
    %17 = vector.broadcast %16 : vector<16x1xf32> to vector<16x128xf32>
    %18 = arith.subf %8, %17 : vector<16x128xf32>
    %19 = arith.mulf %18, %18 : vector<16x128xf32>
    %cst_13 = arith.constant dense<0.000000e+00> : vector<16xf32>
    %20 = vector.multi_reduction <add>, %19, %cst_13 [1] : vector<16x128xf32> to vector<16xf32>
    %21 = vector.shape_cast %20 : vector<16xf32> to vector<16x1xf32>
    %cst_14 = arith.constant 1.280000e+02 : f32
    %22 = vector.broadcast %cst_14 : f32 to vector<16x1xf32>
    %23 = arith.divf %21, %22 : vector<16x1xf32>
    %24 = vector.broadcast %16 : vector<16x1xf32> to vector<16x128xf32>
    %25 = arith.subf %8, %24 : vector<16x128xf32>
    %cst_15 = arith.constant 9.99999974E-6 : f32
    %26 = vector.broadcast %cst_15 : f32 to vector<16x1xf32>
    %27 = arith.addf %23, %26 : vector<16x1xf32>
    %28 = math.rsqrt %27 : vector<16x1xf32>
    %29 = vector.broadcast %28 : vector<16x1xf32> to vector<16x128xf32>
    %30 = arith.mulf %25, %29 : vector<16x128xf32>
    %31 = vector.broadcast %11 : vector<1x128xf32> to vector<16x128xf32>
    %32 = arith.mulf %30, %31 : vector<16x128xf32>
    %33 = vector.broadcast %12 : vector<1x128xf32> to vector<16x128xf32>
    %34 = arith.addf %32, %33 : vector<16x128xf32>
    %cst_16 = arith.constant 0.000000e+00 : f32
    %35 = vector.broadcast %cst_16 : f32 to vector<16x128xf32>
    %36 = arith.cmpf oge, %34, %35 : vector<16x128xf32>
    %cst_17 = arith.constant 0.00999999977 : f32
    %37 = vector.broadcast %cst_17 : f32 to vector<16x128xf32>
    %38 = arith.mulf %37, %34 : vector<16x128xf32>
    %39 = arith.select %36, %34, %38 : vector<16x128xi1>, vector<16x128xf32>
    %c0_18 = arith.constant 0 : index
    %c0_19 = arith.constant 0 : index
    %c0_20 = arith.constant 0 : index
    %40 = vector.load %arg5[%c0_18, %c0_19, %c0_20] : memref<1x128x128xf32, #tpu.memory_space<vmem>>, vector<1x128x128xf32>
    %41 = vector.shape_cast %40 : vector<1x128x128xf32> to vector<128x128xf32>
    %cst_21 = arith.constant dense<0.000000e+00> : vector<16x128xf32>
    %42 = tpu.matmul %39, %41, %cst_21 {dimension_numbers = #tpu.dot_dimension_numbers<[1], [0], [0], [1], [0, 0, 1, 1], [], []>} : vector<16x128xf32>, vector<128x128xf32>, vector<16x128xf32> -> vector<16x128xf32>
    %c0_22 = arith.constant 0 : index
    %c0_23 = arith.constant 0 : index
    %c0_24 = arith.constant 0 : index
    %43 = vector.load %arg6[%c0_22, %c0_23, %c0_24] : memref<1x1x128xf32, #tpu.memory_space<vmem>>, vector<1x1x128xf32>
    %44 = vector.shape_cast %43 : vector<1x1x128xf32> to vector<1x128xf32>
    %45 = vector.broadcast %44 : vector<1x128xf32> to vector<16x128xf32>
    %46 = arith.addf %42, %45 : vector<16x128xf32>
    %c0_25 = arith.constant 0 : index
    %c0_26 = arith.constant 0 : index
    %c0_27 = arith.constant 0 : index
    %47 = vector.load %arg7[%c0_25, %c0_26, %c0_27] : memref<1x2x128xf32, #tpu.memory_space<vmem>>, vector<1x2x128xf32>
    %48 = vector.shape_cast %47 : vector<1x2x128xf32> to vector<2x128xf32>
    %49 = vector.extract_strided_slice %48 {offsets = [0, 0], sizes = [1, 128], strides = [1, 1]} : vector<2x128xf32> to vector<1x128xf32>
    %50 = vector.extract_strided_slice %48 {offsets = [1, 0], sizes = [1, 128], strides = [1, 1]} : vector<2x128xf32> to vector<1x128xf32>
    %cst_28 = arith.constant dense<0.000000e+00> : vector<16xf32>
    %51 = vector.multi_reduction <add>, %46, %cst_28 [1] : vector<16x128xf32> to vector<16xf32>
    %52 = vector.shape_cast %51 : vector<16xf32> to vector<16x1xf32>
    %cst_29 = arith.constant 1.280000e+02 : f32
    %53 = vector.broadcast %cst_29 : f32 to vector<16x1xf32>
    %54 = arith.divf %52, %53 : vector<16x1xf32>
    %55 = vector.broadcast %54 : vector<16x1xf32> to vector<16x128xf32>
    %56 = arith.subf %46, %55 : vector<16x128xf32>
    %57 = arith.mulf %56, %56 : vector<16x128xf32>
    %cst_30 = arith.constant dense<0.000000e+00> : vector<16xf32>
    %58 = vector.multi_reduction <add>, %57, %cst_30 [1] : vector<16x128xf32> to vector<16xf32>
    %59 = vector.shape_cast %58 : vector<16xf32> to vector<16x1xf32>
    %cst_31 = arith.constant 1.280000e+02 : f32
    %60 = vector.broadcast %cst_31 : f32 to vector<16x1xf32>
    %61 = arith.divf %59, %60 : vector<16x1xf32>
    %62 = vector.broadcast %54 : vector<16x1xf32> to vector<16x128xf32>
    %63 = arith.subf %46, %62 : vector<16x128xf32>
    %cst_32 = arith.constant 9.99999974E-6 : f32
    %64 = vector.broadcast %cst_32 : f32 to vector<16x1xf32>
    %65 = arith.addf %61, %64 : vector<16x1xf32>
    %66 = math.rsqrt %65 : vector<16x1xf32>
    %67 = vector.broadcast %66 : vector<16x1xf32> to vector<16x128xf32>
    %68 = arith.mulf %63, %67 : vector<16x128xf32>
    %69 = vector.broadcast %49 : vector<1x128xf32> to vector<16x128xf32>
    %70 = arith.mulf %68, %69 : vector<16x128xf32>
    %71 = vector.broadcast %50 : vector<1x128xf32> to vector<16x128xf32>
    %72 = arith.addf %70, %71 : vector<16x128xf32>
    %cst_33 = arith.constant 0.000000e+00 : f32
    %73 = vector.broadcast %cst_33 : f32 to vector<16x128xf32>
    %74 = arith.cmpf oge, %72, %73 : vector<16x128xf32>
    %cst_34 = arith.constant 0.00999999977 : f32
    %75 = vector.broadcast %cst_34 : f32 to vector<16x128xf32>
    %76 = arith.mulf %75, %72 : vector<16x128xf32>
    %77 = arith.select %74, %72, %76 : vector<16x128xi1>, vector<16x128xf32>
    %c0_35 = arith.constant 0 : index
    %c0_36 = arith.constant 0 : index
    %c0_37 = arith.constant 0 : index
    %78 = vector.load %arg8[%c0_35, %c0_36, %c0_37] : memref<1x128x128xf32, #tpu.memory_space<vmem>>, vector<1x128x128xf32>
    %79 = vector.shape_cast %78 : vector<1x128x128xf32> to vector<128x128xf32>
    %cst_38 = arith.constant dense<0.000000e+00> : vector<16x128xf32>
    %80 = tpu.matmul %77, %79, %cst_38 {dimension_numbers = #tpu.dot_dimension_numbers<[1], [0], [0], [1], [0, 0, 1, 1], [], []>} : vector<16x128xf32>, vector<128x128xf32>, vector<16x128xf32> -> vector<16x128xf32>
    %c0_39 = arith.constant 0 : index
    %c0_40 = arith.constant 0 : index
    %c0_41 = arith.constant 0 : index
    %81 = vector.load %arg9[%c0_39, %c0_40, %c0_41] : memref<1x1x128xf32, #tpu.memory_space<vmem>>, vector<1x1x128xf32>
    %82 = vector.shape_cast %81 : vector<1x1x128xf32> to vector<1x128xf32>
    %83 = vector.broadcast %82 : vector<1x128xf32> to vector<16x128xf32>
    %84 = arith.addf %80, %83 : vector<16x128xf32>
    %c0_42 = arith.constant 0 : index
    %c0_43 = arith.constant 0 : index
    %c0_44 = arith.constant 0 : index
    %85 = vector.load %arg10[%c0_42, %c0_43, %c0_44] : memref<1x16x128xf32, #tpu.memory_space<vmem>>, vector<1x16x128xf32>
    %86 = vector.shape_cast %85 : vector<1x16x128xf32> to vector<16x128xf32>
    %87 = vector.shape_cast %84 : vector<16x128xf32> to vector<1x16x128xf32>
    tpu.vector_store %arg10[%c0_42, %c0_43, %c0_44], %87 {strides = array<i32>} : memref<1x16x128xf32, #tpu.memory_space<vmem>>, vector<1x16x128xf32>,
    return
  }
  func.func @transform_0(%arg0: i32) -> (i32, i32, i32) {
    %c0_i32 = arith.constant 0 : i32
    %c0_i32_0 = arith.constant 0 : i32
    %c0_i32_1 = arith.constant 0 : i32
    return %arg0, %c0_i32, %c0_i32_0 : i32, i32, i32
  }
  func.func @transform_1(%arg0: i32) -> (i32, i32, i32) {
    %c0_i32 = arith.constant 0 : i32
    %c0_i32_0 = arith.constant 0 : i32
    %c0_i32_1 = arith.constant 0 : i32
    return %arg0, %c0_i32, %c0_i32_0 : i32, i32, i32
  }
  func.func @transform_2(%arg0: i32) -> (i32, i32, i32) {
    %c0_i32 = arith.constant 0 : i32
    %c0_i32_0 = arith.constant 0 : i32
    %c0_i32_1 = arith.constant 0 : i32
    return %arg0, %c0_i32, %c0_i32_0 : i32, i32, i32
  }
  func.func @transform_3(%arg0: i32) -> (i32, i32, i32) {
    %c0_i32 = arith.constant 0 : i32
    %c0_i32_0 = arith.constant 0 : i32
    %c0_i32_1 = arith.constant 0 : i32
    return %arg0, %c0_i32, %c0_i32_0 : i32, i32, i32
  }
  func.func @transform_4(%arg0: i32) -> (i32, i32, i32) {
    %c0_i32 = arith.constant 0 : i32
    %c0_i32_0 = arith.constant 0 : i32
    %c0_i32_1 = arith.constant 0 : i32
    return %arg0, %c0_i32, %c0_i32_0 : i32, i32, i32
  }
  func.func @transform_5(%arg0: i32) -> (i32, i32, i32) {
    %c0_i32 = arith.constant 0 : i32
    %c0_i32_0 = arith.constant 0 : i32
    %c0_i32_1 = arith.constant 0 : i32
    return %arg0, %c0_i32, %c0_i32_0 : i32, i32, i32
  }
  func.func @transform_6(%arg0: i32) -> (i32, i32, i32) {
    %c0_i32 = arith.constant 0 : i32
    %c0_i32_0 = arith.constant 0 : i32
    %c0_i32_1 = arith.constant 0 : i32
    return %arg0, %c0_i32, %c0_i32_0 : i32, i32, i32
  }
  func.func @transform_7(%arg0: i32) -> (i32, i32, i32) {
    %c0_i32 = arith.constant 0 : i32
    %c0_i32_0 = arith.constant 0 : i32
    %c0_i32_1 = arith.constant 0 : i32
    return %arg0, %c0_i32, %c0_i32_0 : i32, i32, i32
  }
  func.func @transform_8(%arg0: i32) -> (i32, i32, i32) {
    %c0_i32 = arith.constant 0 : i32
    %c0_i32_0 = arith.constant 0 : i32
    %c0_i32_1 = arith.constant 0 : i32
    return %arg0, %c0_i32, %c0_i32_0 : i32, i32, i32
  }
  func.func @transform_9(%arg0: i32) -> (i32, i32, i32) {
    %c0_i32 = arith.constant 0 : i32
    %c0_i32_0 = arith.constant 0 : i32
    %c0_i32_1 = arith.constant 0 : i32
    return %arg0, %c0_i32, %c0_i32_0 : i32, i32, i32
  }
}

module attributes {stable_mosaic.version = 11 : i64} {
  func.func @_mapping_mlp_kernel(%arg0: i32, %arg1: memref<1x2x160xf32, #tpu.memory_space<vmem>>, %arg2: memref<1x160x128xf32, #tpu.memory_space<vmem>>, %arg3: memref<1x1x128xf32, #tpu.memory_space<vmem>>, %arg4: memref<1x2x128xf32, #tpu.memory_space<vmem>>, %arg5: memref<1x128x128xf32, #tpu.memory_space<vmem>>, %arg6: memref<1x1x128xf32, #tpu.memory_space<vmem>>, %arg7: memref<1x2x128xf32, #tpu.memory_space<vmem>>, %arg8: memref<1x128x640xf32, #tpu.memory_space<vmem>>, %arg9: memref<1x1x640xf32, #tpu.memory_space<vmem>>, %arg10: memref<1x2x640xf32, #tpu.memory_space<vmem>>) attributes {dimension_semantics = [#tpu.dimension_semantics<parallel>], iteration_bounds = array<i64: 1>, scalar_prefetch = 0 : i64, scratch_operands = 0 : i64, tpu.core_type = #tpu.core_type<tc>, window_params = [{transform_indices = @transform_0, window_bounds = array<i64: 1, 2, 160>}, {transform_indices = @transform_1, window_bounds = array<i64: 1, 160, 128>}, {transform_indices = @transform_2, window_bounds = array<i64: 1, 1, 128>}, {transform_indices = @transform_3, window_bounds = array<i64: 1, 2, 128>}, {transform_indices = @transform_4, window_bounds = array<i64: 1, 128, 128>}, {transform_indices = @transform_5, window_bounds = array<i64: 1, 1, 128>}, {transform_indices = @transform_6, window_bounds = array<i64: 1, 2, 128>}, {transform_indices = @transform_7, window_bounds = array<i64: 1, 128, 640>}, {transform_indices = @transform_8, window_bounds = array<i64: 1, 1, 640>}, {transform_indices = @transform_9, window_bounds = array<i64: 1, 2, 640>}]} {
    %c0 = arith.constant 0 : index
    %c0_0 = arith.constant 0 : index
    %c0_1 = arith.constant 0 : index
    %0 = vector.load %arg1[%c0, %c0_0, %c0_1] : memref<1x2x160xf32, #tpu.memory_space<vmem>>, vector<1x2x160xf32>
    %1 = vector.shape_cast %0 : vector<1x2x160xf32> to vector<2x160xf32>
    %c0_2 = arith.constant 0 : index
    %c0_3 = arith.constant 0 : index
    %c0_4 = arith.constant 0 : index
    %2 = vector.load %arg2[%c0_2, %c0_3, %c0_4] : memref<1x160x128xf32, #tpu.memory_space<vmem>>, vector<1x160x128xf32>
    %3 = vector.shape_cast %2 : vector<1x160x128xf32> to vector<160x128xf32>
    %cst = arith.constant dense<0.000000e+00> : vector<2x128xf32>
    %4 = tpu.matmul %1, %3, %cst {dimension_numbers = #tpu.dot_dimension_numbers<[1], [0], [0], [1], [0, 0, 1, 1], [], []>} : vector<2x160xf32>, vector<160x128xf32>, vector<2x128xf32> -> vector<2x128xf32>
    %c0_5 = arith.constant 0 : index
    %c0_6 = arith.constant 0 : index
    %c0_7 = arith.constant 0 : index
    %5 = vector.load %arg3[%c0_5, %c0_6, %c0_7] : memref<1x1x128xf32, #tpu.memory_space<vmem>>, vector<1x1x128xf32>
    %6 = vector.shape_cast %5 : vector<1x1x128xf32> to vector<1x128xf32>
    %7 = vector.broadcast %6 : vector<1x128xf32> to vector<2x128xf32>
    %8 = arith.addf %4, %7 : vector<2x128xf32>
    %c0_8 = arith.constant 0 : index
    %c0_9 = arith.constant 0 : index
    %c0_10 = arith.constant 0 : index
    %9 = vector.load %arg4[%c0_8, %c0_9, %c0_10] : memref<1x2x128xf32, #tpu.memory_space<vmem>>, vector<1x2x128xf32>
    %10 = vector.shape_cast %9 : vector<1x2x128xf32> to vector<2x128xf32>
    %11 = vector.extract_strided_slice %10 {offsets = [0, 0], sizes = [1, 128], strides = [1, 1]} : vector<2x128xf32> to vector<1x128xf32>
    %12 = vector.extract_strided_slice %10 {offsets = [1, 0], sizes = [1, 128], strides = [1, 1]} : vector<2x128xf32> to vector<1x128xf32>
    %cst_11 = arith.constant dense<0.000000e+00> : vector<2xf32>
    %13 = vector.multi_reduction <add>, %8, %cst_11 [1] : vector<2x128xf32> to vector<2xf32>
    %14 = vector.shape_cast %13 : vector<2xf32> to vector<2x1xf32>
    %cst_12 = arith.constant 1.280000e+02 : f32
    %15 = vector.broadcast %cst_12 : f32 to vector<2x1xf32>
    %16 = arith.divf %14, %15 : vector<2x1xf32>
    %17 = vector.broadcast %16 : vector<2x1xf32> to vector<2x128xf32>
    %18 = arith.subf %8, %17 : vector<2x128xf32>
    %19 = arith.mulf %18, %18 : vector<2x128xf32>
    %cst_13 = arith.constant dense<0.000000e+00> : vector<2xf32>
    %20 = vector.multi_reduction <add>, %19, %cst_13 [1] : vector<2x128xf32> to vector<2xf32>
    %21 = vector.shape_cast %20 : vector<2xf32> to vector<2x1xf32>
    %cst_14 = arith.constant 1.280000e+02 : f32
    %22 = vector.broadcast %cst_14 : f32 to vector<2x1xf32>
    %23 = arith.divf %21, %22 : vector<2x1xf32>
    %24 = vector.broadcast %16 : vector<2x1xf32> to vector<2x128xf32>
    %25 = arith.subf %8, %24 : vector<2x128xf32>
    %cst_15 = arith.constant 9.99999974E-6 : f32
    %26 = vector.broadcast %cst_15 : f32 to vector<2x1xf32>
    %27 = arith.addf %23, %26 : vector<2x1xf32>
    %28 = math.rsqrt %27 : vector<2x1xf32>
    %29 = vector.broadcast %28 : vector<2x1xf32> to vector<2x128xf32>
    %30 = arith.mulf %25, %29 : vector<2x128xf32>
    %31 = vector.broadcast %11 : vector<1x128xf32> to vector<2x128xf32>
    %32 = arith.mulf %30, %31 : vector<2x128xf32>
    %33 = vector.broadcast %12 : vector<1x128xf32> to vector<2x128xf32>
    %34 = arith.addf %32, %33 : vector<2x128xf32>
    %cst_16 = arith.constant 0.000000e+00 : f32
    %35 = vector.broadcast %cst_16 : f32 to vector<2x128xf32>
    %36 = arith.cmpf oge, %34, %35 : vector<2x128xf32>
    %cst_17 = arith.constant 0.00999999977 : f32
    %37 = vector.broadcast %cst_17 : f32 to vector<2x128xf32>
    %38 = arith.mulf %37, %34 : vector<2x128xf32>
    %39 = arith.select %36, %34, %38 : vector<2x128xi1>, vector<2x128xf32>
    %c0_18 = arith.constant 0 : index
    %c0_19 = arith.constant 0 : index
    %c0_20 = arith.constant 0 : index
    %40 = vector.load %arg5[%c0_18, %c0_19, %c0_20] : memref<1x128x128xf32, #tpu.memory_space<vmem>>, vector<1x128x128xf32>
    %41 = vector.shape_cast %40 : vector<1x128x128xf32> to vector<128x128xf32>
    %cst_21 = arith.constant dense<0.000000e+00> : vector<2x128xf32>
    %42 = tpu.matmul %39, %41, %cst_21 {dimension_numbers = #tpu.dot_dimension_numbers<[1], [0], [0], [1], [0, 0, 1, 1], [], []>} : vector<2x128xf32>, vector<128x128xf32>, vector<2x128xf32> -> vector<2x128xf32>
    %c0_22 = arith.constant 0 : index
    %c0_23 = arith.constant 0 : index
    %c0_24 = arith.constant 0 : index
    %43 = vector.load %arg6[%c0_22, %c0_23, %c0_24] : memref<1x1x128xf32, #tpu.memory_space<vmem>>, vector<1x1x128xf32>
    %44 = vector.shape_cast %43 : vector<1x1x128xf32> to vector<1x128xf32>
    %45 = vector.broadcast %44 : vector<1x128xf32> to vector<2x128xf32>
    %46 = arith.addf %42, %45 : vector<2x128xf32>
    %c0_25 = arith.constant 0 : index
    %c0_26 = arith.constant 0 : index
    %c0_27 = arith.constant 0 : index
    %47 = vector.load %arg7[%c0_25, %c0_26, %c0_27] : memref<1x2x128xf32, #tpu.memory_space<vmem>>, vector<1x2x128xf32>
    %48 = vector.shape_cast %47 : vector<1x2x128xf32> to vector<2x128xf32>
    %49 = vector.extract_strided_slice %48 {offsets = [0, 0], sizes = [1, 128], strides = [1, 1]} : vector<2x128xf32> to vector<1x128xf32>
    %50 = vector.extract_strided_slice %48 {offsets = [1, 0], sizes = [1, 128], strides = [1, 1]} : vector<2x128xf32> to vector<1x128xf32>
    %cst_28 = arith.constant dense<0.000000e+00> : vector<2xf32>
    %51 = vector.multi_reduction <add>, %46, %cst_28 [1] : vector<2x128xf32> to vector<2xf32>
    %52 = vector.shape_cast %51 : vector<2xf32> to vector<2x1xf32>
    %cst_29 = arith.constant 1.280000e+02 : f32
    %53 = vector.broadcast %cst_29 : f32 to vector<2x1xf32>
    %54 = arith.divf %52, %53 : vector<2x1xf32>
    %55 = vector.broadcast %54 : vector<2x1xf32> to vector<2x128xf32>
    %56 = arith.subf %46, %55 : vector<2x128xf32>
    %57 = arith.mulf %56, %56 : vector<2x128xf32>
    %cst_30 = arith.constant dense<0.000000e+00> : vector<2xf32>
    %58 = vector.multi_reduction <add>, %57, %cst_30 [1] : vector<2x128xf32> to vector<2xf32>
    %59 = vector.shape_cast %58 : vector<2xf32> to vector<2x1xf32>
    %cst_31 = arith.constant 1.280000e+02 : f32
    %60 = vector.broadcast %cst_31 : f32 to vector<2x1xf32>
    %61 = arith.divf %59, %60 : vector<2x1xf32>
    %62 = vector.broadcast %54 : vector<2x1xf32> to vector<2x128xf32>
    %63 = arith.subf %46, %62 : vector<2x128xf32>
    %cst_32 = arith.constant 9.99999974E-6 : f32
    %64 = vector.broadcast %cst_32 : f32 to vector<2x1xf32>
    %65 = arith.addf %61, %64 : vector<2x1xf32>
    %66 = math.rsqrt %65 : vector<2x1xf32>
    %67 = vector.broadcast %66 : vector<2x1xf32> to vector<2x128xf32>
    %68 = arith.mulf %63, %67 : vector<2x128xf32>
    %69 = vector.broadcast %49 : vector<1x128xf32> to vector<2x128xf32>
    %70 = arith.mulf %68, %69 : vector<2x128xf32>
    %71 = vector.broadcast %50 : vector<1x128xf32> to vector<2x128xf32>
    %72 = arith.addf %70, %71 : vector<2x128xf32>
    %cst_33 = arith.constant 0.000000e+00 : f32
    %73 = vector.broadcast %cst_33 : f32 to vector<2x128xf32>
    %74 = arith.cmpf oge, %72, %73 : vector<2x128xf32>
    %cst_34 = arith.constant 0.00999999977 : f32
    %75 = vector.broadcast %cst_34 : f32 to vector<2x128xf32>
    %76 = arith.mulf %75, %72 : vector<2x128xf32>
    %77 = arith.select %74, %72, %76 : vector<2x128xi1>, vector<2x128xf32>
    %c0_35 = arith.constant 0 : index
    %c0_36 = arith.constant 0 : index
    %c0_37 = arith.constant 0 : index
    %78 = vector.load %arg8[%c0_35, %c0_36, %c0_37] : memref<1x128x640xf32, #tpu.memory_space<vmem>>, vector<1x128x640xf32>
    %79 = vector.shape_cast %78 : vector<1x128x640xf32> to vector<128x640xf32>
    %cst_38 = arith.constant dense<0.000000e+00> : vector<2x640xf32>
    %80 = tpu.matmul %77, %79, %cst_38 {dimension_numbers = #tpu.dot_dimension_numbers<[1], [0], [0], [1], [0, 0, 1, 1], [], []>} : vector<2x128xf32>, vector<128x640xf32>, vector<2x640xf32> -> vector<2x640xf32>
    %c0_39 = arith.constant 0 : index
    %c0_40 = arith.constant 0 : index
    %c0_41 = arith.constant 0 : index
    %81 = vector.load %arg9[%c0_39, %c0_40, %c0_41] : memref<1x1x640xf32, #tpu.memory_space<vmem>>, vector<1x1x640xf32>
    %82 = vector.shape_cast %81 : vector<1x1x640xf32> to vector<1x640xf32>
    %83 = vector.broadcast %82 : vector<1x640xf32> to vector<2x640xf32>
    %84 = arith.addf %80, %83 : vector<2x640xf32>
    %c0_42 = arith.constant 0 : index
    %c0_43 = arith.constant 0 : index
    %c0_44 = arith.constant 0 : index
    %85 = vector.load %arg10[%c0_42, %c0_43, %c0_44] : memref<1x2x640xf32, #tpu.memory_space<vmem>>, vector<1x2x640xf32>
    %86 = vector.shape_cast %85 : vector<1x2x640xf32> to vector<2x640xf32>
    %87 = vector.shape_cast %84 : vector<2x640xf32> to vector<1x2x640xf32>
    tpu.vector_store %arg10[%c0_42, %c0_43, %c0_44], %87 {strides = array<i32>} : memref<1x2x640xf32, #tpu.memory_space<vmem>>, vector<1x2x640xf32>,
    return
  }
  func.func @transform_0(%arg0: i32) -> (i32, i32, i32) {
    %c0_i32 = arith.constant 0 : i32
    %c0_i32_0 = arith.constant 0 : i32
    %c0_i32_1 = arith.constant 0 : i32
    return %arg0, %c0_i32, %c0_i32_0 : i32, i32, i32
  }
  func.func @transform_1(%arg0: i32) -> (i32, i32, i32) {
    %c0_i32 = arith.constant 0 : i32
    %c0_i32_0 = arith.constant 0 : i32
    %c0_i32_1 = arith.constant 0 : i32
    return %arg0, %c0_i32, %c0_i32_0 : i32, i32, i32
  }
  func.func @transform_2(%arg0: i32) -> (i32, i32, i32) {
    %c0_i32 = arith.constant 0 : i32
    %c0_i32_0 = arith.constant 0 : i32
    %c0_i32_1 = arith.constant 0 : i32
    return %arg0, %c0_i32, %c0_i32_0 : i32, i32, i32
  }
  func.func @transform_3(%arg0: i32) -> (i32, i32, i32) {
    %c0_i32 = arith.constant 0 : i32
    %c0_i32_0 = arith.constant 0 : i32
    %c0_i32_1 = arith.constant 0 : i32
    return %arg0, %c0_i32, %c0_i32_0 : i32, i32, i32
  }
  func.func @transform_4(%arg0: i32) -> (i32, i32, i32) {
    %c0_i32 = arith.constant 0 : i32
    %c0_i32_0 = arith.constant 0 : i32
    %c0_i32_1 = arith.constant 0 : i32
    return %arg0, %c0_i32, %c0_i32_0 : i32, i32, i32
  }
  func.func @transform_5(%arg0: i32) -> (i32, i32, i32) {
    %c0_i32 = arith.constant 0 : i32
    %c0_i32_0 = arith.constant 0 : i32
    %c0_i32_1 = arith.constant 0 : i32
    return %arg0, %c0_i32, %c0_i32_0 : i32, i32, i32
  }
  func.func @transform_6(%arg0: i32) -> (i32, i32, i32) {
    %c0_i32 = arith.constant 0 : i32
    %c0_i32_0 = arith.constant 0 : i32
    %c0_i32_1 = arith.constant 0 : i32
    return %arg0, %c0_i32, %c0_i32_0 : i32, i32, i32
  }
  func.func @transform_7(%arg0: i32) -> (i32, i32, i32) {
    %c0_i32 = arith.constant 0 : i32
    %c0_i32_0 = arith.constant 0 : i32
    %c0_i32_1 = arith.constant 0 : i32
    return %arg0, %c0_i32, %c0_i32_0 : i32, i32, i32
  }
  func.func @transform_8(%arg0: i32) -> (i32, i32, i32) {
    %c0_i32 = arith.constant 0 : i32
    %c0_i32_0 = arith.constant 0 : i32
    %c0_i32_1 = arith.constant 0 : i32
    return %arg0, %c0_i32, %c0_i32_0 : i32, i32, i32
  }
  func.func @transform_9(%arg0: i32) -> (i32, i32, i32) {
    %c0_i32 = arith.constant 0 : i32
    %c0_i32_0 = arith.constant 0 : i32
    %c0_i32_1 = arith.constant 0 : i32
    return %arg0, %c0_i32, %c0_i32_0 : i32, i32, i32
  }
}

module attributes {stable_mosaic.version = 11 : i64} {
  func.func @_matmul_kernel(%arg0: i32, %arg1: memref<16x128xf32, #tpu.memory_space<vmem>>, %arg2: memref<128x256xf32, #tpu.memory_space<vmem>>, %arg3: memref<16x256xf32, #tpu.memory_space<vmem>>) attributes {dimension_semantics = [#tpu.dimension_semantics<arbitrary>], iteration_bounds = array<i64: 1>, scalar_prefetch = 0 : i64, scratch_operands = 0 : i64, tpu.core_type = #tpu.core_type<tc>, window_params = [{pipeline_mode = #tpu.pipeline_mode<synchronous>, transform_indices = @transform_0, window_bounds = array<i64: 16, 128>}, {pipeline_mode = #tpu.pipeline_mode<synchronous>, transform_indices = @transform_1, window_bounds = array<i64: 128, 256>}, {pipeline_mode = #tpu.pipeline_mode<synchronous>, transform_indices = @transform_2, window_bounds = array<i64: 16, 256>}]} {
    %c0 = arith.constant 0 : index
    %c0_0 = arith.constant 0 : index
    %0 = vector.load %arg1[%c0, %c0_0] : memref<16x128xf32, #tpu.memory_space<vmem>>, vector<16x128xf32>
    %c0_1 = arith.constant 0 : index
    %c0_2 = arith.constant 0 : index
    %1 = vector.load %arg2[%c0_1, %c0_2] : memref<128x256xf32, #tpu.memory_space<vmem>>, vector<128x256xf32>
    %cst = arith.constant dense<0.000000e+00> : vector<16x256xf32>
    %2 = tpu.matmul %0, %1, %cst {dimension_numbers = #tpu.dot_dimension_numbers<[1], [0], [0], [1], [0, 0, 1, 1], [], []>} : vector<16x128xf32>, vector<128x256xf32>, vector<16x256xf32> -> vector<16x256xf32>
    %c0_3 = arith.constant 0 : index
    %c0_4 = arith.constant 0 : index
    %3 = vector.load %arg3[%c0_3, %c0_4] : memref<16x256xf32, #tpu.memory_space<vmem>>, vector<16x256xf32>
    tpu.vector_store %arg3[%c0_3, %c0_4], %2 {strides = array<i32>} : memref<16x256xf32, #tpu.memory_space<vmem>>, vector<16x256xf32>,
    return
  }
  func.func @transform_0(%arg0: i32) -> (i32, i32) {
    %c0_i32 = arith.constant 0 : i32
    %c0_i32_0 = arith.constant 0 : i32
    %c0_i32_1 = arith.constant 0 : i32
    return %c0_i32, %c0_i32_0 : i32, i32
  }
  func.func @transform_1(%arg0: i32) -> (i32, i32) {
    %c0_i32 = arith.constant 0 : i32
    %c0_i32_0 = arith.constant 0 : i32
    %c0_i32_1 = arith.constant 0 : i32
    return %c0_i32, %c0_i32_0 : i32, i32
  }
  func.func @transform_2(%arg0: i32) -> (i32, i32) {
    %c0_i32 = arith.constant 0 : i32
    %c0_i32_0 = arith.constant 0 : i32
    %c0_i32_1 = arith.constant 0 : i32
    return %c0_i32, %c0_i32_0 : i32, i32
  }
}

module attributes {stable_mosaic.version = 11 : i64} {
  func.func @_fused_layer_kernel(%arg0: i32, %arg1: memref<1x13x128xf32, #tpu.memory_space<vmem>>, %arg2: memref<1x13x128xf32, #tpu.memory_space<vmem>>, %arg3: memref<6x128xf32, #tpu.memory_space<vmem>>, %arg4: memref<128x128xf32, #tpu.memory_space<vmem>>, %arg5: memref<128x256xf32, #tpu.memory_space<vmem>>, %arg6: memref<128x128xf32, #tpu.memory_space<vmem>>, %arg7: memref<128x512xf32, #tpu.memory_space<vmem>>, %arg8: memref<512x128xf32, #tpu.memory_space<vmem>>, %arg9: memref<1x13x128xf32, #tpu.memory_space<vmem>>) attributes {dimension_semantics = [#tpu.dimension_semantics<parallel>], iteration_bounds = array<i64: 2>, scalar_prefetch = 0 : i64, scratch_operands = 0 : i64, tpu.core_type = #tpu.core_type<tc>, window_params = [{transform_indices = @transform_0, window_bounds = array<i64: 1, 13, 128>}, {transform_indices = @transform_1, window_bounds = array<i64: 1, 13, 128>}, {pipeline_mode = #tpu.pipeline_mode<synchronous>, transform_indices = @transform_2, window_bounds = array<i64: 6, 128>}, {pipeline_mode = #tpu.pipeline_mode<synchronous>, transform_indices = @transform_3, window_bounds = array<i64: 128, 128>}, {pipeline_mode = #tpu.pipeline_mode<synchronous>, transform_indices = @transform_4, window_bounds = array<i64: 128, 256>}, {pipeline_mode = #tpu.pipeline_mode<synchronous>, transform_indices = @transform_5, window_bounds = array<i64: 128, 128>}, {pipeline_mode = #tpu.pipeline_mode<synchronous>, transform_indices = @transform_6, window_bounds = array<i64: 128, 512>}, {pipeline_mode = #tpu.pipeline_mode<synchronous>, transform_indices = @transform_7, window_bounds = array<i64: 512, 128>}, {transform_indices = @transform_8, window_bounds = array<i64: 1, 13, 128>}]} {
    %c0 = arith.constant 0 : index
    %c0_0 = arith.constant 0 : index
    %c0_1 = arith.constant 0 : index
    %0 = vector.load %arg1[%c0, %c0_0, %c0_1] : memref<1x13x128xf32, #tpu.memory_space<vmem>>, vector<1x13x128xf32>
    %1 = vector.shape_cast %0 : vector<1x13x128xf32> to vector<13x128xf32>
    %c0_2 = arith.constant 0 : index
    %c0_3 = arith.constant 0 : index
    %c0_4 = arith.constant 0 : index
    %2 = vector.load %arg2[%c0_2, %c0_3, %c0_4] : memref<1x13x128xf32, #tpu.memory_space<vmem>>, vector<1x13x128xf32>
    %3 = vector.shape_cast %2 : vector<1x13x128xf32> to vector<13x128xf32>
    %c0_5 = arith.constant 0 : index
    %c0_6 = arith.constant 0 : index
    %4 = vector.load %arg3[%c0_5, %c0_6] : memref<6x128xf32, #tpu.memory_space<vmem>>, vector<6x128xf32>
    %5 = vector.extract_strided_slice %4 {offsets = [0, 0], sizes = [1, 128], strides = [1, 1]} : vector<6x128xf32> to vector<1x128xf32>
    %6 = vector.extract_strided_slice %4 {offsets = [1, 0], sizes = [1, 128], strides = [1, 1]} : vector<6x128xf32> to vector<1x128xf32>
    %cst = arith.constant dense<0.000000e+00> : vector<13xf32>
    %7 = vector.multi_reduction <add>, %1, %cst [1] : vector<13x128xf32> to vector<13xf32>
    %8 = vector.shape_cast %7 : vector<13xf32> to vector<13x1xf32>
    %cst_7 = arith.constant 1.280000e+02 : f32
    %9 = vector.broadcast %cst_7 : f32 to vector<13x1xf32>
    %10 = arith.divf %8, %9 : vector<13x1xf32>
    %11 = vector.broadcast %10 : vector<13x1xf32> to vector<13x128xf32>
    %12 = arith.subf %1, %11 : vector<13x128xf32>
    %13 = arith.mulf %12, %12 : vector<13x128xf32>
    %cst_8 = arith.constant dense<0.000000e+00> : vector<13xf32>
    %14 = vector.multi_reduction <add>, %13, %cst_8 [1] : vector<13x128xf32> to vector<13xf32>
    %15 = vector.shape_cast %14 : vector<13xf32> to vector<13x1xf32>
    %cst_9 = arith.constant 1.280000e+02 : f32
    %16 = vector.broadcast %cst_9 : f32 to vector<13x1xf32>
    %17 = arith.divf %15, %16 : vector<13x1xf32>
    %18 = vector.broadcast %10 : vector<13x1xf32> to vector<13x128xf32>
    %19 = arith.subf %1, %18 : vector<13x128xf32>
    %cst_10 = arith.constant 9.99999974E-6 : f32
    %20 = vector.broadcast %cst_10 : f32 to vector<13x1xf32>
    %21 = arith.addf %17, %20 : vector<13x1xf32>
    %22 = math.rsqrt %21 : vector<13x1xf32>
    %23 = vector.broadcast %22 : vector<13x1xf32> to vector<13x128xf32>
    %24 = arith.mulf %19, %23 : vector<13x128xf32>
    %25 = vector.broadcast %5 : vector<1x128xf32> to vector<13x128xf32>
    %26 = arith.mulf %24, %25 : vector<13x128xf32>
    %27 = vector.broadcast %6 : vector<1x128xf32> to vector<13x128xf32>
    %28 = arith.addf %26, %27 : vector<13x128xf32>
    %29 = vector.extract_strided_slice %4 {offsets = [2, 0], sizes = [1, 128], strides = [1, 1]} : vector<6x128xf32> to vector<1x128xf32>
    %30 = vector.extract_strided_slice %4 {offsets = [3, 0], sizes = [1, 128], strides = [1, 1]} : vector<6x128xf32> to vector<1x128xf32>
    %cst_11 = arith.constant dense<0.000000e+00> : vector<13xf32>
    %31 = vector.multi_reduction <add>, %3, %cst_11 [1] : vector<13x128xf32> to vector<13xf32>
    %32 = vector.shape_cast %31 : vector<13xf32> to vector<13x1xf32>
    %cst_12 = arith.constant 1.280000e+02 : f32
    %33 = vector.broadcast %cst_12 : f32 to vector<13x1xf32>
    %34 = arith.divf %32, %33 : vector<13x1xf32>
    %35 = vector.broadcast %34 : vector<13x1xf32> to vector<13x128xf32>
    %36 = arith.subf %3, %35 : vector<13x128xf32>
    %37 = arith.mulf %36, %36 : vector<13x128xf32>
    %cst_13 = arith.constant dense<0.000000e+00> : vector<13xf32>
    %38 = vector.multi_reduction <add>, %37, %cst_13 [1] : vector<13x128xf32> to vector<13xf32>
    %39 = vector.shape_cast %38 : vector<13xf32> to vector<13x1xf32>
    %cst_14 = arith.constant 1.280000e+02 : f32
    %40 = vector.broadcast %cst_14 : f32 to vector<13x1xf32>
    %41 = arith.divf %39, %40 : vector<13x1xf32>
    %42 = vector.broadcast %34 : vector<13x1xf32> to vector<13x128xf32>
    %43 = arith.subf %3, %42 : vector<13x128xf32>
    %cst_15 = arith.constant 9.99999974E-6 : f32
    %44 = vector.broadcast %cst_15 : f32 to vector<13x1xf32>
    %45 = arith.addf %41, %44 : vector<13x1xf32>
    %46 = math.rsqrt %45 : vector<13x1xf32>
    %47 = vector.broadcast %46 : vector<13x1xf32> to vector<13x128xf32>
    %48 = arith.mulf %43, %47 : vector<13x128xf32>
    %49 = vector.broadcast %29 : vector<1x128xf32> to vector<13x128xf32>
    %50 = arith.mulf %48, %49 : vector<13x128xf32>
    %51 = vector.broadcast %30 : vector<1x128xf32> to vector<13x128xf32>
    %52 = arith.addf %50, %51 : vector<13x128xf32>
    %c0_16 = arith.constant 0 : index
    %c0_17 = arith.constant 0 : index
    %53 = vector.load %arg4[%c0_16, %c0_17] : memref<128x128xf32, #tpu.memory_space<vmem>>, vector<128x128xf32>
    %cst_18 = arith.constant dense<0.000000e+00> : vector<13x128xf32>
    %54 = tpu.matmul %52, %53, %cst_18 {dimension_numbers = #tpu.dot_dimension_numbers<[1], [0], [0], [1], [0, 0, 1, 1], [], []>} : vector<13x128xf32>, vector<128x128xf32>, vector<13x128xf32> -> vector<13x128xf32>
    %cst_19 = arith.constant 0.176776692 : f32
    %55 = vector.broadcast %cst_19 : f32 to vector<13x128xf32>
    %56 = arith.mulf %54, %55 : vector<13x128xf32>
    %c0_20 = arith.constant 0 : index
    %c0_21 = arith.constant 0 : index
    %57 = vector.load %arg5[%c0_20, %c0_21] : memref<128x256xf32, #tpu.memory_space<vmem>>, vector<128x128xf32>
    %c0_22 = arith.constant 0 : index
    %c128 = arith.constant 128 : index
    %58 = vector.load %arg5[%c0_22, %c128] : memref<128x256xf32, #tpu.memory_space<vmem>>, vector<128x128xf32>
    %cst_23 = arith.constant dense<0.000000e+00> : vector<13x128xf32>
    %59 = tpu.matmul %28, %57, %cst_23 {dimension_numbers = #tpu.dot_dimension_numbers<[1], [0], [0], [1], [0, 0, 1, 1], [], []>} : vector<13x128xf32>, vector<128x128xf32>, vector<13x128xf32> -> vector<13x128xf32>
    %cst_24 = arith.constant dense<0.000000e+00> : vector<13x128xf32>
    %60 = tpu.matmul %28, %58, %cst_24 {dimension_numbers = #tpu.dot_dimension_numbers<[1], [0], [0], [1], [0, 0, 1, 1], [], []>} : vector<13x128xf32>, vector<128x128xf32>, vector<13x128xf32> -> vector<13x128xf32>
    %cst_25 = arith.constant dense<0.000000e+00> : vector<13x128xf32>
    %61 = tpu.matmul %52, %57, %cst_25 {dimension_numbers = #tpu.dot_dimension_numbers<[1], [0], [0], [1], [0, 0, 1, 1], [], []>} : vector<13x128xf32>, vector<128x128xf32>, vector<13x128xf32> -> vector<13x128xf32>
    %cst_26 = arith.constant dense<0.000000e+00> : vector<13x128xf32>
    %62 = tpu.matmul %52, %58, %cst_26 {dimension_numbers = #tpu.dot_dimension_numbers<[1], [0], [0], [1], [0, 0, 1, 1], [], []>} : vector<13x128xf32>, vector<128x128xf32>, vector<13x128xf32> -> vector<13x128xf32>
    %63 = vector.extract_strided_slice %56 {offsets = [0, 0], sizes = [13, 32], strides = [1, 1]} : vector<13x128xf32> to vector<13x32xf32>
    %64 = vector.extract_strided_slice %59 {offsets = [0, 0], sizes = [13, 32], strides = [1, 1]} : vector<13x128xf32> to vector<13x32xf32>
    %cst_27 = arith.constant dense<0.000000e+00> : vector<13x13xf32>
    %65 = tpu.matmul %63, %64, %cst_27 {dimension_numbers = #tpu.dot_dimension_numbers<[1], [1], [0], [0], [0, 0, 1, 0], [], []>} : vector<13x32xf32>, vector<13x32xf32>, vector<13x13xf32> -> vector<13x13xf32>
    %66 = vector.extract_strided_slice %61 {offsets = [0, 0], sizes = [13, 32], strides = [1, 1]} : vector<13x128xf32> to vector<13x32xf32>
    %cst_28 = arith.constant dense<0.000000e+00> : vector<13x13xf32>
    %67 = tpu.matmul %63, %66, %cst_28 {dimension_numbers = #tpu.dot_dimension_numbers<[1], [1], [0], [0], [0, 0, 1, 0], [], []>} : vector<13x32xf32>, vector<13x32xf32>, vector<13x13xf32> -> vector<13x13xf32>
    %cst_29 = arith.constant dense<0xFF800000> : vector<13xf32>
    %68 = vector.multi_reduction <maximumf>, %65, %cst_29 [1] : vector<13x13xf32> to vector<13xf32>
    %69 = vector.shape_cast %68 : vector<13xf32> to vector<13x1xf32>
    %cst_30 = arith.constant dense<0xFF800000> : vector<13xf32>
    %70 = vector.multi_reduction <maximumf>, %67, %cst_30 [1] : vector<13x13xf32> to vector<13xf32>
    %71 = vector.shape_cast %70 : vector<13xf32> to vector<13x1xf32>
    %72 = arith.maximumf %69, %71 : vector<13x1xf32>
    %73 = vector.broadcast %72 : vector<13x1xf32> to vector<13x13xf32>
    %74 = arith.subf %65, %73 : vector<13x13xf32>
    %75 = math.exp %74 : vector<13x13xf32>
    %76 = vector.broadcast %72 : vector<13x1xf32> to vector<13x13xf32>
    %77 = arith.subf %67, %76 : vector<13x13xf32>
    %78 = math.exp %77 : vector<13x13xf32>
    %cst_31 = arith.constant dense<0.000000e+00> : vector<13xf32>
    %79 = vector.multi_reduction <add>, %75, %cst_31 [1] : vector<13x13xf32> to vector<13xf32>
    %80 = vector.shape_cast %79 : vector<13xf32> to vector<13x1xf32>
    %cst_32 = arith.constant dense<0.000000e+00> : vector<13xf32>
    %81 = vector.multi_reduction <add>, %78, %cst_32 [1] : vector<13x13xf32> to vector<13xf32>
    %82 = vector.shape_cast %81 : vector<13xf32> to vector<13x1xf32>
    %83 = arith.addf %80, %82 : vector<13x1xf32>
    %84 = vector.extract_strided_slice %60 {offsets = [0, 0], sizes = [13, 32], strides = [1, 1]} : vector<13x128xf32> to vector<13x32xf32>
    %cst_33 = arith.constant dense<0.000000e+00> : vector<13x32xf32>
    %85 = tpu.matmul %75, %84, %cst_33 {dimension_numbers = #tpu.dot_dimension_numbers<[1], [0], [0], [1], [0, 0, 1, 1], [], []>} : vector<13x13xf32>, vector<13x32xf32>, vector<13x32xf32> -> vector<13x32xf32>
    %86 = vector.extract_strided_slice %62 {offsets = [0, 0], sizes = [13, 32], strides = [1, 1]} : vector<13x128xf32> to vector<13x32xf32>
    %cst_34 = arith.constant dense<0.000000e+00> : vector<13x32xf32>
    %87 = tpu.matmul %78, %86, %cst_34 {dimension_numbers = #tpu.dot_dimension_numbers<[1], [0], [0], [1], [0, 0, 1, 1], [], []>} : vector<13x13xf32>, vector<13x32xf32>, vector<13x32xf32> -> vector<13x32xf32>
    %88 = arith.addf %85, %87 : vector<13x32xf32>
    %89 = tpu.reciprocal %83 {approx = true} : vector<13x1xf32> -> vector<13x1xf32>
    %90 = vector.broadcast %89 : vector<13x1xf32> to vector<13x32xf32>
    %91 = arith.mulf %88, %90 : vector<13x32xf32>
    %c0_35 = arith.constant 0 : index
    %c0_36 = arith.constant 0 : index
    %92 = vector.load %arg6[%c0_35, %c0_36] : memref<128x128xf32, #tpu.memory_space<vmem>>, vector<32x128xf32>
    %cst_37 = arith.constant dense<0.000000e+00> : vector<13x128xf32>
    %93 = tpu.matmul %91, %92, %cst_37 {dimension_numbers = #tpu.dot_dimension_numbers<[1], [0], [0], [1], [0, 0, 1, 1], [], []>} : vector<13x32xf32>, vector<32x128xf32>, vector<13x128xf32> -> vector<13x128xf32>
    %94 = vector.extract_strided_slice %56 {offsets = [0, 32], sizes = [13, 32], strides = [1, 1]} : vector<13x128xf32> to vector<13x32xf32>
    %95 = vector.extract_strided_slice %59 {offsets = [0, 32], sizes = [13, 32], strides = [1, 1]} : vector<13x128xf32> to vector<13x32xf32>
    %cst_38 = arith.constant dense<0.000000e+00> : vector<13x13xf32>
    %96 = tpu.matmul %94, %95, %cst_38 {dimension_numbers = #tpu.dot_dimension_numbers<[1], [1], [0], [0], [0, 0, 1, 0], [], []>} : vector<13x32xf32>, vector<13x32xf32>, vector<13x13xf32> -> vector<13x13xf32>
    %97 = vector.extract_strided_slice %61 {offsets = [0, 32], sizes = [13, 32], strides = [1, 1]} : vector<13x128xf32> to vector<13x32xf32>
    %cst_39 = arith.constant dense<0.000000e+00> : vector<13x13xf32>
    %98 = tpu.matmul %94, %97, %cst_39 {dimension_numbers = #tpu.dot_dimension_numbers<[1], [1], [0], [0], [0, 0, 1, 0], [], []>} : vector<13x32xf32>, vector<13x32xf32>, vector<13x13xf32> -> vector<13x13xf32>
    %cst_40 = arith.constant dense<0xFF800000> : vector<13xf32>
    %99 = vector.multi_reduction <maximumf>, %96, %cst_40 [1] : vector<13x13xf32> to vector<13xf32>
    %100 = vector.shape_cast %99 : vector<13xf32> to vector<13x1xf32>
    %cst_41 = arith.constant dense<0xFF800000> : vector<13xf32>
    %101 = vector.multi_reduction <maximumf>, %98, %cst_41 [1] : vector<13x13xf32> to vector<13xf32>
    %102 = vector.shape_cast %101 : vector<13xf32> to vector<13x1xf32>
    %103 = arith.maximumf %100, %102 : vector<13x1xf32>
    %104 = vector.broadcast %103 : vector<13x1xf32> to vector<13x13xf32>
    %105 = arith.subf %96, %104 : vector<13x13xf32>
    %106 = math.exp %105 : vector<13x13xf32>
    %107 = vector.broadcast %103 : vector<13x1xf32> to vector<13x13xf32>
    %108 = arith.subf %98, %107 : vector<13x13xf32>
    %109 = math.exp %108 : vector<13x13xf32>
    %cst_42 = arith.constant dense<0.000000e+00> : vector<13xf32>
    %110 = vector.multi_reduction <add>, %106, %cst_42 [1] : vector<13x13xf32> to vector<13xf32>
    %111 = vector.shape_cast %110 : vector<13xf32> to vector<13x1xf32>
    %cst_43 = arith.constant dense<0.000000e+00> : vector<13xf32>
    %112 = vector.multi_reduction <add>, %109, %cst_43 [1] : vector<13x13xf32> to vector<13xf32>
    %113 = vector.shape_cast %112 : vector<13xf32> to vector<13x1xf32>
    %114 = arith.addf %111, %113 : vector<13x1xf32>
    %115 = vector.extract_strided_slice %60 {offsets = [0, 32], sizes = [13, 32], strides = [1, 1]} : vector<13x128xf32> to vector<13x32xf32>
    %cst_44 = arith.constant dense<0.000000e+00> : vector<13x32xf32>
    %116 = tpu.matmul %106, %115, %cst_44 {dimension_numbers = #tpu.dot_dimension_numbers<[1], [0], [0], [1], [0, 0, 1, 1], [], []>} : vector<13x13xf32>, vector<13x32xf32>, vector<13x32xf32> -> vector<13x32xf32>
    %117 = vector.extract_strided_slice %62 {offsets = [0, 32], sizes = [13, 32], strides = [1, 1]} : vector<13x128xf32> to vector<13x32xf32>
    %cst_45 = arith.constant dense<0.000000e+00> : vector<13x32xf32>
    %118 = tpu.matmul %109, %117, %cst_45 {dimension_numbers = #tpu.dot_dimension_numbers<[1], [0], [0], [1], [0, 0, 1, 1], [], []>} : vector<13x13xf32>, vector<13x32xf32>, vector<13x32xf32> -> vector<13x32xf32>
    %119 = arith.addf %116, %118 : vector<13x32xf32>
    %120 = tpu.reciprocal %114 {approx = true} : vector<13x1xf32> -> vector<13x1xf32>
    %121 = vector.broadcast %120 : vector<13x1xf32> to vector<13x32xf32>
    %122 = arith.mulf %119, %121 : vector<13x32xf32>
    %c32 = arith.constant 32 : index
    %c0_46 = arith.constant 0 : index
    %123 = vector.load %arg6[%c32, %c0_46] : memref<128x128xf32, #tpu.memory_space<vmem>>, vector<32x128xf32>
    %cst_47 = arith.constant dense<0.000000e+00> : vector<13x128xf32>
    %124 = tpu.matmul %122, %123, %cst_47 {dimension_numbers = #tpu.dot_dimension_numbers<[1], [0], [0], [1], [0, 0, 1, 1], [], []>} : vector<13x32xf32>, vector<32x128xf32>, vector<13x128xf32> -> vector<13x128xf32>
    %125 = arith.addf %93, %124 : vector<13x128xf32>
    %126 = vector.extract_strided_slice %56 {offsets = [0, 64], sizes = [13, 32], strides = [1, 1]} : vector<13x128xf32> to vector<13x32xf32>
    %127 = vector.extract_strided_slice %59 {offsets = [0, 64], sizes = [13, 32], strides = [1, 1]} : vector<13x128xf32> to vector<13x32xf32>
    %cst_48 = arith.constant dense<0.000000e+00> : vector<13x13xf32>
    %128 = tpu.matmul %126, %127, %cst_48 {dimension_numbers = #tpu.dot_dimension_numbers<[1], [1], [0], [0], [0, 0, 1, 0], [], []>} : vector<13x32xf32>, vector<13x32xf32>, vector<13x13xf32> -> vector<13x13xf32>
    %129 = vector.extract_strided_slice %61 {offsets = [0, 64], sizes = [13, 32], strides = [1, 1]} : vector<13x128xf32> to vector<13x32xf32>
    %cst_49 = arith.constant dense<0.000000e+00> : vector<13x13xf32>
    %130 = tpu.matmul %126, %129, %cst_49 {dimension_numbers = #tpu.dot_dimension_numbers<[1], [1], [0], [0], [0, 0, 1, 0], [], []>} : vector<13x32xf32>, vector<13x32xf32>, vector<13x13xf32> -> vector<13x13xf32>
    %cst_50 = arith.constant dense<0xFF800000> : vector<13xf32>
    %131 = vector.multi_reduction <maximumf>, %128, %cst_50 [1] : vector<13x13xf32> to vector<13xf32>
    %132 = vector.shape_cast %131 : vector<13xf32> to vector<13x1xf32>
    %cst_51 = arith.constant dense<0xFF800000> : vector<13xf32>
    %133 = vector.multi_reduction <maximumf>, %130, %cst_51 [1] : vector<13x13xf32> to vector<13xf32>
    %134 = vector.shape_cast %133 : vector<13xf32> to vector<13x1xf32>
    %135 = arith.maximumf %132, %134 : vector<13x1xf32>
    %136 = vector.broadcast %135 : vector<13x1xf32> to vector<13x13xf32>
    %137 = arith.subf %128, %136 : vector<13x13xf32>
    %138 = math.exp %137 : vector<13x13xf32>
    %139 = vector.broadcast %135 : vector<13x1xf32> to vector<13x13xf32>
    %140 = arith.subf %130, %139 : vector<13x13xf32>
    %141 = math.exp %140 : vector<13x13xf32>
    %cst_52 = arith.constant dense<0.000000e+00> : vector<13xf32>
    %142 = vector.multi_reduction <add>, %138, %cst_52 [1] : vector<13x13xf32> to vector<13xf32>
    %143 = vector.shape_cast %142 : vector<13xf32> to vector<13x1xf32>
    %cst_53 = arith.constant dense<0.000000e+00> : vector<13xf32>
    %144 = vector.multi_reduction <add>, %141, %cst_53 [1] : vector<13x13xf32> to vector<13xf32>
    %145 = vector.shape_cast %144 : vector<13xf32> to vector<13x1xf32>
    %146 = arith.addf %143, %145 : vector<13x1xf32>
    %147 = vector.extract_strided_slice %60 {offsets = [0, 64], sizes = [13, 32], strides = [1, 1]} : vector<13x128xf32> to vector<13x32xf32>
    %cst_54 = arith.constant dense<0.000000e+00> : vector<13x32xf32>
    %148 = tpu.matmul %138, %147, %cst_54 {dimension_numbers = #tpu.dot_dimension_numbers<[1], [0], [0], [1], [0, 0, 1, 1], [], []>} : vector<13x13xf32>, vector<13x32xf32>, vector<13x32xf32> -> vector<13x32xf32>
    %149 = vector.extract_strided_slice %62 {offsets = [0, 64], sizes = [13, 32], strides = [1, 1]} : vector<13x128xf32> to vector<13x32xf32>
    %cst_55 = arith.constant dense<0.000000e+00> : vector<13x32xf32>
    %150 = tpu.matmul %141, %149, %cst_55 {dimension_numbers = #tpu.dot_dimension_numbers<[1], [0], [0], [1], [0, 0, 1, 1], [], []>} : vector<13x13xf32>, vector<13x32xf32>, vector<13x32xf32> -> vector<13x32xf32>
    %151 = arith.addf %148, %150 : vector<13x32xf32>
    %152 = tpu.reciprocal %146 {approx = true} : vector<13x1xf32> -> vector<13x1xf32>
    %153 = vector.broadcast %152 : vector<13x1xf32> to vector<13x32xf32>
    %154 = arith.mulf %151, %153 : vector<13x32xf32>
    %c64 = arith.constant 64 : index
    %c0_56 = arith.constant 0 : index
    %155 = vector.load %arg6[%c64, %c0_56] : memref<128x128xf32, #tpu.memory_space<vmem>>, vector<32x128xf32>
    %cst_57 = arith.constant dense<0.000000e+00> : vector<13x128xf32>
    %156 = tpu.matmul %154, %155, %cst_57 {dimension_numbers = #tpu.dot_dimension_numbers<[1], [0], [0], [1], [0, 0, 1, 1], [], []>} : vector<13x32xf32>, vector<32x128xf32>, vector<13x128xf32> -> vector<13x128xf32>
    %157 = arith.addf %125, %156 : vector<13x128xf32>
    %158 = vector.extract_strided_slice %56 {offsets = [0, 96], sizes = [13, 32], strides = [1, 1]} : vector<13x128xf32> to vector<13x32xf32>
    %159 = vector.extract_strided_slice %59 {offsets = [0, 96], sizes = [13, 32], strides = [1, 1]} : vector<13x128xf32> to vector<13x32xf32>
    %cst_58 = arith.constant dense<0.000000e+00> : vector<13x13xf32>
    %160 = tpu.matmul %158, %159, %cst_58 {dimension_numbers = #tpu.dot_dimension_numbers<[1], [1], [0], [0], [0, 0, 1, 0], [], []>} : vector<13x32xf32>, vector<13x32xf32>, vector<13x13xf32> -> vector<13x13xf32>
    %161 = vector.extract_strided_slice %61 {offsets = [0, 96], sizes = [13, 32], strides = [1, 1]} : vector<13x128xf32> to vector<13x32xf32>
    %cst_59 = arith.constant dense<0.000000e+00> : vector<13x13xf32>
    %162 = tpu.matmul %158, %161, %cst_59 {dimension_numbers = #tpu.dot_dimension_numbers<[1], [1], [0], [0], [0, 0, 1, 0], [], []>} : vector<13x32xf32>, vector<13x32xf32>, vector<13x13xf32> -> vector<13x13xf32>
    %cst_60 = arith.constant dense<0xFF800000> : vector<13xf32>
    %163 = vector.multi_reduction <maximumf>, %160, %cst_60 [1] : vector<13x13xf32> to vector<13xf32>
    %164 = vector.shape_cast %163 : vector<13xf32> to vector<13x1xf32>
    %cst_61 = arith.constant dense<0xFF800000> : vector<13xf32>
    %165 = vector.multi_reduction <maximumf>, %162, %cst_61 [1] : vector<13x13xf32> to vector<13xf32>
    %166 = vector.shape_cast %165 : vector<13xf32> to vector<13x1xf32>
    %167 = arith.maximumf %164, %166 : vector<13x1xf32>
    %168 = vector.broadcast %167 : vector<13x1xf32> to vector<13x13xf32>
    %169 = arith.subf %160, %168 : vector<13x13xf32>
    %170 = math.exp %169 : vector<13x13xf32>
    %171 = vector.broadcast %167 : vector<13x1xf32> to vector<13x13xf32>
    %172 = arith.subf %162, %171 : vector<13x13xf32>
    %173 = math.exp %172 : vector<13x13xf32>
    %cst_62 = arith.constant dense<0.000000e+00> : vector<13xf32>
    %174 = vector.multi_reduction <add>, %170, %cst_62 [1] : vector<13x13xf32> to vector<13xf32>
    %175 = vector.shape_cast %174 : vector<13xf32> to vector<13x1xf32>
    %cst_63 = arith.constant dense<0.000000e+00> : vector<13xf32>
    %176 = vector.multi_reduction <add>, %173, %cst_63 [1] : vector<13x13xf32> to vector<13xf32>
    %177 = vector.shape_cast %176 : vector<13xf32> to vector<13x1xf32>
    %178 = arith.addf %175, %177 : vector<13x1xf32>
    %179 = vector.extract_strided_slice %60 {offsets = [0, 96], sizes = [13, 32], strides = [1, 1]} : vector<13x128xf32> to vector<13x32xf32>
    %cst_64 = arith.constant dense<0.000000e+00> : vector<13x32xf32>
    %180 = tpu.matmul %170, %179, %cst_64 {dimension_numbers = #tpu.dot_dimension_numbers<[1], [0], [0], [1], [0, 0, 1, 1], [], []>} : vector<13x13xf32>, vector<13x32xf32>, vector<13x32xf32> -> vector<13x32xf32>
    %181 = vector.extract_strided_slice %62 {offsets = [0, 96], sizes = [13, 32], strides = [1, 1]} : vector<13x128xf32> to vector<13x32xf32>
    %cst_65 = arith.constant dense<0.000000e+00> : vector<13x32xf32>
    %182 = tpu.matmul %173, %181, %cst_65 {dimension_numbers = #tpu.dot_dimension_numbers<[1], [0], [0], [1], [0, 0, 1, 1], [], []>} : vector<13x13xf32>, vector<13x32xf32>, vector<13x32xf32> -> vector<13x32xf32>
    %183 = arith.addf %180, %182 : vector<13x32xf32>
    %184 = tpu.reciprocal %178 {approx = true} : vector<13x1xf32> -> vector<13x1xf32>
    %185 = vector.broadcast %184 : vector<13x1xf32> to vector<13x32xf32>
    %186 = arith.mulf %183, %185 : vector<13x32xf32>
    %c96 = arith.constant 96 : index
    %c0_66 = arith.constant 0 : index
    %187 = vector.load %arg6[%c96, %c0_66] : memref<128x128xf32, #tpu.memory_space<vmem>>, vector<32x128xf32>
    %cst_67 = arith.constant dense<0.000000e+00> : vector<13x128xf32>
    %188 = tpu.matmul %186, %187, %cst_67 {dimension_numbers = #tpu.dot_dimension_numbers<[1], [0], [0], [1], [0, 0, 1, 1], [], []>} : vector<13x32xf32>, vector<32x128xf32>, vector<13x128xf32> -> vector<13x128xf32>
    %189 = arith.addf %157, %188 : vector<13x128xf32>
    %190 = arith.addf %3, %189 : vector<13x128xf32>
    %191 = vector.extract_strided_slice %4 {offsets = [4, 0], sizes = [1, 128], strides = [1, 1]} : vector<6x128xf32> to vector<1x128xf32>
    %192 = vector.extract_strided_slice %4 {offsets = [5, 0], sizes = [1, 128], strides = [1, 1]} : vector<6x128xf32> to vector<1x128xf32>
    %cst_68 = arith.constant dense<0.000000e+00> : vector<13xf32>
    %193 = vector.multi_reduction <add>, %190, %cst_68 [1] : vector<13x128xf32> to vector<13xf32>
    %194 = vector.shape_cast %193 : vector<13xf32> to vector<13x1xf32>
    %cst_69 = arith.constant 1.280000e+02 : f32
    %195 = vector.broadcast %cst_69 : f32 to vector<13x1xf32>
    %196 = arith.divf %194, %195 : vector<13x1xf32>
    %197 = vector.broadcast %196 : vector<13x1xf32> to vector<13x128xf32>
    %198 = arith.subf %190, %197 : vector<13x128xf32>
    %199 = arith.mulf %198, %198 : vector<13x128xf32>
    %cst_70 = arith.constant dense<0.000000e+00> : vector<13xf32>
    %200 = vector.multi_reduction <add>, %199, %cst_70 [1] : vector<13x128xf32> to vector<13xf32>
    %201 = vector.shape_cast %200 : vector<13xf32> to vector<13x1xf32>
    %cst_71 = arith.constant 1.280000e+02 : f32
    %202 = vector.broadcast %cst_71 : f32 to vector<13x1xf32>
    %203 = arith.divf %201, %202 : vector<13x1xf32>
    %204 = vector.broadcast %196 : vector<13x1xf32> to vector<13x128xf32>
    %205 = arith.subf %190, %204 : vector<13x128xf32>
    %cst_72 = arith.constant 9.99999974E-6 : f32
    %206 = vector.broadcast %cst_72 : f32 to vector<13x1xf32>
    %207 = arith.addf %203, %206 : vector<13x1xf32>
    %208 = math.rsqrt %207 : vector<13x1xf32>
    %209 = vector.broadcast %208 : vector<13x1xf32> to vector<13x128xf32>
    %210 = arith.mulf %205, %209 : vector<13x128xf32>
    %211 = vector.broadcast %191 : vector<1x128xf32> to vector<13x128xf32>
    %212 = arith.mulf %210, %211 : vector<13x128xf32>
    %213 = vector.broadcast %192 : vector<1x128xf32> to vector<13x128xf32>
    %214 = arith.addf %212, %213 : vector<13x128xf32>
    %c0_73 = arith.constant 0 : index
    %c0_74 = arith.constant 0 : index
    %215 = vector.load %arg7[%c0_73, %c0_74] : memref<128x512xf32, #tpu.memory_space<vmem>>, vector<128x512xf32>
    %cst_75 = arith.constant dense<0.000000e+00> : vector<13x512xf32>
    %216 = tpu.matmul %214, %215, %cst_75 {dimension_numbers = #tpu.dot_dimension_numbers<[1], [0], [0], [1], [0, 0, 1, 1], [], []>} : vector<13x128xf32>, vector<128x512xf32>, vector<13x512xf32> -> vector<13x512xf32>
    %cst_76 = arith.constant 5.000000e-01 : f32
    %217 = vector.broadcast %cst_76 : f32 to vector<13x512xf32>
    %218 = arith.mulf %217, %216 : vector<13x512xf32>
    %cst_77 = arith.constant 0.707106769 : f32
    %219 = vector.broadcast %cst_77 : f32 to vector<13x512xf32>
    %220 = arith.mulf %216, %219 : vector<13x512xf32>
    %221 = math.erf %220 : vector<13x512xf32>
    %cst_78 = arith.constant 1.000000e+00 : f32
    %222 = vector.broadcast %cst_78 : f32 to vector<13x512xf32>
    %223 = arith.addf %222, %221 : vector<13x512xf32>
    %224 = arith.mulf %218, %223 : vector<13x512xf32>
    %c0_79 = arith.constant 0 : index
    %c0_80 = arith.constant 0 : index
    %225 = vector.load %arg8[%c0_79, %c0_80] : memref<512x128xf32, #tpu.memory_space<vmem>>, vector<512x128xf32>
    %cst_81 = arith.constant dense<0.000000e+00> : vector<13x128xf32>
    %226 = tpu.matmul %224, %225, %cst_81 {dimension_numbers = #tpu.dot_dimension_numbers<[1], [0], [0], [1], [0, 0, 1, 1], [], []>} : vector<13x512xf32>, vector<512x128xf32>, vector<13x128xf32> -> vector<13x128xf32>
    %227 = arith.addf %190, %226 : vector<13x128xf32>
    %c0_82 = arith.constant 0 : index
    %c0_83 = arith.constant 0 : index
    %c0_84 = arith.constant 0 : index
    %228 = vector.load %arg9[%c0_82, %c0_83, %c0_84] : memref<1x13x128xf32, #tpu.memory_space<vmem>>, vector<1x13x128xf32>
    %229 = vector.shape_cast %228 : vector<1x13x128xf32> to vector<13x128xf32>
    %230 = vector.shape_cast %227 : vector<13x128xf32> to vector<1x13x128xf32>
    tpu.vector_store %arg9[%c0_82, %c0_83, %c0_84], %230 {strides = array<i32>} : memref<1x13x128xf32, #tpu.memory_space<vmem>>, vector<1x13x128xf32>,
    return
  }
  func.func @transform_0(%arg0: i32) -> (i32, i32, i32) {
    %c0_i32 = arith.constant 0 : i32
    %c0_i32_0 = arith.constant 0 : i32
    %c0_i32_1 = arith.constant 0 : i32
    return %arg0, %c0_i32, %c0_i32_0 : i32, i32, i32
  }
  func.func @transform_1(%arg0: i32) -> (i32, i32, i32) {
    %c0_i32 = arith.constant 0 : i32
    %c0_i32_0 = arith.constant 0 : i32
    %c0_i32_1 = arith.constant 0 : i32
    return %arg0, %c0_i32, %c0_i32_0 : i32, i32, i32
  }
  func.func @transform_2(%arg0: i32) -> (i32, i32) {
    %c0_i32 = arith.constant 0 : i32
    %c0_i32_0 = arith.constant 0 : i32
    %c0_i32_1 = arith.constant 0 : i32
    return %c0_i32, %c0_i32_0 : i32, i32
  }
  func.func @transform_3(%arg0: i32) -> (i32, i32) {
    %c0_i32 = arith.constant 0 : i32
    %c0_i32_0 = arith.constant 0 : i32
    %c0_i32_1 = arith.constant 0 : i32
    return %c0_i32, %c0_i32_0 : i32, i32
  }
  func.func @transform_4(%arg0: i32) -> (i32, i32) {
    %c0_i32 = arith.constant 0 : i32
    %c0_i32_0 = arith.constant 0 : i32
    %c0_i32_1 = arith.constant 0 : i32
    return %c0_i32, %c0_i32_0 : i32, i32
  }
  func.func @transform_5(%arg0: i32) -> (i32, i32) {
    %c0_i32 = arith.constant 0 : i32
    %c0_i32_0 = arith.constant 0 : i32
    %c0_i32_1 = arith.constant 0 : i32
    return %c0_i32, %c0_i32_0 : i32, i32
  }
  func.func @transform_6(%arg0: i32) -> (i32, i32) {
    %c0_i32 = arith.constant 0 : i32
    %c0_i32_0 = arith.constant 0 : i32
    %c0_i32_1 = arith.constant 0 : i32
    return %c0_i32, %c0_i32_0 : i32, i32
  }
  func.func @transform_7(%arg0: i32) -> (i32, i32) {
    %c0_i32 = arith.constant 0 : i32
    %c0_i32_0 = arith.constant 0 : i32
    %c0_i32_1 = arith.constant 0 : i32
    return %c0_i32, %c0_i32_0 : i32, i32
  }
  func.func @transform_8(%arg0: i32) -> (i32, i32, i32) {
    %c0_i32 = arith.constant 0 : i32
    %c0_i32_0 = arith.constant 0 : i32
    %c0_i32_1 = arith.constant 0 : i32
    return %arg0, %c0_i32, %c0_i32_0 : i32, i32, i32
  }
}

</mosaic_0001>

<bundles_post_ra>
// kernel: squeeze.6
= control target key start
LH: loop header
LB: loop body
LE: loop exit
PB: predicated region body
PF: predicated region fallthrough
CT: control target
= control target key end

     0   :  { %s94_s0 = inlined_call_operand.vmem [shape: f32[1,2,640], index: 0, kind: input, shape index: {}]   ;;  %s95_s1 = inlined_call_operand.vmem [shape: f32[2,5,128], index: 1, kind: output, shape index: {}]  }
   0x1   :  { %v46_v0 = vld [vmem:[%s94_s0 + $0x8] sm:$0x3]  ;;  %v47_v1 = vld [vmem:[%s94_s0 + $0x6] sm:$0x3]  ;;  %v48_v2 = vld [vmem:[%s94_s0 + $0x4] sm:$0x3] }
   0x2   :  { %8 = vst [vmem:[#allocation0 + $0x20] sm:$0x3] %v46_v0  ;;  %13 = vst [vmem:[#allocation0 + $0x18] sm:$0x3] %v47_v1  ;;  %v49_v3 = vld [vmem:[%s94_s0 + $0x2] sm:$0x3] }
   0x3   :  { %18 = vst [vmem:[#allocation0 + $0x10] sm:$0x3] %v48_v2  ;;  %v23_v4 = vld [vmem:[%s94_s0] sm:$0x3]  ;;  %22 = vst [vmem:[#allocation0 + $0x8] sm:$0x3] %v49_v3 }
   0x4   :  { %24 = vst [vmem:[#allocation0] sm:$0x3] %v23_v4 }
   0x9   :  { %v36_v6 = vld [vmem:[#allocation0 + $0x18] sm:$0x3]   ;;  %v40_v7 = vld [vmem:[#allocation0 + $0x20] sm:$0x3]  }
   0xa   :  { %v32_v5 = vld [vmem:[#allocation0 + $0x10] sm:$0x3]   ;;  %v28_v9 = vld [vmem:[#allocation0 + $0x8] sm:$0x3]  }
   0xb   :  { %v25_v8 = vld [vmem:[#allocation0] sm:$0x3]   ;;  %51 = vst [vmem:[%s95_s1 + $0x2] ss:$8 sm:$0x3] %v32_v5  }
   0xc   :  { %52 = vst [vmem:[%s95_s1 + $0x3] ss:$8 sm:$0x3] %v36_v6   ;;  %53 = vst [vmem:[%s95_s1 + $0x4] ss:$8 sm:$0x3] %v40_v7  }
   0xd   :  { %26 = vst [vmem:[%s95_s1] ss:$8 sm:$0x3] %v25_v8   ;;  %50 = vst [vmem:[%s95_s1 + $0x1] ss:$8 sm:$0x3] %v28_v9  }

// kernel: local_facial_extractor.15
= control target key start
LH: loop header
LB: loop body
LE: loop exit
PB: predicated region body
PF: predicated region fallthrough
CT: control target
= control target key end

     0   :  { %v219_v7 = vmov 0.0   ;;  %s352_s0 = inlined_call_operand.vmem [shape: f32[16,128], index: 0, kind: input, shape index: {}]   ;;  %s353_s1 = inlined_call_operand.vmem [shape: f32[128,256], index: 1, kind: input, shape index: {}]   ;;  %s354_s2 = inlined_call_operand.hbm [shape: f32[16,256], index: 2, kind: output, shape index: {}]  }
   0x1   :  { %v15_v0 = vld [vmem:[%s353_s1 + $0x8] sm:$0xff]  ;;  %v17_v1 = vld [vmem:[%s353_s1 + $0x18] sm:$0xff]  ;;  %v14_v2 = vld [vmem:[%s353_s1] sm:$0xff]  ;;  %110 = vmatprep.mubr.f32.mxu0 %v219_v7  ;;  %116 = vmatprep.mubr.f32.mxu1 %v219_v7 }
   0x2   :  { %v143_v3 = vpack.c.bf16 %v17_v1, %v15_v0  ;;  %v16_v4 = vld [vmem:[%s353_s1 + $0x10] sm:$0xff]  ;;  %v19_v5 = vld [vmem:[%s353_s1 + $0x28] sm:$0xff]  ;;  %v21_v6 = vld [vmem:[%s353_s1 + $0x38] sm:$0xff] }
   0x3   :  { %v145_v8 = vpack.c.bf16 %v16_v4, %v14_v2  ;;  %v147_v9 = vpack.c.bf16 %v21_v6, %v19_v5  ;;  %v18_v10 = vld [vmem:[%s353_s1 + $0x20] sm:$0xff]  ;;  %v20_v11 = vld [vmem:[%s353_s1 + $0x30] sm:$0xff]  ;;  %v23_v12 = vld [vmem:[%s353_s1 + $0x48] sm:$0xff] }
   0x4   :  { %144 = vmatprep.subr.bf16.mxu0 %v143_v3  ;;  %175 = vmatprep.subr.bf16.mxu1 %v143_v3  ;;  %v25_v13 = vld [vmem:[%s353_s1 + $0x58] sm:$0xff]  ;;  %v149_v14 = vpack.c.bf16 %v20_v11, %v18_v10  ;;  %v22_v16 = vld [vmem:[%s353_s1 + $0x40] sm:$0xff]  ;;  %v24_v17 = vld [vmem:[%s353_s1 + $0x50] sm:$0xff] }
   0x5   :  { %146 = vmatpush1.bf16.msra.mxu0 %v145_v8  ;;  %183 = vmatpush1.bf16.msra.mxu1 %v145_v8  ;;  %v151_v15 = vpack.c.bf16 %v25_v13, %v23_v12  ;;  %v27_v18 = vld [vmem:[%s353_s1 + $0x68] sm:$0xff]  ;;  %v29_v19 = vld [vmem:[%s353_s1 + $0x78] sm:$0xff]  ;;  %v153_v20 = vpack.c.bf16 %v24_v17, %v22_v16  ;;  %v26_v22 = vld [vmem:[%s353_s1 + $0x60] sm:$0xff] }
   0x6   :  { %148 = vmatprep.subr.bf16.mxu0 %v147_v9  ;;  %176 = vmatprep.subr.bf16.mxu1 %v147_v9  ;;  %v155_v21 = vpack.c.bf16 %v29_v19, %v27_v18  ;;  %v28_v23 = vld [vmem:[%s353_s1 + $0x70] sm:$0xff]  ;;  %v31_v24 = vld [vmem:[%s353_s1 + $0x88] sm:$0xff]  ;;  %v33_v25 = vld [vmem:[%s353_s1 + $0x98] sm:$0xff] }
   0x9   :  { %150 = vmatpush1.bf16.msra.mxu0 %v149_v14  ;;  %184 = vmatpush1.bf16.msra.mxu1 %v149_v14 }
   0xa   :  { %152 = vmatprep.subr.bf16.mxu0 %v151_v15  ;;  %177 = vmatprep.subr.bf16.mxu1 %v151_v15 }
   0xb   :  { %7 = vsyncpa [#allocation3], 0  ;;  %v157_v26 = vpack.c.bf16 %v28_v23, %v26_v22  ;;  %v159_v27 = vpack.c.bf16 %v33_v25, %v31_v24  ;;  %v30_v28 = vld [vmem:[%s353_s1 + $0x80] sm:$0xff]  ;;  %v32_v29 = vld [vmem:[%s353_s1 + $0x90] sm:$0xff]  ;;  %s220_s21 = smov [#allocation2]  }
   0xc   :  { %v35_v30 = vld [vmem:[%s353_s1 + $0xa8] sm:$0xff]  ;;  %v37_v31 = vld [vmem:[%s353_s1 + $0xb8] sm:$0xff]  ;;  %v161_v32 = vpack.c.bf16 %v32_v29, %v30_v28  ;;  %v34_v34 = vld [vmem:[%s353_s1 + $0xa0] sm:$0xff]  ;;  %s132_s22 = sshll.u32 %s220_s21, 4  ;;  %s133_s22 = int_to_ptr.vmem [resolvable:$true] %s132_s22 }
   0xd   :  { %154 = vmatpush1.bf16.msra.mxu0 %v153_v20  ;;  %185 = vmatpush1.bf16.msra.mxu1 %v153_v20  ;;  %v163_v33 = vpack.c.bf16 %v37_v31, %v35_v30  ;;  %v36_v35 = vld [vmem:[%s353_s1 + $0xb0] sm:$0xff]  ;;  %v39_v36 = vld [vmem:[%s353_s1 + $0xc8] sm:$0xff]  ;;  %v41_v37 = vld [vmem:[%s353_s1 + $0xd8] sm:$0xff]  ;;  %p200_p1 = scmp.lt.s32.totalorder %s133_s22, %s133_s22 }
   0xe   :  { %156 = vmatprep.subr.bf16.mxu0 %v155_v21  ;;  %178 = vmatprep.subr.bf16.mxu1 %v155_v21  ;;  %v165_v38 = vpack.c.bf16 %v36_v35, %v34_v34  ;;  %v167_v39 = vpack.c.bf16 %v41_v37, %v39_v36  ;;  %v38_v40 = vld [vmem:[%s353_s1 + $0xc0] sm:$0xff]  ;;  %v40_v41 = vld [vmem:[%s353_s1 + $0xd0] sm:$0xff]  ;;  %v43_v42 = vld [vmem:[%s353_s1 + $0xe8] sm:$0xff] }
   0xf   :  { %v45_v43 = vld [vmem:[%s353_s1 + $0xf8] sm:$0xff]  ;;  %v169_v44 = vpack.c.bf16 %v40_v41, %v38_v40  ;;  %v42_v46 = vld [vmem:[%s353_s1 + $0xe0] sm:$0xff]  ;;  %v44_v47 = vld [vmem:[%s353_s1 + $0xf0] sm:$0xff]  ;;  %s195_s1 = scalar_lea.vmem %s133_s22, 512 }
  0x10   :  { %v171_v45 = vpack.c.bf16 %v45_v43, %v43_v42  ;;  %v173_v48 = vpack.c.bf16 %v44_v47, %v42_v46  ;;  %v12_v49 = vld [vmem:[%s352_s0] sm:$0xff]  ;;  %v13_v50 = vld [vmem:[%s352_s0 + $0x8] sm:$0xff]  ;;  %p196_p0 = scmp.ne.s32.totalorder %s133_s22, %s195_s1  ;;  %p201_p2 = scmp.lt.s32.totalorder %s195_s1, %s195_s1 }
  0x11   :  { %158 = vmatpush1.bf16.msra.mxu0 %v157_v26  ;;  %186 = vmatpush1.bf16.msra.mxu1 %v157_v26 }
  0x12   :  { %160 = vmatprep.subr.bf16.mxu0 %v159_v27  ;;  %179 = vmatprep.subr.bf16.mxu1 %v159_v27  ;;  %p202_p3 = por %p201_p2, %p200_p1 }
  0x14   :  { %p203_p4 = pnand %p202_p3, %p196_p0 }
  0x15   :  { %162 = vmatpush1.bf16.msra.mxu0 %v161_v32  ;;  %187 = vmatpush1.bf16.msra.mxu1 %v161_v32 }
  0x16   :  { %164 = vmatprep.subr.bf16.mxu0 %v163_v33  ;;  %180 = vmatprep.subr.bf16.mxu1 %v163_v33 }
  0x19   :  { %166 = vmatpush1.bf16.msra.mxu0 %v165_v38  ;;  %188 = vmatpush1.bf16.msra.mxu1 %v165_v38 }
  0x1a   :  { %168 = vmatprep.subr.bf16.mxu0 %v167_v39  ;;  %181 = vmatprep.subr.bf16.mxu1 %v167_v39 }
  0x1d   :  { %170 = vmatpush1.bf16.msra.mxu0 %v169_v44  ;;  %189 = vmatpush1.bf16.msra.mxu1 %v169_v44 }
  0x1e   :  { %172 = vmatprep.subr.bf16.mxu0 %v171_v45  ;;  %182 = vmatprep.subr.bf16.mxu1 %v171_v45 }
  0x21   :  { %174 = vmatpush1.bf16.msra.mxu0 %v173_v48  ;;  %190 = vmatpush1.bf16.msra.mxu1 %v173_v48 }
  0x24   :  { %111 = vmatmul.mubr.f32.vlgmr.msra.gmra.mrb[0].mxu0 %v12_v49  ;;  %117 = vmatmul.mubr.f32.vlgmr.msra.gmra.mrb[0].mxu1 %v13_v50 }
  0xf7   :  { %v112_v51 = vpop.f32.mrb[0].mxu0  ;;  %v118_v52 = vpop.f32.mrb[0].mxu1 }
  0xf8   :  { %123 = vst [vmem:[#allocation2] sm:$0xff] %v112_v51  ;;  %125 = vst [vmem:[#allocation2 + $0x10] sm:$0xff] %v118_v52  ;;  %v114_v53 = vpop.f32.mrb[1].mxu0  ;;  %v120_v54 = vpop.f32.mrb[1].mxu1 }
  0xf9   :  { %124 = vst [vmem:[#allocation2 + $0x8] sm:$0xff] %v114_v53  ;;  %126 = vst [vmem:[#allocation2 + $0x18] sm:$0xff] %v120_v54 }
  0xfa   :  { %206 = shalt.err (!%p203_p4)
}
  0xfb   :  { %s207_s24 = scalar_lea.hbm %s354_s2, 512 }
  0xfc   :  { %p208_p5 = scmp.ne.s32.totalorder %s354_s2, %s207_s24  ;;  %p211_p6 = scmp.lt.u32.totalorder %s207_s24, %s354_s2 }
  0xfe   :  { %p213_p7 = pnand %p211_p6, %p208_p5 }
 0x100   :  { %216 = shalt.err (!%p213_p7)
}
 0x101   :  { %s221_s29 = smov 256   ;;  %s222_s30 = smov 16  }
 0x102   :  { %138 = dma.vmem_to_hbm [thread:$0]  %s133_s22, 512, %s354_s2, [#allocation3], %s221_s29, %s221_s29, %s222_s30  }
 0x103   :  { %217 = dma.done.wait [#allocation3], 512  }
 0x104   :  { %218 = vsyncadd [#allocation3], 4294966784 }
 0x105   :  { %142 = vsyncpa [#allocation3], 1 }

// kernel: local_facial_extractor.9
= control target key start
LH: loop header
LB: loop body
LE: loop exit
PB: predicated region body
PF: predicated region fallthrough
CT: control target
= control target key end

     0   :  { %s1348_s30 = smov 0   ;;  %s1480_s0 = inlined_call_operand.vmem [shape: f32[5,16,128], index: 0, kind: input, shape index: {}]   ;;  %s1481_s1 = inlined_call_operand.vmem [shape: f32[5,128,128], index: 1, kind: input, shape index: {}]   ;;  %s1482_s2 = inlined_call_operand.vmem [shape: f32[5,1,128], index: 2, kind: input, shape index: {}]   ;;  %s1483_s3 = inlined_call_operand.vmem [shape: f32[5,2,128], index: 3, kind: input, shape index: {}]   ;;  %s1484_s4 = inlined_call_operand.vmem [shape: f32[5,128,128], index: 4, kind: input, shape index: {}]   ;;  %s1485_s5 = inlined_call_operand.vmem [shape: f32[5,1,128], index: 5, kind: input, shape index: {}]   ;;  %s1486_s6 = inlined_call_operand.vmem [shape: f32[5,2,128], index: 6, kind: input, shape index: {}]   ;;  %s1487_s7 = inlined_call_operand.vmem [shape: f32[5,128,128], index: 7, kind: input, shape index: {}]   ;;  %s1488_s8 = inlined_call_operand.vmem [shape: f32[5,1,128], index: 8, kind: input, shape index: {}]   ;;  %s1489_s9 = inlined_call_operand.vmem [shape: f32[5,16,128], index: 9, kind: output, shape index: {}]  }
   0x1 LB: > { %s992_s10 = sadd.s32 4294967295, %s1296_s30   ;;  %p996_p0 = scmp.ge.s32.totalorder %s1296_s30, 1  ;;  %s1296_s30 = sphi %s1348_s30, %s19_s30  }
   0x2   : > { %p359_p1 = scmp.lt.s32.totalorder %s1296_s30, 6 }
   0x4   : > { %p360_p2 = pnand %p996_p0, %p359_p1 }
   0x5   : > { %p427_p3 = scmp.lt.s32.totalorder (!%p360_p2), %s992_s10, 4 }
   0x6   : > { %363 = sbr.rel (%p360_p2) target bundleno = 1330 (0x532), region = 56 }
   0xd   : > { %s1491_s10 = smov (!%p427_p3, %s992_s10), 4 }
   0xe   : > { %s1359_s11 = sshll.u32 %s1491_s10, 7  ;;  %s1014_s15 = sshll.u32 %s1491_s10, 4 }
   0xf   : > { %s1365_s14 = scalar_lea.vmem %s1481_s1, %s1359_s11  ;;  %s1379_s18 = scalar_lea.vmem %s1480_s0, %s1014_s15 }
  0x10   : > { %v471_v0 = vld [vmem:[%s1365_s14] sm:$0xff]  ;;  %v472_v1 = vld [vmem:[%s1365_s14 + $0x8] sm:$0xff]  ;;  %v473_v2 = vld [vmem:[%s1365_s14 + $0x10] sm:$0xff]  ;;  %s439_s21 = scalar_lea.vmem %s1482_s2, %s1491_s10  ;;  %s1401_s24 = scalar_lea.vmem %s1484_s4, %s1359_s11 }
  0x11   : > { %v1178_v3 = vpack.c.bf16 %v472_v1, %v471_v0  ;;  %v474_v4 = vld [vmem:[%s1365_s14 + $0x18] sm:$0xff]  ;;  %v475_v6 = vld [vmem:[%s1365_s14 + $0x20] sm:$0xff]  ;;  %v476_v7 = vld [vmem:[%s1365_s14 + $0x28] sm:$0xff]  ;;  %v593_v1 = vlaneseq  ;;  %s1001_s25 = sshll.u32 %s1491_s10, 1  ;;  %s451_s13 = scalar_lea.vmem %s1485_s5, %s1491_s10 }
  0x12   : > { %v1182_v5 = vpack.c.bf16 %v474_v4, %v473_v2  ;;  %v1186_v8 = vpack.c.bf16 %v476_v7, %v475_v6  ;;  %v469_v9 = vld [vmem:[%s1379_s18] sm:$0xff]  ;;  %v477_v10 = vld [vmem:[%s1365_s14 + $0x30] sm:$0xff]  ;;  %v478_v11 = vld [vmem:[%s1365_s14 + $0x38] sm:$0xff]  ;;  %s443_s28 = scalar_lea.vmem %s1483_s3, %s1001_s25  ;;  %s1441_s17 = scalar_lea.vmem %s1487_s7, %s1359_s11 }
  0x13   : > { %1179 = vmatprep.subr.bf16.mxu0 %v1178_v3  ;;  %1105 = vmatprep.mubr.f32.mxu0 %v469_v9  ;;  %v1190_v12 = vpack.c.bf16 %v478_v11, %v477_v10  ;;  %v479_v13 = vld [vmem:[%s1365_s14 + $0x40] sm:$0xff]  ;;  %v480_v14 = vld [vmem:[%s1365_s14 + $0x48] sm:$0xff]  ;;  %v481_v16 = vld [vmem:[%s1365_s14 + $0x50] sm:$0xff]  ;;  %s455_s19 = scalar_lea.vmem %s1486_s6, %s1001_s25  ;;  %s463_s22 = scalar_lea.vmem %s1488_s8, %s1491_s10 }
  0x14   : > { %1181 = vmatpush3.bf16.msra.mxu0 %v1178_v3  ;;  %v1194_v15 = vpack.c.bf16 %v480_v14, %v479_v13  ;;  %v482_v17 = vld [vmem:[%s1365_s14 + $0x58] sm:$0xff]  ;;  %v483_v19 = vld [vmem:[%s1365_s14 + $0x60] sm:$0xff]  ;;  %v484_v20 = vld [vmem:[%s1365_s14 + $0x68] sm:$0xff]  ;;  %s468_s25 = scalar_lea.vmem %s1489_s9, %s1014_s15 }
  0x15   : > { %1183 = vmatprep.subr.bf16.mxu0 %v1182_v5  ;;  %v1198_v18 = vpack.c.bf16 %v482_v17, %v481_v16  ;;  %v1202_v21 = vpack.c.bf16 %v484_v20, %v483_v19  ;;  %v485_v22 = vld [vmem:[%s1365_s14 + $0x70] sm:$0xff]  ;;  %v486_v23 = vld [vmem:[%s1365_s14 + $0x78] sm:$0xff]  ;;  %v470_v25 = vld [vmem:[%s1379_s18 + $0x8] sm:$0xff] }
  0x16   : > { %v1206_v24 = vpack.c.bf16 %v486_v23, %v485_v22  ;;  %v1009_v26 = vld [vmem:[%s439_s21] ss:$0 sm:$0xff]  ;;  %v612_v32 = vld [vmem:[%s1401_s24 + $0x8] sm:$0xff]  ;;  %v613_v42 = vld [vmem:[%s1401_s24 + $0x10] sm:$0xff] }
  0x17   : > { %v611_v31 = vld [vmem:[%s1401_s24] sm:$0xff]  ;;  %v614_v43 = vld [vmem:[%s1401_s24 + $0x18] sm:$0xff]  ;;  %v616_v46 = vld [vmem:[%s1401_s24 + $0x28] sm:$0xff] }
  0x18   : > { %1185 = vmatpush3.bf16.msra.mxu0 %v1182_v5  ;;  %v1210_v33 = vpack.c.bf16 %v612_v32, %v611_v31  ;;  %v1214_v44 = vpack.c.bf16 %v614_v43, %v613_v42  ;;  %v615_v45 = vld [vmem:[%s1401_s24 + $0x20] sm:$0xff]  ;;  %v617_v48 = vld [vmem:[%s1401_s24 + $0x30] sm:$0xff]  ;;  %v618_v49 = vld [vmem:[%s1401_s24 + $0x38] sm:$0xff]  ;;  %v1420_v5 = vshrl.u32 %v593_v1, 7 }
  0x19   : > { %1187 = vmatprep.subr.bf16.mxu0 %v1186_v8  ;;  %v1218_v47 = vpack.c.bf16 %v616_v46, %v615_v45  ;;  %v1222_v50 = vpack.c.bf16 %v618_v49, %v617_v48  ;;  %v619_v51 = vld [vmem:[%s1401_s24 + $0x40] sm:$0xff]  ;;  %v620_v52 = vld [vmem:[%s1401_s24 + $0x48] sm:$0xff]  ;;  %v621_v53 = vld [vmem:[%s1401_s24 + $0x50] sm:$0xff] }
  0x1a   : > { %1211 = vmatprep.subr.bf16.mxu1 %v1210_v33  ;;  %v1226_v54 = vpack.c.bf16 %v620_v52, %v619_v51  ;;  %v622_v55 = vld [vmem:[%s1401_s24 + $0x58] sm:$0xff]  ;;  %v623_v57 = vld [vmem:[%s1401_s24 + $0x60] sm:$0xff]  ;;  %v624_v58 = vld [vmem:[%s1401_s24 + $0x68] sm:$0xff]  ;;  %v595_v7 = vsub.s32 0, %v1420_v5  ;;  %v601_v9 = vsub.s32 1, %v1420_v5 }
  0x1b   : > { %1213 = vmatpush3.bf16.msra.mxu1 %v1210_v33  ;;  %v1230_v56 = vpack.c.bf16 %v622_v55, %v621_v53  ;;  %v1234_v59 = vpack.c.bf16 %v624_v58, %v623_v57  ;;  %v625_v60 = vld [vmem:[%s1401_s24 + $0x70] sm:$0xff]  ;;  %v626_v61 = vld [vmem:[%s1401_s24 + $0x78] sm:$0xff]  ;;  %v754_v43 = vld [vmem:[%s1441_s17 + $0x20] sm:$0xff] }
  0x1c   : > { %1189 = vmatpush3.bf16.msra.mxu0 %v1186_v8  ;;  %1215 = vmatprep.subr.bf16.mxu1 %v1214_v44  ;;  %v1238_v62 = vpack.c.bf16 %v626_v61, %v625_v60  ;;  %v569_v8 = vld [vmem:[%s443_s28] sm:$0x3]  ;;  %v752_v31 = vld [vmem:[%s1441_s17 + $0x10] sm:$0xff]  ;;  %v753_v33 = vld [vmem:[%s1441_s17 + $0x18] sm:$0xff] }
  0x1d   : > { %1191 = vmatprep.subr.bf16.mxu0 %v1190_v12  ;;  %v596_v10 = vrot.slane %v569_v8, %v595_v7  ;;  %v602_v13 = vrot.slane %v569_v8, %v601_v9  ;;  %v756_v46 = vld [vmem:[%s1441_s17 + $0x30] sm:$0xff]  ;;  %v758_v49 = vld [vmem:[%s1441_s17 + $0x40] sm:$0xff]  ;;  %v761_v53 = vld [vmem:[%s1441_s17 + $0x58] sm:$0xff] }
  0x1e   : > { %v760_v52 = vld [vmem:[%s1441_s17 + $0x50] sm:$0xff]  ;;  %v762_v55 = vld [vmem:[%s1441_s17 + $0x60] sm:$0xff] }
  0x1f   : > { %1217 = vmatpush3.bf16.msra.mxu1 %v1214_v44  ;;  %v755_v44 = vld [vmem:[%s1441_s17 + $0x28] sm:$0xff]  ;;  %v764_v57 = vld [vmem:[%s1441_s17 + $0x70] sm:$0xff]  ;;  %v1011_v5 = vld [vmem:[%s463_s22] ss:$0 sm:$0xff] }
  0x20   : > { %1193 = vmatpush3.bf16.msra.mxu0 %v1190_v12  ;;  %1219 = vmatprep.subr.bf16.mxu1 %v1218_v47  ;;  %v1250_v45 = vpack.c.bf16 %v755_v44, %v754_v43 }
  0x21   : > { %1195 = vmatprep.subr.bf16.mxu0 %v1194_v15 }
  0x23   : > { %1221 = vmatpush3.bf16.msra.mxu1 %v1218_v47  ;;  %v757_v47 = vld [vmem:[%s1441_s17 + $0x38] sm:$0xff] }
  0x24   : > { %1197 = vmatpush3.bf16.msra.mxu0 %v1194_v15  ;;  %1223 = vmatprep.subr.bf16.mxu1 %v1222_v50  ;;  %v1254_v48 = vpack.c.bf16 %v757_v47, %v756_v46 }
  0x25   : > { %1199 = vmatprep.subr.bf16.mxu0 %v1198_v18 }
  0x27   : > { %1225 = vmatpush3.bf16.msra.mxu1 %v1222_v50  ;;  %v759_v50 = vld [vmem:[%s1441_s17 + $0x48] sm:$0xff] }
  0x28   : > { %1201 = vmatpush3.bf16.msra.mxu0 %v1198_v18  ;;  %1227 = vmatprep.subr.bf16.mxu1 %v1226_v54  ;;  %v1258_v51 = vpack.c.bf16 %v759_v50, %v758_v49 }
  0x29   : > { %1203 = vmatprep.subr.bf16.mxu0 %v1202_v21 }
  0x2b   : > { %1229 = vmatpush3.bf16.msra.mxu1 %v1226_v54  ;;  %v1262_v54 = vpack.c.bf16 %v761_v53, %v760_v52 }
  0x2c   : > { %1205 = vmatpush3.bf16.msra.mxu0 %v1202_v21  ;;  %1231 = vmatprep.subr.bf16.mxu1 %v1230_v56 }
  0x2d   : > { %1207 = vmatprep.subr.bf16.mxu0 %v1206_v24 }
  0x2f   : > { %1233 = vmatpush3.bf16.msra.mxu1 %v1230_v56  ;;  %v763_v56 = vld [vmem:[%s1441_s17 + $0x68] sm:$0xff] }
  0x30   : > { %1209 = vmatpush3.bf16.msra.mxu0 %v1206_v24  ;;  %1235 = vmatprep.subr.bf16.mxu1 %v1234_v59  ;;  %v1010_v24 = vld [vmem:[%s451_s13] ss:$0 sm:$0xff]  ;;  %v1266_v58 = vpack.c.bf16 %v763_v56, %v762_v55 }
  0x33   : > { %1106 = vmatmul.mubr.f32.vlgmr.msra.gmra.mrb[0].mxu0 %v470_v25  ;;  %1237 = vmatpush3.bf16.msra.mxu1 %v1234_v59  ;;  %v765_v59 = vld [vmem:[%s1441_s17 + $0x78] sm:$0xff] }
  0x34   : > { %1239 = vmatprep.subr.bf16.mxu1 %v1238_v62  ;;  %v1270_v60 = vpack.c.bf16 %v765_v59, %v764_v57 }
  0x37   : > { %1241 = vmatpush3.bf16.msra.mxu1 %v1238_v62 }
 0x106   : > { %v1107_v27 = vpop.f32.mrb[0].mxu0 }
 0x107   : > { %v560_v28 = vpop.f32.mrb[1].mxu0  ;;  %v566_v30 = vadd.f32 %v1107_v27, %v1009_v26 }
 0x108   : > { %v561_v29 = vadd.f32 %v1009_v26, %v560_v28 }
 0x10a   : > { %570 = vadd.xlane.f32.xlu0 %v561_v29 }
 0x10e   : > { %572 = vadd.xlane.f32.xlu0 %v566_v30 }
 0x197   : > { %v571_v34 = vpop.xlane.xlu0 %570 }
 0x198   : > { %v575_v35 = vmul.f32 0.0078125, %v571_v34  ;;  %v1246_v34 = vpack.c.bf16 %v753_v33, %v752_v31 }
 0x19a   : > { %v577_v36 = vsub.f32 %v561_v29, %v575_v35  ;;  %v750_v29 = vld [vmem:[%s1441_s17] sm:$0xff] }
 0x19b   : > { %v573_v37 = vpop.xlane.xlu0 %572 }
 0x19c   : > { %v576_v38 = vmul.f32 0.0078125, %v573_v37  ;;  %v579_v39 = vmul.f32 %v577_v36, %v577_v36 }
 0x19e   : > { %v578_v40 = vsub.f32 %v566_v30, %v576_v38  ;;  %581 = vadd.xlane.f32.xlu1 %v579_v39  ;;  %v751_v30 = vld [vmem:[%s1441_s17 + $0x8] sm:$0xff] }
 0x19f   : > { %v1242_v32 = vpack.c.bf16 %v751_v30, %v750_v29 }
 0x1a0   : > { %v580_v41 = vmul.f32 %v578_v40, %v578_v40 }
 0x1a1   : > { %1243 = vmatprep.subr.bf16.mxu0 %v1242_v32 }
 0x1a2   : > { %583 = vadd.xlane.f32.xlu1 %v580_v41  ;;  %1245 = vmatpush3.bf16.msra.mxu0 %v1242_v32 }
 0x1a3   : > { %1247 = vmatprep.subr.bf16.mxu0 %v1246_v34 }
 0x1a6   : > { %1249 = vmatpush3.bf16.msra.mxu0 %v1246_v34 }
 0x1a7   : > { %1251 = vmatprep.subr.bf16.mxu0 %v1250_v45 }
 0x1aa   : > { %1253 = vmatpush3.bf16.msra.mxu0 %v1250_v45 }
 0x1ab   : > { %1255 = vmatprep.subr.bf16.mxu0 %v1254_v48 }
 0x1ae   : > { %1257 = vmatpush3.bf16.msra.mxu0 %v1254_v48 }
 0x1af   : > { %1259 = vmatprep.subr.bf16.mxu0 %v1258_v51 }
 0x1b2   : > { %1261 = vmatpush3.bf16.msra.mxu0 %v1258_v51 }
 0x1b3   : > { %1263 = vmatprep.subr.bf16.mxu0 %v1262_v54 }
 0x1b6   : > { %1265 = vmatpush3.bf16.msra.mxu0 %v1262_v54 }
 0x1b7   : > { %1267 = vmatprep.subr.bf16.mxu0 %v1266_v58 }
 0x1ba   : > { %1269 = vmatpush3.bf16.msra.mxu0 %v1266_v58 }
 0x1bb   : > { %1271 = vmatprep.subr.bf16.mxu0 %v1270_v60 }
 0x1be   : > { %1273 = vmatpush3.bf16.msra.mxu0 %v1270_v60 }
 0x22b   : > { %v582_v63 = vpop.xlane.xlu1 %581 }
 0x22c   : > { %v585_v0 = vmul.f32 0.0078125, %v582_v63 }
 0x22e   : > { %v587_v2 = vadd.f32 1e-05, %v585_v0 }
 0x22f   : > { %v584_v3 = vpop.xlane.xlu1 %583 }
 0x230   : > { %1282 = vrsqrt.f32 %v587_v2  ;;  %v586_v4 = vmul.f32 0.0078125, %v584_v3  ;;  %v709_v3 = vld [vmem:[%s455_s19] sm:$0x3] }
 0x232   : > { %v588_v6 = vadd.f32 1e-05, %v586_v4  ;;  %v735_v4 = vrot.slane %v709_v3, %v595_v7 }
 0x234   : > { %1284 = vrsqrt.f32 %v588_v6 }
 0x23a   : > { %v1283_v11 = vpop.eup %1282 }
 0x23b   : > { %v591_v12 = vmul.f32 %v1283_v11, %v577_v36  ;;  %v741_v11 = vrot.slane %v709_v3, %v601_v9 }
 0x23d   : > { %v597_v14 = vmul.f32 %v596_v10, %v591_v12 }
 0x23e   : > { %v1285_v15 = vpop.eup %1284 }
 0x23f   : > { %v603_v16 = vadd.f32 %v602_v13, %v597_v14  ;;  %v592_v17 = vmul.f32 %v1285_v15, %v578_v40 }
 0x241   : > { %vm605_vm0 = vcmp.ge.f32.partialorder %v603_v16, 0.0  ;;  %v607_v18 = vmul.f32 0.01, %v603_v16  ;;  %v598_v19 = vmul.f32 %v596_v10, %v592_v17 }
 0x243   : > { %v609_v20 = vsel %vm605_vm0, %v603_v16, %v607_v18  ;;  %v604_v21 = vadd.f32 %v602_v13, %v598_v19 }
 0x244   : > { %1140 = vmatprep.mubr.f32.mxu1 %v609_v20 }
 0x245   : > { %vm606_vm1 = vcmp.ge.f32.partialorder %v604_v21, 0.0  ;;  %v608_v22 = vmul.f32 0.01, %v604_v21 }
 0x247   : > { %v610_v23 = vsel %vm606_vm1, %v604_v21, %v608_v22 }
 0x248   : > { %1141 = vmatmul.mubr.f32.vlgmr.msra.gmra.mrb[0].mxu1 %v610_v23 }
 0x31b   : > { %v1142_v25 = vpop.f32.mrb[0].mxu1 }
 0x31c   : > { %v706_v26 = vadd.f32 %v1142_v25, %v1010_v24  ;;  %v700_v27 = vpop.f32.mrb[1].mxu1 }
 0x31d   : > { %v701_v28 = vadd.f32 %v1010_v24, %v700_v27 }
 0x31e   : > { %712 = vadd.xlane.f32.xlu1 %v706_v26 }
 0x31f   : > { %710 = vadd.xlane.f32.xlu0 %v701_v28 }
 0x3ab   : > { %v713_v35 = vpop.xlane.xlu1 %712 }
 0x3ac   : > { %v715_v36 = vmul.f32 0.0078125, %v713_v35  ;;  %v711_v37 = vpop.xlane.xlu0 %710 }
 0x3ad   : > { %v714_v38 = vmul.f32 0.0078125, %v711_v37 }
 0x3ae   : > { %v717_v39 = vsub.f32 %v706_v26, %v715_v36 }
 0x3af   : > { %v716_v40 = vsub.f32 %v701_v28, %v714_v38 }
 0x3b0   : > { %v719_v41 = vmul.f32 %v717_v39, %v717_v39 }
 0x3b1   : > { %v718_v42 = vmul.f32 %v716_v40, %v716_v40 }
 0x3b2   : > { %722 = vadd.xlane.f32.xlu1 %v719_v41 }
 0x3b3   : > { %720 = vadd.xlane.f32.xlu0 %v718_v42 }
 0x43f   : > { %v723_v61 = vpop.xlane.xlu1 %722 }
 0x440   : > { %v725_v62 = vmul.f32 0.0078125, %v723_v61  ;;  %v721_v63 = vpop.xlane.xlu0 %720 }
 0x441   : > { %v724_v0 = vmul.f32 0.0078125, %v721_v63 }
 0x442   : > { %v727_v1 = vadd.f32 1e-05, %v725_v62 }
 0x443   : > { %v726_v2 = vadd.f32 1e-05, %v724_v0 }
 0x444   : > { %1286 = vrsqrt.f32 %v727_v1 }
 0x445   : > { %1288 = vrsqrt.f32 %v726_v2 }
 0x44e   : > { %v1287_v6 = vpop.eup %1286 }
 0x44f   : > { %v1289_v8 = vpop.eup %1288  ;;  %v731_v10 = vmul.f32 %v1287_v6, %v717_v39 }
 0x450   : > { %v730_v12 = vmul.f32 %v1289_v8, %v716_v40 }
 0x451   : > { %v737_v13 = vmul.f32 %v735_v4, %v731_v10 }
 0x452   : > { %v736_v14 = vmul.f32 %v735_v4, %v730_v12 }
 0x453   : > { %v743_v15 = vadd.f32 %v741_v11, %v737_v13 }
 0x454   : > { %v742_v16 = vadd.f32 %v741_v11, %v736_v14 }
 0x455   : > { %v747_v17 = vmul.f32 0.01, %v743_v15  ;;  %vm745_vm3 = vcmp.ge.f32.partialorder %v743_v15, 0.0 }
 0x456   : > { %vm744_vm2 = vcmp.ge.f32.partialorder %v742_v16, 0.0  ;;  %v746_v18 = vmul.f32 0.01, %v742_v16 }
 0x457   : > { %v749_v7 = vsel %vm745_vm3, %v743_v15, %v747_v17 }
 0x458   : > { %v748_v19 = vsel %vm744_vm2, %v742_v16, %v746_v18 }
 0x459   : > { %1175 = vmatprep.mubr.f32.mxu0 %v748_v19 }
 0x45a   : > { %1176 = vmatmul.mubr.f32.vlgmr.msra.gmra.mrb[2].mxu0 %v749_v7 }
 0x52d   : > { %v1177_v9 = vpop.f32.mrb[2].mxu0 }
 0x52e   : > { %v845_v20 = vadd.f32 %v1177_v9, %v1011_v5  ;;  %v839_v21 = vpop.f32.mrb[3].mxu0 }
 0x52f   : > { %v840_v22 = vadd.f32 %v1011_v5, %v839_v21 }
 0x530   : > { %849 = vst [vmem:[%s468_s25 + $0x8] sm:$0xff] %v845_v20 }
 0x531   : > { %848 = vst [vmem:[%s468_s25] sm:$0xff] %v840_v22 }
 0x532 PF: > { %s19_s30 = sadd.s32 1, %s1296_s30  }
 0x533   : > { %p16_p4 = scmp.ge.s32.totalorder %s19_s30, 7  }
 0x535   :  { %18 = sbr.rel (!%p16_p4) target bundleno = 1 (0x1), region = 110 }

// kernel: local_facial_extractor.8
= control target key start
LH: loop header
LB: loop body
LE: loop exit
PB: predicated region body
PF: predicated region fallthrough
CT: control target
= control target key end

     0   :  { %v907_v0 = vmov 0.0|0.0   ;;  %vm70_vm0 = vcmask 261120   ;;  %vm144_vm1 = vcmask 1041408   ;;  %vm908_vm2 = vmmov 0   ;;  %s1392_s1 = inlined_call_operand.vmem [shape: f32[1,160,128], index: 1, kind: input, shape index: {}]   ;;  %s1393_s0 = inlined_call_operand.vmem [shape: f32[1,2,160], index: 0, kind: input, shape index: {}]   ;;  %s1394_s2 = inlined_call_operand.vmem [shape: f32[1,1,128], index: 2, kind: input, shape index: {}]   ;;  %s1395_s4 = inlined_call_operand.vmem [shape: f32[1,128,128], index: 4, kind: input, shape index: {}]   ;;  %s1396_s3 = inlined_call_operand.vmem [shape: f32[1,2,128], index: 3, kind: input, shape index: {}]   ;;  %s1397_s5 = inlined_call_operand.vmem [shape: f32[1,1,128], index: 5, kind: input, shape index: {}]   ;;  %s1398_s7 = inlined_call_operand.vmem [shape: f32[1,128,640], index: 7, kind: input, shape index: {}]   ;;  %s1399_s6 = inlined_call_operand.vmem [shape: f32[1,2,128], index: 6, kind: input, shape index: {}]   ;;  %s1400_s8 = inlined_call_operand.vmem [shape: f32[1,1,640], index: 8, kind: input, shape index: {}]   ;;  %s1401_s9 = inlined_call_operand.vmem [shape: f32[1,2,640], index: 9, kind: output, shape index: {}]  }
   0x1   :  { %757 = vmatprep.subr.bf16.mxu0 %v907_v0  ;;  %v33_v1 = vld [vmem:[%s1392_s1] sm:$0xff]  ;;  %v34_v2 = vld [vmem:[%s1392_s1 + $0x8] sm:$0xff]  ;;  %v35_v3 = vld [vmem:[%s1392_s1 + $0x10] sm:$0xff]  ;;  %787 = vmatprep.subr.bf16.mxu1 %v907_v0  ;;  %v909_v58 = vmov 0.0  }
   0x2   :  { %v758_v4 = vpack.c.bf16 %v34_v2, %v33_v1  ;;  %v36_v5 = vld [vmem:[%s1392_s1 + $0x18] sm:$0xff]  ;;  %v37_v7 = vld [vmem:[%s1392_s1 + $0x20] sm:$0xff]  ;;  %v38_v8 = vld [vmem:[%s1392_s1 + $0x28] sm:$0xff]  ;;  %719 = vmatprep.mubr.msk.f32.mxu1 %vm908_vm2, %v909_v58 }
   0x3   :  { %v761_v6 = vpack.c.bf16 %v36_v5, %v35_v3  ;;  %v649_v9 = vld.sshfl [vmem:[%s1393_s0] sm:$0x33 pattern:$0x76325410]  ;;  %v764_v10 = vpack.c.bf16 %v38_v8, %v37_v7  ;;  %v39_v12 = vld [vmem:[%s1392_s1 + $0x30] sm:$0xff]  ;;  %v40_v13 = vld [vmem:[%s1392_s1 + $0x38] sm:$0xff]  ;;  %v159_v7 = vlaneseq }
   0x4   :  { %759 = vmatpush1.bf16.msra.mxu0 %v758_v4  ;;  %v68_v11 = vcombine.high %v649_v9, %v649_v9  ;;  %v767_v14 = vpack.c.bf16 %v40_v13, %v39_v12  ;;  %v41_v15 = vld [vmem:[%s1392_s1 + $0x40] sm:$0xff]  ;;  %v42_v16 = vld [vmem:[%s1392_s1 + $0x48] sm:$0xff]  ;;  %v43_v18 = vld [vmem:[%s1392_s1 + $0x50] sm:$0xff] }
   0x5   :  { %760 = vmatprep.subr.bf16.mxu0 %v907_v0  ;;  %v770_v17 = vpack.c.bf16 %v42_v16, %v41_v15  ;;  %v44_v19 = vld [vmem:[%s1392_s1 + $0x58] sm:$0xff]  ;;  %v45_v21 = vld [vmem:[%s1392_s1 + $0x60] sm:$0xff]  ;;  %v46_v22 = vld [vmem:[%s1392_s1 + $0x68] sm:$0xff] }
   0x6   :  { %650 = vmatprep.mubr.msk.f32.mxu0 %vm70_vm0, %v68_v11  ;;  %v773_v20 = vpack.c.bf16 %v44_v19, %v43_v18  ;;  %v776_v23 = vpack.c.bf16 %v46_v22, %v45_v21  ;;  %v47_v24 = vld [vmem:[%s1392_s1 + $0x70] sm:$0xff]  ;;  %v48_v25 = vld [vmem:[%s1392_s1 + $0x78] sm:$0xff]  ;;  %v49_v27 = vld [vmem:[%s1392_s1 + $0x80] sm:$0xff] }
   0x7   :  { %v779_v26 = vpack.c.bf16 %v48_v25, %v47_v24  ;;  %v50_v28 = vld [vmem:[%s1392_s1 + $0x88] sm:$0xff]  ;;  %v51_v30 = vld [vmem:[%s1392_s1 + $0x90] sm:$0xff]  ;;  %v52_v31 = vld [vmem:[%s1392_s1 + $0x98] sm:$0xff] }
   0x8   :  { %762 = vmatpush1.bf16.msra.mxu0 %v761_v6  ;;  %v782_v29 = vpack.c.bf16 %v50_v28, %v49_v27  ;;  %v785_v32 = vpack.c.bf16 %v52_v31, %v51_v30  ;;  %v648_v33 = vld [vmem:[%s1394_s2] ss:$0 sm:$0xff]  ;;  %v173_v39 = vld [vmem:[%s1395_s4 + $0x8] sm:$0xff]  ;;  %v174_v40 = vld [vmem:[%s1395_s4 + $0x10] sm:$0xff] }
   0x9   :  { %763 = vmatprep.subr.bf16.mxu0 %v907_v0  ;;  %v172_v38 = vld [vmem:[%s1395_s4] sm:$0xff]  ;;  %v175_v42 = vld [vmem:[%s1395_s4 + $0x18] sm:$0xff]  ;;  %v177_v50 = vld [vmem:[%s1395_s4 + $0x28] sm:$0xff] }
   0xa   :  { %v788_v41 = vpack.c.bf16 %v173_v39, %v172_v38  ;;  %v791_v43 = vpack.c.bf16 %v175_v42, %v174_v40  ;;  %v176_v49 = vld [vmem:[%s1395_s4 + $0x20] sm:$0xff]  ;;  %v178_v52 = vld [vmem:[%s1395_s4 + $0x30] sm:$0xff]  ;;  %v179_v53 = vld [vmem:[%s1395_s4 + $0x38] sm:$0xff] }
   0xb   :  { %v794_v51 = vpack.c.bf16 %v177_v50, %v176_v49  ;;  %v797_v54 = vpack.c.bf16 %v179_v53, %v178_v52  ;;  %v180_v55 = vld [vmem:[%s1395_s4 + $0x40] sm:$0xff]  ;;  %v181_v56 = vld [vmem:[%s1395_s4 + $0x48] sm:$0xff]  ;;  %v182_v59 = vld [vmem:[%s1395_s4 + $0x50] sm:$0xff] }
   0xc   :  { %765 = vmatpush1.bf16.msra.mxu0 %v764_v10  ;;  %789 = vmatpush3.bf16.msra.mxu1 %v788_v41  ;;  %v800_v57 = vpack.c.bf16 %v181_v56, %v180_v55  ;;  %v183_v60 = vld [vmem:[%s1395_s4 + $0x58] sm:$0xff]  ;;  %v184_v62 = vld [vmem:[%s1395_s4 + $0x60] sm:$0xff]  ;;  %v185_v63 = vld [vmem:[%s1395_s4 + $0x68] sm:$0xff] }
   0xd   :  { %766 = vmatprep.subr.bf16.mxu0 %v907_v0  ;;  %790 = vmatprep.subr.bf16.mxu1 %v907_v0  ;;  %v803_v61 = vpack.c.bf16 %v183_v60, %v182_v59  ;;  %v806_v1 = vpack.c.bf16 %v185_v63, %v184_v62  ;;  %v186_v2 = vld [vmem:[%s1395_s4 + $0x70] sm:$0xff]  ;;  %v187_v3 = vld [vmem:[%s1395_s4 + $0x78] sm:$0xff]  ;;  %v143_v11 = vld [vmem:[%s1396_s3] sm:$0x3] }
   0xe   :  { %v809_v4 = vpack.c.bf16 %v187_v3, %v186_v2  ;;  %v651_v21 = vld [vmem:[%s1397_s5] ss:$0 sm:$0xff]  ;;  %v298_v27 = vld [vmem:[%s1398_s7 + $0x30] sm:$0xff]  ;;  %v297_v30 = vld [vmem:[%s1398_s7 + $0x28] sm:$0xff] }
   0xf   :  { %v292_v28 = vld [vmem:[%s1398_s7] sm:$0xff]  ;;  %v295_v31 = vld [vmem:[%s1398_s7 + $0x18] sm:$0xff]  ;;  %v302_v40 = vld [vmem:[%s1398_s7 + $0x50] sm:$0xff] }
  0x10   :  { %768 = vmatpush1.bf16.msra.mxu0 %v767_v14  ;;  %792 = vmatpush3.bf16.msra.mxu1 %v791_v43  ;;  %v308_v39 = vld [vmem:[%s1398_s7 + $0x80] sm:$0xff]  ;;  %v307_v41 = vld [vmem:[%s1398_s7 + $0x78] sm:$0xff]  ;;  %v313_v49 = vld [vmem:[%s1398_s7 + $0xa8] sm:$0xff] }
  0x11   :  { %769 = vmatprep.subr.bf16.mxu0 %v907_v0  ;;  %793 = vmatprep.subr.bf16.mxu1 %v907_v0  ;;  %v817_v43 = vpack.c.bf16 %v307_v41, %v302_v40  ;;  %v318_v50 = vld [vmem:[%s1398_s7 + $0xd0] sm:$0xff]  ;;  %v312_v59 = vld [vmem:[%s1398_s7 + $0xa0] sm:$0xff]  ;;  %v317_v60 = vld [vmem:[%s1398_s7 + $0xc8] sm:$0xff] }
  0x12   :  { %v819_v52 = vpack.c.bf16 %v318_v50, %v313_v49  ;;  %v821_v62 = vpack.c.bf16 %v317_v60, %v312_v59  ;;  %v320_v63 = vld [vmem:[%s1398_s7 + $0xe0] sm:$0xff]  ;;  %v319_v2 = vld [vmem:[%s1398_s7 + $0xd8] sm:$0xff]  ;;  %v349_v41 = vld [vmem:[%s1398_s7 + $0x1c8] sm:$0xff] }
  0x13   :  { %v344_v40 = vld [vmem:[%s1398_s7 + $0x1a0] sm:$0xff]  ;;  %v355_v49 = vld [vmem:[%s1398_s7 + $0x1f8] sm:$0xff]  ;;  %v362_v60 = vld [vmem:[%s1398_s7 + $0x230] sm:$0xff] }
  0x14   :  { %771 = vmatpush1.bf16.msra.mxu0 %v770_v17  ;;  %795 = vmatpush3.bf16.msra.mxu1 %v794_v51  ;;  %v368_v59 = vld [vmem:[%s1398_s7 + $0x260] sm:$0xff] }
  0x15   :  { %772 = vmatprep.subr.bf16.mxu0 %v907_v0  ;;  %796 = vmatprep.subr.bf16.mxu1 %v907_v0 }
  0x18   :  { %774 = vmatpush1.bf16.msra.mxu0 %v773_v20  ;;  %798 = vmatpush3.bf16.msra.mxu1 %v797_v54 }
  0x19   :  { %775 = vmatprep.subr.bf16.mxu0 %v907_v0  ;;  %799 = vmatprep.subr.bf16.mxu1 %v907_v0 }
  0x1c   :  { %777 = vmatpush1.bf16.msra.mxu0 %v776_v23  ;;  %801 = vmatpush3.bf16.msra.mxu1 %v800_v57 }
  0x1d   :  { %778 = vmatprep.subr.bf16.mxu0 %v907_v0  ;;  %802 = vmatprep.subr.bf16.mxu1 %v907_v0 }
  0x20   :  { %780 = vmatpush1.bf16.msra.mxu0 %v779_v26  ;;  %804 = vmatpush3.bf16.msra.mxu1 %v803_v61  ;;  %v293_v26 = vld [vmem:[%s1398_s7 + $0x8] sm:$0xff]  ;;  %v315_v61 = vld [vmem:[%s1398_s7 + $0xb8] sm:$0xff] }
  0x21   :  { %781 = vmatprep.subr.bf16.mxu0 %v907_v0  ;;  %805 = vmatprep.subr.bf16.mxu1 %v907_v0  ;;  %v851_v3 = vpack.c.bf16 %v320_v63, %v315_v61  ;;  %v365_v63 = vld [vmem:[%s1398_s7 + $0x248] sm:$0xff] }
  0x24   :  { %783 = vmatpush1.bf16.msra.mxu0 %v782_v29  ;;  %807 = vmatpush3.bf16.msra.mxu1 %v806_v1  ;;  %v811_v29 = vpack.c.bf16 %v298_v27, %v293_v26  ;;  %v314_v1 = vld [vmem:[%s1398_s7 + $0xb0] sm:$0xff]  ;;  %v340_v27 = vld [vmem:[%s1398_s7 + $0x180] sm:$0xff] }
  0x25   :  { %784 = vmatprep.subr.bf16.mxu0 %v907_v0  ;;  %808 = vmatprep.subr.bf16.mxu1 %v907_v0 }
  0x28   :  { %786 = vmatpush1.bf16.msra.mxu0 %v785_v32  ;;  %810 = vmatpush3.bf16.msra.mxu1 %v809_v4  ;;  %v300_v32 = vld [vmem:[%s1398_s7 + $0x40] sm:$0xff]  ;;  %v853_v4 = vpack.c.bf16 %v319_v2, %v314_v1  ;;  %v370_v1 = vld [vmem:[%s1398_s7 + $0x270] sm:$0xff] }
  0x29   :  { %812 = vmatprep.subr.bf16.mxu1 %v811_v29  ;;  %v339_v29 = vld [vmem:[%s1398_s7 + $0x178] sm:$0xff] }
  0x2b   :  { %138 = vmatmul.mubr.f32.vlgmr.msra.gmra.mrb[0].mxu0 %v649_v9  ;;  %v1098_v9 = vshrl.u32 %v159_v7, 7 }
  0x2c   :  { %534 = vmatprep.mubr.f32.mxu0 %v909_v58 }
  0x2d   :  { %v1101_v10 = vsub.s32 0, %v1098_v9  ;;  %v1107_v12 = vsub.s32 1, %v1098_v9 }
  0x2f   :  { %v162_v13 = vrot.slane %v143_v11, %v1101_v10  ;;  %v167_v16 = vrot.slane %v143_v11, %v1107_v12  ;;  %v327_v11 = vld [vmem:[%s1398_s7 + $0x118] sm:$0xff] }
  0xfe   :  { %v139_v34 = vpop.f32.mrb[0].mxu0 }
  0xff   :  { %v140_v35 = vadd.f32 %v648_v33, %v139_v34  ;;  %v141_v36 = vpop.f32.mrb[1].mxu0  ;;  %v813_v33 = vpack.c.bf16 %v297_v30, %v292_v28  ;;  %v843_v34 = vpack.c.bf16 %v300_v32, %v295_v31  ;;  %v334_v28 = vld [vmem:[%s1398_s7 + $0x150] sm:$0xff]  ;;  %v343_v32 = vld [vmem:[%s1398_s7 + $0x198] sm:$0xff] }
 0x100   :  { %v299_v36 = vld [vmem:[%s1398_s7 + $0x38] sm:$0xff]  ;;  %v861_v31 = vpack.c.bf16 %v339_v29, %v334_v28  ;;  %v321_v28 = vld [vmem:[%s1398_s7 + $0xe8] sm:$0xff] }
 0x101   :  { %v145_v37 = vsel %vm144_vm1, %v140_v35, 0.0  ;;  %844 = vmatprep.subr.bf16.mxu0 %v843_v34 }
 0x102   :  { %146 = vadd.xlane.f32.xlu0 %v145_v37  ;;  %v303_v37 = vld [vmem:[%s1398_s7 + $0x58] sm:$0xff] }
 0x103   :  { %v815_v42 = vpack.c.bf16 %v308_v39, %v303_v37  ;;  %v345_v37 = vld [vmem:[%s1398_s7 + $0x1a8] sm:$0xff]  ;;  %v350_v39 = vld [vmem:[%s1398_s7 + $0x1d0] sm:$0xff] }
 0x18f   :  { %v147_v44 = vpop.xlane.xlu0 %146 }
 0x190   :  { %v149_v45 = vmul.f32 0.0078125, %v147_v44  ;;  %v305_v44 = vld [vmem:[%s1398_s7 + $0x68] sm:$0xff] }
 0x192   :  { %v150_v46 = vsub.f32 %v140_v35, %v149_v45  ;;  %v294_v35 = vld [vmem:[%s1398_s7 + $0x10] sm:$0xff] }
 0x193   :  { %v845_v38 = vpack.c.bf16 %v299_v36, %v294_v35  ;;  %v310_v45 = vld [vmem:[%s1398_s7 + $0x90] sm:$0xff]  ;;  %v347_v36 = vld [vmem:[%s1398_s7 + $0x1b8] sm:$0xff] }
 0x194   :  { %v151_v47 = vmul.f32 %v150_v46, %v150_v46  ;;  %v342_v35 = vld [vmem:[%s1398_s7 + $0x190] sm:$0xff] }
 0x195   :  { %846 = vmatpush1.bf16.msra.mxu0 %v845_v38  ;;  %v833_v38 = vpack.c.bf16 %v347_v36, %v342_v35  ;;  %v346_v35 = vld [vmem:[%s1398_s7 + $0x1b0] sm:$0xff]  ;;  %v351_v36 = vld [vmem:[%s1398_s7 + $0x1d8] sm:$0xff] }
 0x196   :  { %v152_v48 = vsel %vm144_vm1, %v151_v47, 0.0  ;;  %v847_v47 = vpack.c.bf16 %v310_v45, %v305_v44  ;;  %v353_v44 = vld [vmem:[%s1398_s7 + $0x1e8] sm:$0xff]  ;;  %v358_v45 = vld [vmem:[%s1398_s7 + $0x210] sm:$0xff] }
 0x197   :  { %153 = vadd.xlane.f32.xlu0 %v152_v48  ;;  %v309_v48 = vld [vmem:[%s1398_s7 + $0x88] sm:$0xff] }
 0x198   :  { %848 = vmatprep.subr.bf16.mxu0 %v847_v47  ;;  %v352_v47 = vld [vmem:[%s1398_s7 + $0x1e0] sm:$0xff] }
 0x224   :  { %v154_v5 = vpop.xlane.xlu0 %153 }
 0x225   :  { %v155_v6 = vmul.f32 0.0078125, %v154_v5  ;;  %v323_v5 = vld [vmem:[%s1398_s7 + $0xf8] sm:$0xff] }
 0x227   :  { %v156_v8 = vadd.f32 1e-05, %v155_v6  ;;  %v328_v6 = vld [vmem:[%s1398_s7 + $0x120] sm:$0xff] }
 0x228   :  { %v823_v7 = vpack.c.bf16 %v328_v6, %v323_v5  ;;  %v369_v5 = vld [vmem:[%s1398_s7 + $0x268] sm:$0xff] }
 0x229   :  { %903 = vrsqrt.f32 %v156_v8  ;;  %v322_v8 = vld [vmem:[%s1398_s7 + $0xf0] sm:$0xff] }
 0x233   :  { %v904_v14 = vpop.eup %903 }
 0x234   :  { %v158_v15 = vmul.f32 %v904_v14, %v150_v46  ;;  %v304_v46 = vld [vmem:[%s1398_s7 + $0x60] sm:$0xff]  ;;  %v825_v14 = vpack.c.bf16 %v327_v11, %v322_v8 }
 0x235   :  { %v849_v51 = vpack.c.bf16 %v309_v48, %v304_v46  ;;  %v835_v46 = vpack.c.bf16 %v358_v45, %v353_v44  ;;  %v357_v48 = vld [vmem:[%s1398_s7 + $0x208] sm:$0xff]  ;;  %v384_v44 = vsub.s32 2, %v1098_v9  ;;  %v372_v45 = vld [vmem:[%s1400_s8] sm:$0x1f] }
 0x236   :  { %v163_v17 = vmul.f32 %v162_v13, %v158_v15  ;;  %v325_v13 = vld [vmem:[%s1398_s7 + $0x108] sm:$0xff]  ;;  %v330_v15 = vld [vmem:[%s1398_s7 + $0x130] sm:$0xff]  ;;  %v837_v50 = vpack.c.bf16 %v357_v48, %v352_v47  ;;  %v388_v48 = vsub.s32 3, %v1098_v9 }
 0x237   :  { %850 = vmatpush1.bf16.msra.mxu0 %v849_v51  ;;  %v360_v51 = vld [vmem:[%s1398_s7 + $0x220] sm:$0xff] }
 0x238   :  { %v168_v18 = vadd.f32 %v167_v16, %v163_v17  ;;  %852 = vmatprep.subr.bf16.mxu0 %v851_v3  ;;  %v324_v16 = vld [vmem:[%s1398_s7 + $0x100] sm:$0xff]  ;;  %v329_v17 = vld [vmem:[%s1398_s7 + $0x128] sm:$0xff]  ;;  %v871_v3 = vpack.c.bf16 %v370_v1, %v365_v63 }
 0x23a   :  { %vm169_vm3 = vcmp.ge.f32.partialorder %v168_v18, 0.0  ;;  %v170_v19 = vmul.f32 0.01, %v168_v18 }
 0x23b   :  { %854 = vmatpush1.bf16.msra.mxu0 %v853_v4  ;;  %v364_v4 = vld [vmem:[%s1398_s7 + $0x240] sm:$0xff] }
 0x23c   :  { %v171_v20 = vsel %vm169_vm3, %v168_v18, %v170_v19  ;;  %v855_v18 = vpack.c.bf16 %v330_v15, %v325_v13  ;;  %v857_v19 = vpack.c.bf16 %v329_v17, %v324_v16  ;;  %v873_v6 = vpack.c.bf16 %v369_v5, %v364_v4  ;;  %v265_v13 = vld [vmem:[%s1399_s6] sm:$0x3] }
 0x23d   :  { %720 = vmatmul.mubr.f32.vlgmr.msra.gmra.mrb[0].mxu1 %v171_v20  ;;  %v333_v20 = vld [vmem:[%s1398_s7 + $0x148] sm:$0xff]  ;;  %v287_v17 = vrot.slane %v265_v13, %v1107_v12 }
 0x23e   :  { %463 = vmatprep.mubr.f32.mxu1 %v909_v58  ;;  %814 = vmatpush1.bf16.msra.mxu1 %v813_v33  ;;  %v348_v33 = vld [vmem:[%s1398_s7 + $0x1c0] sm:$0xff] }
 0x23f   :  { %816 = vmatprep.subr.bf16.mxu1 %v815_v42  ;;  %856 = vmatprep.subr.bf16.mxu0 %v855_v18  ;;  %v831_v34 = vpack.c.bf16 %v348_v33, %v343_v32  ;;  %v863_v42 = vpack.c.bf16 %v350_v39, %v345_v37  ;;  %v336_v32 = vld [vmem:[%s1398_s7 + $0x160] sm:$0xff]  ;;  %v341_v33 = vld [vmem:[%s1398_s7 + $0x188] sm:$0xff]  ;;  %v891_v37 = vpack.c.bf16 %v351_v36, %v346_v35 }
 0x240   :  { %858 = vmatpush1.bf16.msra.mxu0 %v857_v19  ;;  %v296_v19 = vld [vmem:[%s1398_s7 + $0x20] sm:$0xff]  ;;  %v361_v39 = vld [vmem:[%s1398_s7 + $0x228] sm:$0xff] }
 0x242   :  { %818 = vmatpush1.bf16.msra.mxu1 %v817_v43  ;;  %v865_v43 = vpack.c.bf16 %v349_v41, %v344_v40  ;;  %v366_v41 = vld [vmem:[%s1398_s7 + $0x250] sm:$0xff] }
 0x243   :  { %820 = vmatprep.subr.bf16.mxu1 %v819_v52  ;;  %v354_v52 = vld [vmem:[%s1398_s7 + $0x1f0] sm:$0xff] }
 0x246   :  { %822 = vmatpush1.bf16.msra.mxu1 %v821_v62  ;;  %v367_v62 = vld [vmem:[%s1398_s7 + $0x258] sm:$0xff] }
 0x247   :  { %824 = vmatprep.subr.bf16.mxu1 %v823_v7  ;;  %v841_v2 = vpack.c.bf16 %v367_v62, %v362_v60 }
 0x24a   :  { %826 = vmatpush1.bf16.msra.mxu1 %v825_v14  ;;  %v282_v14 = vrot.slane %v265_v13, %v1101_v10 }
 0x310   :  { %v261_v22 = vpop.f32.mrb[0].mxu1 }
 0x311   :  { %v262_v23 = vadd.f32 %v651_v21, %v261_v22  ;;  %v721_v24 = vpop.f32.mrb[1].mxu1  ;;  %v338_v21 = vld [vmem:[%s1398_s7 + $0x170] sm:$0xff] }
 0x312   :  { %v827_v22 = vpack.c.bf16 %v338_v21, %v333_v20  ;;  %v337_v24 = vld [vmem:[%s1398_s7 + $0x168] sm:$0xff] }
 0x313   :  { %v266_v25 = vsel %vm144_vm1, %v262_v23, 0.0  ;;  %v301_v20 = vld [vmem:[%s1398_s7 + $0x48] sm:$0xff] }
 0x314   :  { %267 = vadd.xlane.f32.xlu1 %v266_v25  ;;  %v335_v25 = vld [vmem:[%s1398_s7 + $0x158] sm:$0xff]  ;;  %828 = vmatprep.subr.bf16.mxu1 %v827_v22 }
 0x315   :  { %v859_v30 = vpack.c.bf16 %v340_v27, %v335_v25  ;;  %v316_v27 = vld [vmem:[%s1398_s7 + $0xc0] sm:$0xff] }
 0x316   :  { %v882_v29 = vpack.c.bf16 %v321_v28, %v316_v27 }
 0x317   :  { %860 = vmatprep.subr.bf16.mxu0 %v859_v30  ;;  %v326_v30 = vld [vmem:[%s1398_s7 + $0x110] sm:$0xff] }
 0x318   :  { %862 = vmatpush1.bf16.msra.mxu0 %v861_v31 }
 0x319   :  { %864 = vmatprep.subr.bf16.mxu0 %v863_v42  ;;  %v371_v42 = vld [vmem:[%s1398_s7 + $0x278] sm:$0xff] }
 0x31c   :  { %866 = vmatpush1.bf16.msra.mxu0 %v865_v43  ;;  %v897_v43 = vpack.c.bf16 %v371_v42, %v366_v41 }
 0x3a1   :  { %v268_v53 = vpop.xlane.xlu1 %267 }
 0x3a2   :  { %v269_v54 = vmul.f32 0.0078125, %v268_v53  ;;  %v359_v53 = vld [vmem:[%s1398_s7 + $0x218] sm:$0xff] }
 0x3a4   :  { %v1170_v55 = vsub.f32 %v262_v23, %v269_v54  ;;  %v332_v23 = vld [vmem:[%s1398_s7 + $0x140] sm:$0xff]  ;;  %v867_v54 = vpack.c.bf16 %v360_v51, %v355_v49  ;;  %v377_v49 = vrot.slane %v372_v45, %v1101_v10  ;;  %v381_v51 = vrot.slane %v372_v45, %v1107_v12 }
 0x3a5   :  { %v829_v26 = vpack.c.bf16 %v337_v24, %v332_v23  ;;  %v876_v23 = vpack.c.bf16 %v301_v20, %v296_v19  ;;  %v306_v24 = vld [vmem:[%s1398_s7 + $0x70] sm:$0xff]  ;;  %v392_v12 = vsub.s32 4, %v1098_v9 }
 0x3a6   :  { %v271_v56 = vmul.f32 %v1170_v55, %v1170_v55  ;;  %868 = vmatprep.subr.bf16.mxu0 %v867_v54 }
 0x3a7   :  { %830 = vmatpush1.bf16.msra.mxu1 %v829_v26  ;;  %v393_v5 = vrot.slane %v372_v45, %v392_v12 }
 0x3a8   :  { %v272_v57 = vsel %vm144_vm1, %v271_v56, 0.0  ;;  %832 = vmatprep.subr.bf16.mxu1 %v831_v34  ;;  %v869_v56 = vpack.c.bf16 %v359_v53, %v354_v52  ;;  %v888_v34 = vpack.c.bf16 %v341_v33, %v336_v32  ;;  %v389_v53 = vrot.slane %v372_v45, %v388_v48 }
 0x3a9   :  { %273 = vadd.xlane.f32.xlu1 %v272_v57  ;;  %v363_v57 = vld [vmem:[%s1398_s7 + $0x238] sm:$0xff] }
 0x3aa   :  { %v839_v61 = vpack.c.bf16 %v368_v59, %v363_v57  ;;  %870 = vmatpush1.bf16.msra.mxu0 %v869_v56 }
 0x3ab   :  { %834 = vmatpush1.bf16.msra.mxu1 %v833_v38  ;;  %872 = vmatprep.subr.bf16.mxu0 %v871_v3  ;;  %v356_v38 = vld [vmem:[%s1398_s7 + $0x200] sm:$0xff] }
 0x3ac   :  { %836 = vmatprep.subr.bf16.mxu1 %v835_v46  ;;  %v894_v40 = vpack.c.bf16 %v361_v39, %v356_v38  ;;  %v910_v46 = vmov 1983009808  }
 0x3ad   :  { %v619_v47 = vunpack.c.l.s4 %v910_v46 }
 0x3ae   :  { %874 = vmatpush1.bf16.msra.mxu0 %v873_v6 }
 0x3af   :  { %838 = vmatpush1.bf16.msra.mxu1 %v837_v50  ;;  %v385_v50 = vrot.slane %v372_v45, %v384_v44  ;;  %v620_v52 = vunpack.c.0.s8 %v619_v47 }
 0x3b0   :  { %840 = vmatprep.subr.bf16.mxu1 %v839_v61 }
 0x3b1   :  { %v623_v62 = vsub.s32 %v620_v52, %v1098_v9 }
 0x3b3   :  { %842 = vmatpush1.bf16.msra.mxu1 %v841_v2 }
 0x3b4   :  { %875 = vmatprep.subr.bf16.mxu1 %v907_v0 }
 0x436   :  { %v274_v7 = vpop.xlane.xlu1 %273 }
 0x437   :  { %v275_v8 = vmul.f32 0.0078125, %v274_v7 }
 0x439   :  { %v276_v11 = vadd.f32 1e-05, %v275_v8 }
 0x43b   :  { %905 = vrsqrt.f32 %v276_v11 }
 0x445   :  { %v906_v15 = vpop.eup %905 }
 0x446   :  { %v278_v16 = vmul.f32 %v906_v15, %v1170_v55  ;;  %v311_v55 = vld [vmem:[%s1398_s7 + $0x98] sm:$0xff] }
 0x447   :  { %v879_v26 = vpack.c.bf16 %v311_v55, %v306_v24 }
 0x448   :  { %v283_v18 = vmul.f32 %v282_v14, %v278_v16 }
 0x44a   :  { %v288_v21 = vadd.f32 %v287_v17, %v283_v18 }
 0x44c   :  { %vm289_vm4 = vcmp.ge.f32.partialorder %v288_v21, 0.0  ;;  %v290_v22 = vmul.f32 0.01, %v288_v21 }
 0x44e   :  { %v291_v25 = vsel %vm289_vm4, %v288_v21, %v290_v22 }
 0x44f   :  { %464 = vmatmul.mubr.f32.vlgmr.msra.gmra.mrb[2].mxu1 %v291_v25  ;;  %535 = vmatmul.mubr.f32.vlgmr.msra.gmra.mrb[2].mxu0 %v291_v25 }
 0x450   :  { %877 = vmatpush3.bf16.msra.mxu1 %v876_v23  ;;  %754 = vmatprep.mubr.msk.f32.mxu1 %vm908_vm2, %v909_v58  ;;  %v331_v58 = vld [vmem:[%s1398_s7 + $0x138] sm:$0xff] }
 0x451   :  { %878 = vmatprep.subr.bf16.mxu1 %v907_v0  ;;  %v885_v31 = vpack.c.bf16 %v331_v58, %v326_v30 }
 0x454   :  { %880 = vmatpush3.bf16.msra.mxu1 %v879_v26 }
 0x455   :  { %881 = vmatprep.subr.bf16.mxu1 %v907_v0 }
 0x458   :  { %883 = vmatpush3.bf16.msra.mxu1 %v882_v29 }
 0x459   :  { %884 = vmatprep.subr.bf16.mxu1 %v907_v0 }
 0x45c   :  { %886 = vmatpush3.bf16.msra.mxu1 %v885_v31 }
 0x45d   :  { %887 = vmatprep.subr.bf16.mxu1 %v907_v0 }
 0x460   :  { %889 = vmatpush3.bf16.msra.mxu1 %v888_v34 }
 0x461   :  { %890 = vmatprep.subr.bf16.mxu1 %v907_v0 }
 0x464   :  { %892 = vmatpush3.bf16.msra.mxu1 %v891_v37 }
 0x465   :  { %893 = vmatprep.subr.bf16.mxu1 %v907_v0 }
 0x468   :  { %895 = vmatpush3.bf16.msra.mxu1 %v894_v40 }
 0x469   :  { %896 = vmatprep.subr.bf16.mxu1 %v907_v0 }
 0x46c   :  { %898 = vmatpush3.bf16.msra.mxu1 %v897_v43 }
 0x46f   :  { %755 = vmatmul.mubr.f32.vlgmr.msra.gmra.mrb[4].mxu1 %v291_v25 }
 0x522   :  { %v465_v0 = vpop.f32.mrb[2].mxu1  ;;  %v536_v54 = vpop.f32.mrb[2].mxu0 }
 0x523   :  { %v466_v56 = vadd.f32 %v465_v0, %v377_v49  ;;  %v537_v57 = vadd.f32 %v536_v54, %v385_v50  ;;  %v467_v59 = vpop.f32.mrb[3].mxu1  ;;  %v538_v60 = vpop.f32.mrb[3].mxu0 }
 0x524   :  { %v468_v61 = vadd.f32 %v467_v59, %v381_v51  ;;  %v539_v63 = vadd.f32 %v538_v60, %v389_v53 }
 0x526   :  { %v616_v1 = vcombine.low %v466_v56, %v468_v61  ;;  %v617_v2 = vcombine.low %v537_v57, %v539_v63 }
 0x528   :  { %v624_v3 = vrot.slane %v616_v1, %v623_v62  ;;  %v631_v4 = vrot.slane %v617_v2, %v623_v62 }
 0x52a   :  { %v632_v10 = vcombine.low %v624_v3, %v631_v4 }
 0x52c   :  { %642 = vst [vmem:[%s1401_s9] sm:$0xff] %v632_v10 }
 0x542   :  { %v607_v6 = vpop.f32.mrb[4].mxu1 }
 0x543   :  { %v608_v7 = vadd.f32 %v607_v6, %v393_v5  ;;  %v756_v8 = vpop.f32.mrb[5].mxu1 }
 0x545   :  { %652 = vst.sshfl [vmem:[%s1401_s9 + $0x8] sm:$0x3 pattern:$0x76325410] %v608_v7 }

// kernel: local_facial_extractor.10
= control target key start
LH: loop header
LB: loop body
LE: loop exit
PB: predicated region body
PF: predicated region fallthrough
CT: control target
= control target key end

     0   :  { %s4627_s27 = smov 0   ;;  %s5583_s0 = inlined_call_operand.vmem [shape: f32[2,13,128], index: 0, kind: input, shape index: {}]   ;;  %s5584_s1 = inlined_call_operand.vmem [shape: f32[2,13,128], index: 1, kind: input, shape index: {}]   ;;  %s5585_s2 = inlined_call_operand.vmem [shape: f32[6,128], index: 2, kind: input, shape index: {}]   ;;  %s5586_s3 = inlined_call_operand.vmem [shape: f32[128,128], index: 3, kind: input, shape index: {}]   ;;  %s5587_s4 = inlined_call_operand.vmem [shape: f32[128,256], index: 4, kind: input, shape index: {}]   ;;  %s5588_s5 = inlined_call_operand.vmem [shape: f32[128,128], index: 5, kind: input, shape index: {}]   ;;  %s5589_s6 = inlined_call_operand.vmem [shape: f32[128,512], index: 6, kind: input, shape index: {}]   ;;  %s5590_s7 = inlined_call_operand.vmem [shape: f32[512,128], index: 7, kind: input, shape index: {}]   ;;  %s5591_s8 = inlined_call_operand.vmem [shape: f32[2,13,128], index: 8, kind: output, shape index: {}]  }
   0x1 LB: > { %s3322_s28 = sadd.s32 4294967295, %s4575_s27   ;;  %p3326_p0 = scmp.ge.s32.totalorder %s4575_s27, 1  ;;  %s4575_s27 = sphi %s4627_s27, %s18_s27  }
   0x2   : > { %p272_p1 = scmp.lt.s32.totalorder %s4575_s27, 3 }
   0x4   : > { %p273_p2 = pnand %p3326_p0, %p272_p1 }
   0x5   : > { %p311_p3 = scmp.lt.s32.totalorder (!%p273_p2), %s3322_s28, 1  ;;  %vm333_vm0 = vcmask (!%p273_p2), 1044480   ;;  %v498_v6 = vld [vmem:[%s5587_s4] sm:$0xff] (!%p273_p2)  ;;  %v499_v7 = vld [vmem:[%s5587_s4 + $0x10] sm:$0xff] (!%p273_p2)  ;;  %v406_v10 = vld [vmem:[%s5586_s3 + $0x8] sm:$0xff] (!%p273_p2)  ;;  %vm830_vm1 = vcmask (!%p273_p2), 261120  }
   0x6   : > { %276 = sbr.rel (%p273_p2) target bundleno = 3204 (0xc84), region = 52  ;;  %v405_v8 = vld [vmem:[%s5586_s3] sm:$0xff] (!%p273_p2)  ;;  %v4660_v9 = vpack.c.bf16 (!%p273_p2), %v499_v7, %v498_v6  ;;  %v501_v12 = vld [vmem:[%s5587_s4 + $0x30] sm:$0xff] (!%p273_p2)  ;;  %v408_v34 = vld [vmem:[%s5586_s3 + $0x18] sm:$0xff] (!%p273_p2)  ;;  %vm4577_vm3 = vmmov (!%p273_p2), 1   ;;  %vm999_vm5 = vcmask (!%p273_p2), 105472  }
   0x7   : > { %v500_v11 = vld [vmem:[%s5587_s4 + $0x20] sm:$0xff] (!%p273_p2)  ;;  %v3987_v13 = vpack.c.bf16 (!%p273_p2), %v406_v10, %v405_v8  ;;  %v407_v33 = vld [vmem:[%s5586_s3 + $0x10] sm:$0xff] (!%p273_p2)  ;;  %v410_v40 = vld [vmem:[%s5586_s3 + $0x28] sm:$0xff] (!%p273_p2)  ;;  %vm1003_vm6 = vcmask (!%p273_p2), 102400   ;;  %s4578_s17 = smov (!%p273_p2), 96   ;;  %s4579_s18 = smov (!%p273_p2), 64  }
   0x8   : > { %v4671_v14 = vpack.c.bf16 (!%p273_p2), %v501_v12, %v500_v11  ;;  %4020 = vmatprep.subr.bf16.mxu1 (!%p273_p2), %v4660_v9  ;;  %v502_v35 = vld [vmem:[%s5587_s4 + $0x40] sm:$0xff] (!%p273_p2)  ;;  %v3991_v36 = vpack.c.bf16 (!%p273_p2), %v408_v34, %v407_v33  ;;  %v503_v37 = vld [vmem:[%s5587_s4 + $0x50] sm:$0xff] (!%p273_p2)  ;;  %v412_v46 = vld [vmem:[%s5586_s3 + $0x38] sm:$0xff] (!%p273_p2)  ;;  %s4580_s19 = smov (!%p273_p2), 32  }
   0x9   : > { %4022 = vmatpush3.bf16.msra.mxu1 (!%p273_p2), %v4660_v9  ;;  %3988 = vmatprep.subr.bf16.mxu0 (!%p273_p2), %v3987_v13  ;;  %v4707_v38 = vpack.c.bf16 (!%p273_p2), %v503_v37, %v502_v35  ;;  %v409_v39 = vld [vmem:[%s5586_s3 + $0x20] sm:$0xff] (!%p273_p2)  ;;  %v505_v43 = vld [vmem:[%s5587_s4 + $0x70] sm:$0xff] (!%p273_p2)  ;;  %v414_v52 = vld [vmem:[%s5586_s3 + $0x48] sm:$0xff] (!%p273_p2) }
   0xa   : > { %4024 = vmatprep.subr.bf16.mxu1 (!%p273_p2), %v4671_v14  ;;  %3990 = vmatpush3.bf16.msra.mxu0 (!%p273_p2), %v3987_v13  ;;  %v504_v41 = vld [vmem:[%s5587_s4 + $0x60] sm:$0xff] (!%p273_p2)  ;;  %v3995_v42 = vpack.c.bf16 (!%p273_p2), %v410_v40, %v409_v39  ;;  %v411_v45 = vld [vmem:[%s5586_s3 + $0x30] sm:$0xff] (!%p273_p2)  ;;  %v416_v58 = vld [vmem:[%s5586_s3 + $0x58] sm:$0xff] (!%p273_p2) }
   0xb   : > { %3992 = vmatprep.subr.bf16.mxu0 (!%p273_p2), %v3991_v36  ;;  %v4723_v44 = vpack.c.bf16 (!%p273_p2), %v505_v43, %v504_v41  ;;  %v506_v47 = vld [vmem:[%s5587_s4 + $0x80] sm:$0xff] (!%p273_p2)  ;;  %v3999_v48 = vpack.c.bf16 (!%p273_p2), %v412_v46, %v411_v45  ;;  %v507_v49 = vld [vmem:[%s5587_s4 + $0x90] sm:$0xff] (!%p273_p2)  ;;  %v418_v63 = vld [vmem:[%s5586_s3 + $0x68] sm:$0xff] (!%p273_p2) }
   0xc   : > { %v4739_v50 = vpack.c.bf16 (!%p273_p2), %v507_v49, %v506_v47  ;;  %v413_v51 = vld [vmem:[%s5586_s3 + $0x40] sm:$0xff] (!%p273_p2)  ;;  %v509_v55 = vld [vmem:[%s5587_s4 + $0xb0] sm:$0xff] (!%p273_p2)  ;;  %v420_v6 = vld [vmem:[%s5586_s3 + $0x78] sm:$0xff] (!%p273_p2) }
   0xd   : > { %s5597_s28 = smov (!%p311_p3, %s3322_s28), 1  ;;  %4026 = vmatpush3.bf16.msra.mxu1 %v4671_v14  ;;  %v508_v53 = vld [vmem:[%s5587_s4 + $0xa0] sm:$0xff]  ;;  %v4003_v54 = vpack.c.bf16 %v414_v52, %v413_v51  ;;  %v415_v57 = vld [vmem:[%s5586_s3 + $0x50] sm:$0xff]  ;;  %v514_v8 = vld [vmem:[%s5587_s4 + $0x8] sm:$0xff] }
   0xe   : > { %s4635_s29 = sshll.u32 %s5597_s28, 4  ;;  %4028 = vmatprep.subr.bf16.mxu1 %v4707_v38  ;;  %3994 = vmatpush3.bf16.msra.mxu0 %v3991_v36  ;;  %v4755_v56 = vpack.c.bf16 %v509_v55, %v508_v53  ;;  %v510_v59 = vld [vmem:[%s5587_s4 + $0xc0] sm:$0xff]  ;;  %v4007_v60 = vpack.c.bf16 %v416_v58, %v415_v57  ;;  %v511_v61 = vld [vmem:[%s5587_s4 + $0xd0] sm:$0xff]  ;;  %v515_v10 = vld [vmem:[%s5587_s4 + $0x18] sm:$0xff] }
   0xf   : > { %s315_s10 = scalar_lea.vmem %s5583_s0, %s4635_s29  ;;  %s4645_s13 = scalar_lea.vmem %s5584_s1, %s4635_s29  ;;  %3996 = vmatprep.subr.bf16.mxu0 %v3995_v42  ;;  %v417_v62 = vld [vmem:[%s5586_s3 + $0x60] sm:$0xff]  ;;  %v4804_v11 = vpack.c.bf16 %v515_v10, %v514_v8  ;;  %v516_v57 = vld [vmem:[%s5587_s4 + $0x28] sm:$0xff]  ;;  %v529_v8 = vld [vmem:[%s5587_s4 + $0xf8] sm:$0xff] }
  0x10   : > { %v326_v0 = vld [vmem:[%s315_s10] sm:$0xff]  ;;  %v327_v1 = vld [vmem:[%s315_s10 + $0x8] sm:$0x1f]  ;;  %vm4892_vm2 = vmpackc.low %vm830_vm1, %vm830_vm1  ;;  %s325_s14 = scalar_lea.vmem %s5591_s8, %s4635_s29 }
  0x11   : > { %331 = vadd.xlane.f32.xlu0 %v326_v0  ;;  %v328_v2 = vld [vmem:[%s4645_s13] sm:$0xff]  ;;  %v329_v3 = vld [vmem:[%s4645_s13 + $0x8] sm:$0x1f]  ;;  %v334_v4 = vsel %vm333_vm0, %v327_v1, 0.0  ;;  %4030 = vmatpush3.bf16.msra.mxu1 %v4707_v38  ;;  %vm4923_vm4 = vmpackc.low %vm333_vm0, %vm4577_vm3 }
  0x12   : > { %369 = vadd.xlane.f32.xlu1 %v328_v2  ;;  %v371_v5 = vsel %vm333_vm0, %v329_v3, 0.0  ;;  %4032 = vmatprep.subr.bf16.mxu1 %v4723_v44 }
  0x13   : > { %3998 = vmatpush3.bf16.msra.mxu0 %v3995_v42 }
  0x14   : > { %4000 = vmatprep.subr.bf16.mxu0 %v3999_v48 }
  0x15   : > { %335 = vadd.xlane.f32.xlu0 %v334_v4  ;;  %4034 = vmatpush3.bf16.msra.mxu1 %v4723_v44 }
  0x16   : > { %372 = vadd.xlane.f32.xlu1 %v371_v5  ;;  %4036 = vmatprep.subr.bf16.mxu1 %v4739_v50  ;;  %v419_v5 = vld [vmem:[%s5586_s3 + $0x70] sm:$0xff] }
  0x17   : > { %4002 = vmatpush3.bf16.msra.mxu0 %v3999_v48  ;;  %v4015_v7 = vpack.c.bf16 %v420_v6, %v419_v5  ;;  %v527_v6 = vld [vmem:[%s5587_s4 + $0xd8] sm:$0xff] }
  0x18   : > { %4004 = vmatprep.subr.bf16.mxu0 %v4003_v54 }
  0x19   : > { %4038 = vmatpush3.bf16.msra.mxu1 %v4739_v50 }
  0x1a   : > { %4040 = vmatprep.subr.bf16.mxu1 %v4755_v56 }
  0x1b   : > { %4006 = vmatpush3.bf16.msra.mxu0 %v4003_v54 }
  0x1c   : > { %4008 = vmatprep.subr.bf16.mxu0 %v4007_v60 }
  0x1d   : > { %4042 = vmatpush3.bf16.msra.mxu1 %v4755_v56 }
  0x1f   : > { %4010 = vmatpush3.bf16.msra.mxu0 %v4007_v60  ;;  %v519_v60 = vld [vmem:[%s5587_s4 + $0x58] sm:$0xff] }
  0x9e   : > { %v332_v15 = vpop.xlane.xlu0 %331 }
  0x9f   : > { %v338_v16 = vmul.f32 0.0078125, %v332_v15  ;;  %v370_v17 = vpop.xlane.xlu1 %369  ;;  %v357_v15 = vlaneseq }
  0xa0   : > { %v374_v18 = vmul.f32 0.0078125, %v370_v17 }
  0xa1   : > { %v4677_v19 = vsub.f32 %v326_v0, %v338_v16  ;;  %v4777_v0 = vpack.c.bf16 %v511_v61, %v510_v59  ;;  %v518_v59 = vld [vmem:[%s5587_s4 + $0x48] sm:$0xff] }
  0xa2   : > { %v4679_v20 = vsub.f32 %v328_v2, %v374_v18  ;;  %v336_v21 = vpop.xlane.xlu0 %335  ;;  %v512_v2 = vld [vmem:[%s5587_s4 + $0xe0] sm:$0xff]  ;;  %v520_v61 = vld [vmem:[%s5587_s4 + $0x68] sm:$0xff] }
  0xa3   : > { %v339_v22 = vmul.f32 0.0078125, %v336_v21  ;;  %v342_v23 = vmul.f32 %v4677_v19, %v4677_v19  ;;  %v373_v24 = vpop.xlane.xlu1 %372  ;;  %4044 = vmatprep.subr.bf16.mxu1 %v4777_v0 }
  0xa4   : > { %v375_v25 = vmul.f32 0.0078125, %v373_v24  ;;  %v378_v27 = vmul.f32 %v4679_v20, %v4679_v20  ;;  %4046 = vmatpush3.bf16.msra.mxu1 %v4777_v0 }
  0xa5   : > { %v4683_v26 = vsub.f32 %v327_v1, %v339_v22  ;;  %344 = vadd.xlane.f32.xlu0 %v342_v23  ;;  %v4011_v1 = vpack.c.bf16 %v418_v63, %v417_v62  ;;  %v4807_v23 = vshrl.u32 %v357_v15, 7  ;;  %v521_v62 = vld [vmem:[%s5587_s4 + $0x78] sm:$0xff]  ;;  %v522_v63 = vld [vmem:[%s5587_s4 + $0x88] sm:$0xff] }
  0xa6   : > { %v4687_v28 = vsub.f32 %v329_v3, %v375_v25  ;;  %v513_v3 = vld [vmem:[%s5587_s4 + $0xf0] sm:$0xff] }
  0xa7   : > { %v343_v29 = vmul.f32 %v4683_v26, %v4683_v26  ;;  %v4785_v4 = vpack.c.bf16 %v513_v3, %v512_v2  ;;  %4012 = vmatprep.subr.bf16.mxu0 %v4011_v1  ;;  %v365_v33 = vsub.s32 1, %v4807_v23  ;;  %v395_v35 = vsub.s32 2, %v4807_v23  ;;  %v525_v3 = vld [vmem:[%s5587_s4 + $0xb8] sm:$0xff] }
  0xa8   : > { %v379_v30 = vmul.f32 %v4687_v28, %v4687_v28  ;;  %4014 = vmatpush3.bf16.msra.mxu0 %v4011_v1  ;;  %v401_v40 = vsub.s32 3, %v4807_v23  ;;  %v523_v1 = vld [vmem:[%s5587_s4 + $0x98] sm:$0xff] }
  0xa9   : > { %380 = vadd.xlane.f32.xlu0 %v378_v27  ;;  %v346_v31 = vsel %vm333_vm0, %v343_v29, 0.0  ;;  %4048 = vmatprep.subr.bf16.mxu1 %v4785_v4  ;;  %v4067_v2 = vpack.c.bf16 %v523_v1, %v522_v63 }
  0xaa   : > { %347 = vadd.xlane.f32.xlu1 %v346_v31  ;;  %v382_v32 = vsel %vm333_vm0, %v379_v30, 0.0  ;;  %4050 = vmatpush3.bf16.msra.mxu1 %v4785_v4  ;;  %v359_v30 = vsub.s32 0, %v4807_v23  ;;  %v330_v31 = vld [vmem:[%s5585_s2] sm:$0x3f] }
  0xab   : > { %4016 = vmatprep.subr.bf16.mxu0 %v4015_v7  ;;  %4084 = vmatprep.subr.bf16.mxu1 %v4660_v9  ;;  %v366_v39 = vrot.slane %v330_v31, %v365_v33  ;;  %v396_v42 = vrot.slane %v330_v31, %v395_v35  ;;  %v402_v48 = vrot.slane %v330_v31, %v401_v40 }
  0xac   : > { %4018 = vmatpush3.bf16.msra.mxu0 %v4015_v7  ;;  %v360_v34 = vrot.slane %v330_v31, %v359_v30 }
  0xad   : > { %4052 = vmatprep.subr.bf16.mxu0 %v4804_v11 }
  0xae   : > { %383 = vadd.xlane.f32.xlu1 %v382_v32 }
 0x132   : > { %v345_v12 = vpop.xlane.xlu0 %344 }
 0x133   : > { %v349_v13 = vmul.f32 0.0078125, %v345_v12 }
 0x135   : > { %v351_v16 = vadd.f32 1e-05, %v349_v13 }
 0x136   : > { %v381_v17 = vpop.xlane.xlu0 %380 }
 0x137   : > { %4490 = vrsqrt.f32 %v351_v16  ;;  %v385_v18 = vmul.f32 0.0078125, %v381_v17  ;;  %v348_v21 = vpop.xlane.xlu1 %347 }
 0x138   : > { %v350_v22 = vmul.f32 0.0078125, %v348_v21 }
 0x139   : > { %v387_v24 = vadd.f32 1e-05, %v385_v18 }
 0x13a   : > { %v352_v25 = vadd.f32 1e-05, %v350_v22 }
 0x13b   : > { %4492 = vrsqrt.f32 %v387_v24  ;;  %v384_v27 = vpop.xlane.xlu1 %383 }
 0x13c   : > { %4494 = vrsqrt.f32 %v352_v25  ;;  %v386_v29 = vmul.f32 0.0078125, %v384_v27 }
 0x13e   : > { %v388_v32 = vadd.f32 1e-05, %v386_v29 }
 0x140   : > { %4496 = vrsqrt.f32 %v388_v32 }
 0x141   : > { %v4491_v36 = vpop.eup %4490 }
 0x142   : > { %v355_v37 = vmul.f32 %v4491_v36, %v4677_v19 }
 0x144   : > { %v361_v41 = vmul.f32 %v360_v34, %v355_v37 }
 0x145   : > { %v4493_v43 = vpop.eup %4492 }
 0x146   : > { %v4495_v45 = vpop.eup %4494  ;;  %v367_v46 = vadd.f32 %v366_v39, %v361_v41  ;;  %v391_v47 = vmul.f32 %v4493_v43, %v4679_v20  ;;  %v517_v20 = vld [vmem:[%s5587_s4 + $0x38] sm:$0xff] }
 0x147   : > { %v356_v49 = vmul.f32 %v4495_v45, %v4683_v26 }
 0x148   : > { %3723 = vmatprep.mubr.f32.mxu1 %v367_v46  ;;  %v397_v51 = vmul.f32 %v396_v42, %v391_v47 }
 0x149   : > { %v362_v52 = vmul.f32 %v360_v34, %v356_v49 }
 0x14a   : > { %v4497_v53 = vpop.eup %4496  ;;  %v4819_v54 = vadd.f32 %v402_v48, %v397_v51 }
 0x14b   : > { %v368_v19 = vadd.f32 %v366_v39, %v362_v52  ;;  %v392_v55 = vmul.f32 %v4497_v53, %v4687_v28  ;;  %v4055_v28 = vpack.c.bf16 %v517_v20, %v516_v57 }
 0x14c   : > { %3688 = vmatprep.mubr.f32.mxu0 %v4819_v54 }
 0x14d   : > { %3724 = vmatmul.mubr.f32.vlgmr.msra.gmra.mrb[0].mxu1 %v368_v19  ;;  %v398_v26 = vmul.f32 %v396_v42, %v392_v55 }
 0x14e   : > { %4086 = vmatpush3.bf16.msra.mxu1 %v4660_v9  ;;  %3793 = vmatprep.mubr.f32.mxu1 %v4819_v54  ;;  %v4059_v9 = vpack.c.bf16 %v519_v60, %v518_v59 }
 0x14f   : > { %4088 = vmatprep.subr.bf16.mxu1 %v4671_v14  ;;  %v4832_v58 = vadd.f32 %v402_v48, %v398_v26 }
 0x151   : > { %3689 = vmatmul.mubr.f32.vlgmr.msra.gmra.mrb[0].mxu0 %v4832_v58 }
 0x152   : > { %4054 = vmatpush3.bf16.msra.mxu0 %v4804_v11  ;;  %4090 = vmatpush3.bf16.msra.mxu1 %v4671_v14  ;;  %v4063_v14 = vpack.c.bf16 %v521_v62, %v520_v61 }
 0x153   : > { %3758 = vmatprep.mubr.f32.mxu0 %v367_v46  ;;  %4056 = vmatprep.subr.bf16.mxu0 %v4055_v28 }
 0x154   : > { %4092 = vmatprep.subr.bf16.mxu1 %v4707_v38 }
 0x156   : > { %4058 = vmatpush3.bf16.msra.mxu0 %v4055_v28  ;;  %4094 = vmatpush3.bf16.msra.mxu1 %v4707_v38  ;;  %v524_v38 = vld [vmem:[%s5587_s4 + $0xa8] sm:$0xff] }
 0x157   : > { %4060 = vmatprep.subr.bf16.mxu0 %v4059_v9  ;;  %4096 = vmatprep.subr.bf16.mxu1 %v4723_v44  ;;  %v4071_v5 = vpack.c.bf16 %v525_v3, %v524_v38 }
 0x15a   : > { %4062 = vmatpush3.bf16.msra.mxu0 %v4059_v9  ;;  %4098 = vmatpush3.bf16.msra.mxu1 %v4723_v44  ;;  %v526_v44 = vld [vmem:[%s5587_s4 + $0xc8] sm:$0xff] }
 0x15b   : > { %4064 = vmatprep.subr.bf16.mxu0 %v4063_v14  ;;  %4100 = vmatprep.subr.bf16.mxu1 %v4739_v50  ;;  %v4075_v7 = vpack.c.bf16 %v527_v6, %v526_v44 }
 0x15e   : > { %4066 = vmatpush3.bf16.msra.mxu0 %v4063_v14  ;;  %4102 = vmatpush3.bf16.msra.mxu1 %v4739_v50  ;;  %v528_v50 = vld [vmem:[%s5587_s4 + $0xe8] sm:$0xff] }
 0x15f   : > { %4068 = vmatprep.subr.bf16.mxu0 %v4067_v2  ;;  %4104 = vmatprep.subr.bf16.mxu1 %v4755_v56  ;;  %v4079_v10 = vpack.c.bf16 %v529_v8, %v528_v50 }
 0x162   : > { %4070 = vmatpush3.bf16.msra.mxu0 %v4067_v2  ;;  %4106 = vmatpush3.bf16.msra.mxu1 %v4755_v56 }
 0x163   : > { %4072 = vmatprep.subr.bf16.mxu0 %v4071_v5  ;;  %4108 = vmatprep.subr.bf16.mxu1 %v4777_v0 }
 0x166   : > { %4074 = vmatpush3.bf16.msra.mxu0 %v4071_v5  ;;  %4110 = vmatpush3.bf16.msra.mxu1 %v4777_v0 }
 0x167   : > { %4076 = vmatprep.subr.bf16.mxu0 %v4075_v7  ;;  %4112 = vmatprep.subr.bf16.mxu1 %v4785_v4 }
 0x16a   : > { %4078 = vmatpush3.bf16.msra.mxu0 %v4075_v7  ;;  %4114 = vmatpush3.bf16.msra.mxu1 %v4785_v4  ;;  %v1213_v4 = vld [vmem:[%s5588_s5] sm:$0xff] }
 0x16b   : > { %4080 = vmatprep.subr.bf16.mxu0 %v4079_v10 }
 0x16d   : > { %3794 = vmatmul.mubr.f32.vlgmr.msra.gmra.mrb[2].mxu1 %v4832_v58 }
 0x16e   : > { %4082 = vmatpush3.bf16.msra.mxu0 %v4079_v10 }
 0x16f   : > { %4116 = vmatprep.subr.bf16.mxu0 %v4804_v11 }
 0x171   : > { %3759 = vmatmul.mubr.f32.vlgmr.msra.gmra.mrb[2].mxu0 %v368_v19 }
 0x172   : > { %4118 = vmatpush3.bf16.msra.mxu0 %v4804_v11  ;;  %3828 = vmatprep.mubr.f32.mxu0 %v4819_v54 }
 0x173   : > { %4120 = vmatprep.subr.bf16.mxu0 %v4055_v28 }
 0x176   : > { %4122 = vmatpush3.bf16.msra.mxu0 %v4055_v28 }
 0x177   : > { %4124 = vmatprep.subr.bf16.mxu0 %v4059_v9 }
 0x17a   : > { %4126 = vmatpush3.bf16.msra.mxu0 %v4059_v9 }
 0x17b   : > { %4128 = vmatprep.subr.bf16.mxu0 %v4063_v14 }
 0x17e   : > { %4130 = vmatpush3.bf16.msra.mxu0 %v4063_v14 }
 0x17f   : > { %4132 = vmatprep.subr.bf16.mxu0 %v4067_v2 }
 0x182   : > { %4134 = vmatpush3.bf16.msra.mxu0 %v4067_v2 }
 0x183   : > { %4136 = vmatprep.subr.bf16.mxu0 %v4071_v5 }
 0x186   : > { %4138 = vmatpush3.bf16.msra.mxu0 %v4071_v5 }
 0x187   : > { %4140 = vmatprep.subr.bf16.mxu0 %v4075_v7 }
 0x18a   : > { %4142 = vmatpush3.bf16.msra.mxu0 %v4075_v7 }
 0x18b   : > { %4144 = vmatprep.subr.bf16.mxu0 %v4079_v10 }
 0x18e   : > { %4146 = vmatpush3.bf16.msra.mxu0 %v4079_v10 }
 0x191   : > { %3829 = vmatmul.mubr.f32.vlgmr.msra.gmra.mrb[4].mxu0 %v4832_v58 }
 0x220   : > { %v3725_v56 = vpop.f32.mrb[0].mxu1 }
 0x221   : > { %v596_v0 = vpop.f32.mrb[1].mxu1 }
 0x222   : > { %v4147_v11 = vpack.c.bf16 %v3725_v56, %v596_v0  ;;  %v4896_v12 = vpack.i.bf16 %v3725_v56, %v596_v0 }
 0x224   : > { %v3690_v13 = vpop.f32.mrb[0].mxu0  ;;  %4149 = vmatprep.subr.msk.bf16.mxu1 %vm4892_vm2, %v4147_v11 }
 0x225   : > { %v487_v15 = vpop.f32.mrb[1].mxu0  ;;  %4152 = vmatpush3.bf16.xpose.msk.msra.mxu1 %vm4892_vm2, %v4147_v11  ;;  %v4906_v17 = vmul.f32 0.17677669, %v3690_v13 }
 0x226   : > { %v4902_v16 = vmul.f32 0.17677669, %v487_v15 }
 0x228   : > { %3835 = vmatprep.mubr.msk.f32.mxu1 %vm830_vm1, %v4902_v16 }
 0x22c   : > { %3836 = vmatmul.mubr.msk.f32.vlgmr.msra.gmra.mrb[4].mxu1 %vm830_vm1, %v4906_v17 }
 0x22d   : > { %3842 = vmatprep.mubr.msk.f32.mxu1 %vm830_vm1, %v4902_v16 }
 0x240   : > { %v3795_v18 = vpop.f32.mrb[2].mxu1 }
 0x241   : > { %v746_v21 = vpop.f32.mrb[3].mxu1 }
 0x242   : > { %v4153_v22 = vpack.c.bf16 %v3795_v18, %v746_v21  ;;  %v4912_v24 = vpack.i.bf16 %v3795_v18, %v746_v21 }
 0x244   : > { %v3760_v25 = vpop.f32.mrb[2].mxu0  ;;  %4155 = vmatprep.subr.msk.bf16.mxu1 %vm4892_vm2, %v4153_v22 }
 0x245   : > { %v671_v27 = vpop.f32.mrb[3].mxu0  ;;  %4158 = vmatpush3.bf16.xpose.msk.msra.mxu1 %vm4892_vm2, %v4153_v22 }
 0x246   : > { %v4165_v29 = vpack.c.bf16 %v3760_v25, %v671_v27  ;;  %v4918_v30 = vpack.i.bf16 %v3760_v25, %v671_v27 }
 0x24c   : > { %3843 = vmatmul.mubr.msk.f32.vlgmr.msra.gmra.mrb[6].mxu1 %vm830_vm1, %v4906_v17 }
 0x264   : > { %v3830_v31 = vpop.f32.mrb[4].mxu0 }
 0x265   : > { %v821_v33 = vpop.f32.mrb[5].mxu0 }
 0x266   : > { %v4159_v34 = vpack.c.bf16 %v3830_v31, %v821_v33  ;;  %v4927_v35 = vpack.i.bf16 %v3830_v31, %v821_v33 }
 0x268   : > { %4161 = vmatprep.subr.msk.bf16.mxu1 %vm4923_vm4, %v4159_v34 }
 0x269   : > { %4164 = vmatpush3.bf16.msk.msra.mxu1 %vm4923_vm4, %v4159_v34 }
 0x26a   : > { %4167 = vmatprep.subr.msk.bf16.mxu1 %vm4923_vm4, %v4165_v29 }
 0x2ff   : > { %v3837_v36 = vpop.f32.mrb[4].mxu1 }
 0x300   : > { %v909_v37 = vpop.f32.mrb[5].mxu1  ;;  %v1004_v40 = vsel %vm1003_vm6, %v3837_v36, -inf }
 0x301   : > { %v1000_v39 = vsel %vm999_vm5, %v909_v37, -inf }
 0x302   : > { %1001 = vmax.xlane.f32.xlu0 %v1000_v39 }
 0x306   : > { %1005 = vmax.xlane.f32.xlu0 %v1004_v40 }
 0x31c   : > { %4431 = vrot.lane.b32.xlu0 %v4896_v12, %s4578_s17 }
 0x31f   : > { %v3844_v41 = vpop.f32.mrb[6].mxu1 }
 0x320   : > { %v990_v42 = vpop.f32.mrb[7].mxu1  ;;  %v1010_v45 = vsel %vm1003_vm6, %v3844_v41, -inf }
 0x321   : > { %v1007_v43 = vsel %vm999_vm5, %v990_v42, -inf }
 0x322   : > { %1008 = vmax.xlane.f32.xlu1 %v1007_v43 }
 0x326   : > { %1011 = vmax.xlane.f32.xlu1 %v1010_v45 }
 0x337   : > { %4436 = vrot.lane.b32.xlu1 %v4912_v24, %s4578_s17 }
 0x33b   : > { %1217 = vrot.lane.b32.xlu1 %v4902_v16, %s4578_s17 }
 0x33f   : > { %1219 = vrot.lane.b32.xlu1 %v4906_v17, %s4578_s17 }
 0x38f   : > { %v1002_v46 = vpop.xlane.xlu0 %1001 }
 0x393   : > { %v1006_v51 = vpop.xlane.xlu0 %1005 }
 0x397   : > { %v4432_v58 = vpop.permute.xlu0 %4431 }
 0x398   : > { %v4434_v60 = vunpack.i.h.bf16 %v4432_v58  ;;  %v4433_v9 = vunpack.i.l.bf16 %v4432_v58 }
 0x39a   : > { %v4171_v14 = vpack.c.bf16 %v4434_v60, %v4433_v9 }
 0x3af   : > { %v1009_v47 = vpop.xlane.xlu1 %1008 }
 0x3b0   : > { %v1013_v48 = vmax.f32 %v1002_v46, %v1009_v47 }
 0x3b2   : > { %v1021_v49 = vsub.f32 %v990_v42, %v1013_v48  ;;  %v1015_v53 = vsub.f32 %v909_v37, %v1013_v48 }
 0x3b3   : > { %v1012_v52 = vpop.xlane.xlu1 %1011 }
 0x3b4   : > { %v1023_v54 = vmul.f32 1.442695, %v1021_v49  ;;  %v1014_v19 = vmax.f32 %v1006_v51, %v1012_v52  ;;  %v1017_v57 = vmul.f32 1.442695, %v1015_v53 }
 0x3b6   : > { %v1022_v55 = vsub.f32 %v3844_v41, %v1014_v19  ;;  %4498 = vpow2.f32 %v1023_v54  ;;  %v1016_v26 = vsub.f32 %v3837_v36, %v1014_v19 }
 0x3b7   : > { %v4437_v63 = vpop.permute.xlu1 %4436 }
 0x3b8   : > { %v1025_v20 = vmul.f32 1.442695, %v1022_v55  ;;  %v1019_v28 = vmul.f32 1.442695, %v1016_v26  ;;  %v4439_v1 = vunpack.i.h.bf16 %v4437_v63  ;;  %v4438_v2 = vunpack.i.l.bf16 %v4437_v63 }
 0x3ba   : > { %4500 = vpow2.f32 %v1025_v20  ;;  %v4177_v5 = vpack.c.bf16 %v4439_v1, %v4438_v2 }
 0x3bb   : > { %4502 = vpow2.f32 %v1017_v57  ;;  %v1218_v3 = vpop.permute.xlu1 %1217 }
 0x3bc   : > { %4504 = vpow2.f32 %v1019_v28 }
 0x3bf   : > { %v1220_v44 = vpop.permute.xlu1 %1219 }
 0x3c0   : > { %v4499_v59 = vpop.eup %4498 }
 0x3c1   : > { %3849 = vmatprep.mubr.msk.f32.mxu1 %vm999_vm5, %v4499_v59 }
 0x3c4   : > { %v4501_v61 = vpop.eup %4500 }
 0x3c5   : > { %v4503_v62 = vpop.eup %4502  ;;  %3850 = vmatmul.mubr.msk.f32.vlgmr.msra.gmra.mrb[8].mxu1 %vm999_vm5, %v4501_v61  ;;  %v1036_v22 = vsel %vm1003_vm6, %v4501_v61, 0.0 }
 0x3c6   : > { %4170 = vmatpush3.bf16.msk.msra.mxu1 %vm4923_vm4, %v4165_v29  ;;  %3856 = vmatprep.mubr.msk.f32.mxu1 %vm999_vm5, %v4503_v62  ;;  %v4505_v38 = vpop.eup %4504  ;;  %v1027_v18 = vsel %vm999_vm5, %v4503_v62, 0.0 }
 0x3c7   : > { %4173 = vmatprep.subr.msk.bf16.mxu1 %vm4892_vm2, %v4171_v14  ;;  %v1030_v21 = vsel %vm1003_vm6, %v4505_v38, 0.0 }
 0x3cd   : > { %3857 = vmatmul.mubr.msk.f32.vlgmr.msra.gmra.mrb[8].mxu1 %vm999_vm5, %v4505_v38 }
 0x3ce   : > { %3863 = vmatprep.mubr.msk.f32.mxu1 %vm830_vm1, %v1218_v3 }
 0x3cf   : > { %4176 = vmatpush3.bf16.xpose.msk.msra.mxu1 %vm4892_vm2, %v4171_v14 }
 0x3d0   : > { %4179 = vmatprep.subr.msk.bf16.mxu1 %vm4892_vm2, %v4177_v5 }
 0x3d6   : > { %3864 = vmatmul.mubr.msk.f32.vlgmr.msra.gmra.mrb[10].mxu1 %vm830_vm1, %v1220_v44 }
 0x3d7   : > { %4182 = vmatpush3.bf16.xpose.msk.msra.mxu1 %vm4892_vm2, %v4177_v5  ;;  %3870 = vmatprep.mubr.msk.f32.mxu1 %vm830_vm1, %v1218_v3 }
 0x3de   : > { %3871 = vmatmul.mubr.msk.f32.vlgmr.msra.gmra.mrb[12].mxu1 %vm830_vm1, %v1220_v44 }
 0x4a0   : > { %v4965_v6 = vpop.f32.mrb[8].mxu1 }
 0x4a1   : > { %v4967_v7 = vpop.f32.mrb[9].mxu1 }
 0x4a9   : > { %v3865_v50 = vpop.f32.mrb[10].mxu1 }
 0x4aa   : > { %v1299_v8 = vpop.f32.mrb[11].mxu1  ;;  %v1394_v10 = vsel %vm1003_vm6, %v3865_v50, -inf }
 0x4ab   : > { %1395 = vmax.xlane.f32.xlu0 %v1394_v10  ;;  %v1391_v56 = vsel %vm999_vm5, %v1299_v8, -inf  ;;  %v1613_v10 = vld [vmem:[%s5588_s5 + $0x20] sm:$0xff] }
 0x4af   : > { %1392 = vmax.xlane.f32.xlu0 %v1391_v56  ;;  %v1614_v56 = vld [vmem:[%s5588_s5 + $0x28] sm:$0xff] }
 0x4b1   : > { %v3872_v0 = vpop.f32.mrb[12].mxu1 }
 0x4b2   : > { %v1382_v11 = vpop.f32.mrb[13].mxu1  ;;  %v1400_v13 = vsel %vm1003_vm6, %v3872_v0, -inf }
 0x4b3   : > { %1401 = vmax.xlane.f32.xlu0 %v1400_v13  ;;  %v1397_v15 = vsel %vm999_vm5, %v1382_v11, -inf }
 0x4b4   : > { %1398 = vmax.xlane.f32.xlu1 %v1397_v15 }
 0x4c5   : > { %4446 = vrot.lane.b32.xlu1 %v4918_v30, %s4578_s17 }
 0x4c9   : > { %4441 = vrot.lane.b32.xlu0 %v4927_v35, %s4578_s17  ;;  %4451 = vrot.lane.b32.xlu1 %v4896_v12, %s4579_s18 }
 0x4cd   : > { %1779 = vrot.lane.b32.xlu0 %v4902_v16, %s4579_s18  ;;  %4456 = vrot.lane.b32.xlu1 %v4912_v24, %s4579_s18 }
 0x4d1   : > { %4461 = vrot.lane.b32.xlu0 %v4896_v12, %s4580_s19  ;;  %1781 = vrot.lane.b32.xlu1 %v4906_v17, %s4579_s18  ;;  %v1033_v12 = vsel %vm999_vm5, %v4499_v59, 0.0 }
 0x4d5   : > { %2260 = vrot.lane.b32.xlu0 %v4902_v16, %s4580_s19  ;;  %4466 = vrot.lane.b32.xlu1 %v4912_v24, %s4580_s19 }
 0x4d9   : > { %2262 = vrot.lane.b32.xlu1 %v4906_v17, %s4580_s19 }
 0x4f4   : > { %1028 = vadd.xlane.f32.xlu0 %v1027_v18  ;;  %v1615_v18 = vld [vmem:[%s5588_s5 + $0x30] sm:$0xff] }
 0x4f8   : > { %1031 = vadd.xlane.f32.xlu0 %v1030_v21  ;;  %v1616_v21 = vld [vmem:[%s5588_s5 + $0x38] sm:$0xff] }
 0x4fd   : > { %1034 = vadd.xlane.f32.xlu1 %v1033_v12  ;;  %v4199_v12 = vpack.c.bf16 %v1616_v21, %v1615_v18 }
 0x501   : > { %1037 = vadd.xlane.f32.xlu1 %v1036_v22  ;;  %v1214_v22 = vld [vmem:[%s5588_s5 + $0x8] sm:$0xff] }
 0x538   : > { %v1396_v25 = vpop.xlane.xlu0 %1395 }
 0x53c   : > { %v1393_v16 = vpop.xlane.xlu0 %1392 }
 0x540   : > { %v1402_v27 = vpop.xlane.xlu0 %1401 }
 0x541   : > { %v1404_v29 = vmax.f32 %v1396_v25, %v1402_v27  ;;  %v1399_v24 = vpop.xlane.xlu1 %1398  ;;  %v4203_v25 = vpack.c.bf16 %v1214_v22, %v1213_v4 }
 0x542   : > { %v1403_v31 = vmax.f32 %v1393_v16, %v1399_v24 }
 0x543   : > { %v1406_v33 = vsub.f32 %v3865_v50, %v1404_v29  ;;  %v1412_v17 = vsub.f32 %v3872_v0, %v1404_v29  ;;  %v4195_v0 = vpack.c.bf16 %v1614_v56, %v1613_v10 }
 0x544   : > { %v1405_v34 = vsub.f32 %v1299_v8, %v1403_v31  ;;  %v1411_v36 = vsub.f32 %v1382_v11, %v1403_v31  ;;  %v4442_v37 = vpop.permute.xlu0 %4441 }
 0x545   : > { %v1409_v39 = vmul.f32 1.442695, %v1406_v33  ;;  %v1415_v40 = vmul.f32 1.442695, %v1412_v17  ;;  %v4444_v41 = vunpack.i.h.bf16 %v4442_v37  ;;  %v4443_v42 = vunpack.i.l.bf16 %v4442_v37  ;;  %v4447_v43 = vpop.permute.xlu1 %4446  ;;  %4196 = vmatprep.subr.bf16.mxu0 %v4195_v0 }
 0x546   : > { %v1413_v45 = vmul.f32 1.442695, %v1411_v36  ;;  %v4449_v46 = vunpack.i.h.bf16 %v4447_v43  ;;  %v4448_v47 = vunpack.i.l.bf16 %v4447_v43  ;;  %v1407_v49 = vmul.f32 1.442695, %v1405_v34  ;;  %4198 = vmatpush3.bf16.msra.mxu0 %v4195_v0  ;;  %v1215_v43 = vld [vmem:[%s5588_s5 + $0x10] sm:$0xff] }
 0x547   : > { %4506 = vpow2.f32 %v1409_v39  ;;  %v4183_v48 = vpack.c.bf16 %v4444_v41, %v4443_v42  ;;  %4200 = vmatprep.subr.bf16.mxu0 %v4199_v12 }
 0x548   : > { %v4189_v51 = vpack.c.bf16 %v4449_v46, %v4448_v47  ;;  %4508 = vpow2.f32 %v1415_v40  ;;  %v1780_v9 = vpop.permute.xlu0 %1779 }
 0x549   : > { %4185 = vmatprep.subr.msk.bf16.mxu1 %vm4923_vm4, %v4183_v48  ;;  %4510 = vpow2.f32 %v1413_v45  ;;  %v4452_v52 = vpop.permute.xlu1 %4451  ;;  %v1216_v45 = vld [vmem:[%s5588_s5 + $0x18] sm:$0xff] }
 0x54a   : > { %4188 = vmatpush3.bf16.msk.msra.mxu1 %vm4923_vm4, %v4183_v48  ;;  %4512 = vpow2.f32 %v1407_v49  ;;  %v4454_v54 = vunpack.i.h.bf16 %v4452_v52  ;;  %v4453_v19 = vunpack.i.l.bf16 %v4452_v52  ;;  %4202 = vmatpush3.bf16.msra.mxu0 %v4199_v12  ;;  %v4207_v52 = vpack.c.bf16 %v1216_v45, %v1215_v43  ;;  %v2175_v43 = vld [vmem:[%s5588_s5 + $0x50] sm:$0xff]  ;;  %v2176_v45 = vld [vmem:[%s5588_s5 + $0x58] sm:$0xff] }
 0x54b   : > { %4191 = vmatprep.subr.msk.bf16.mxu1 %vm4923_vm4, %v4189_v51  ;;  %4204 = vmatprep.subr.bf16.mxu0 %v4203_v25 }
 0x54c   : > { %v4211_v28 = vpack.c.bf16 %v4454_v54, %v4453_v19  ;;  %v4462_v1 = vpop.permute.xlu0 %4461 }
 0x54d   : > { %v4457_v60 = vpop.permute.xlu1 %4456  ;;  %v4464_v38 = vunpack.i.h.bf16 %v4462_v1  ;;  %v4463_v3 = vunpack.i.l.bf16 %v4462_v1 }
 0x54e   : > { %v4459_v61 = vunpack.i.h.bf16 %v4457_v60  ;;  %v4458_v62 = vunpack.i.l.bf16 %v4457_v60 }
 0x54f   : > { %v4243_v5 = vpack.c.bf16 %v4464_v38, %v4463_v3 }
 0x550   : > { %v4217_v63 = vpack.c.bf16 %v4459_v61, %v4458_v62  ;;  %v2261_v11 = vpop.permute.xlu0 %2260 }
 0x551   : > { %v4507_v53 = vpop.eup %4506  ;;  %v1782_v2 = vpop.permute.xlu1 %1781 }
 0x552   : > { %v1420_v55 = vsel %vm1003_vm6, %v4507_v53, 0.0  ;;  %v4509_v57 = vpop.eup %4508 }
 0x553   : > { %1421 = vadd.xlane.f32.xlu0 %v1420_v55  ;;  %v4511_v20 = vpop.eup %4510  ;;  %v1426_v59 = vsel %vm1003_vm6, %v4509_v57, 0.0 }
 0x554   : > { %3877 = vmatprep.mubr.msk.f32.mxu1 %vm999_vm5, %v4511_v20  ;;  %v1423_v26 = vsel %vm999_vm5, %v4511_v20, 0.0  ;;  %v4513_v58 = vpop.eup %4512 }
 0x555   : > { %3878 = vmatmul.mubr.msk.f32.vlgmr.msra.gmra.mrb[14].mxu1 %vm999_vm5, %v4509_v57  ;;  %1424 = vadd.xlane.f32.xlu1 %v1423_v26  ;;  %v1417_v14 = vsel %vm999_vm5, %v4513_v58, 0.0  ;;  %v4467_v44 = vpop.permute.xlu1 %4466 }
 0x556   : > { %4194 = vmatpush3.bf16.msk.msra.mxu1 %vm4923_vm4, %v4189_v51  ;;  %3884 = vmatprep.mubr.msk.f32.mxu1 %vm999_vm5, %v4513_v58  ;;  %v4469_v50 = vunpack.i.h.bf16 %v4467_v44  ;;  %v4468_v8 = vunpack.i.l.bf16 %v4467_v44 }
 0x557   : > { %4213 = vmatprep.subr.msk.bf16.mxu1 %vm4892_vm2, %v4211_v28  ;;  %1427 = vadd.xlane.f32.xlu0 %v1426_v59 }
 0x558   : > { %v4249_v13 = vpack.c.bf16 %v4469_v50, %v4468_v8 }
 0x559   : > { %v2263_v15 = vpop.permute.xlu1 %2262 }
 0x55b   : > { %1418 = vadd.xlane.f32.xlu0 %v1417_v14 }
 0x55d   : > { %3885 = vmatmul.mubr.msk.f32.vlgmr.msra.gmra.mrb[14].mxu1 %vm999_vm5, %v4507_v53 }
 0x55e   : > { %3913 = vmatprep.mubr.msk.f32.mxu1 %vm830_vm1, %v1780_v9 }
 0x55f   : > { %4216 = vmatpush3.bf16.xpose.msk.msra.mxu1 %vm4892_vm2, %v4211_v28 }
 0x560   : > { %4219 = vmatprep.subr.msk.bf16.mxu1 %vm4892_vm2, %v4217_v63 }
 0x566   : > { %3914 = vmatmul.mubr.msk.f32.vlgmr.msra.gmra.mrb[16].mxu1 %vm830_vm1, %v1782_v2 }
 0x567   : > { %4222 = vmatpush3.bf16.xpose.msk.msra.mxu1 %vm4892_vm2, %v4217_v63  ;;  %3920 = vmatprep.mubr.msk.f32.mxu1 %vm830_vm1, %v1780_v9 }
 0x568   : > { %4245 = vmatprep.subr.msk.bf16.mxu1 %vm4892_vm2, %v4243_v5 }
 0x56e   : > { %3921 = vmatmul.mubr.msk.f32.vlgmr.msra.gmra.mrb[18].mxu1 %vm830_vm1, %v1782_v2 }
 0x56f   : > { %4248 = vmatpush3.bf16.xpose.msk.msra.mxu1 %vm4892_vm2, %v4243_v5  ;;  %3952 = vmatprep.mubr.msk.f32.mxu1 %vm830_vm1, %v2261_v11 }
 0x570   : > { %4251 = vmatprep.subr.msk.bf16.mxu1 %vm4892_vm2, %v4249_v13 }
 0x576   : > { %3953 = vmatmul.mubr.msk.f32.vlgmr.msra.gmra.mrb[20].mxu1 %vm830_vm1, %v2263_v15 }
 0x577   : > { %4254 = vmatpush3.bf16.xpose.msk.msra.mxu1 %vm4892_vm2, %v4249_v13  ;;  %3959 = vmatprep.mubr.msk.f32.mxu1 %vm830_vm1, %v2261_v11 }
 0x57e   : > { %3960 = vmatmul.mubr.msk.f32.vlgmr.msra.gmra.mrb[22].mxu1 %vm830_vm1, %v2263_v15 }
 0x581   : > { %v1029_v16 = vpop.xlane.xlu0 %1028 }
 0x585   : > { %v1032_v27 = vpop.xlane.xlu0 %1031 }
 0x58a   : > { %v1035_v24 = vpop.xlane.xlu1 %1034 }
 0x58b   : > { %v1039_v34 = vadd.f32 %v1035_v24, %v1029_v16 }
 0x58d   : > { %4514 = vrcp.f32 %v1039_v34 }
 0x58e   : > { %v1038_v33 = vpop.xlane.xlu1 %1037 }
 0x58f   : > { %v1040_v40 = vadd.f32 %v1038_v33, %v1032_v27 }
 0x597   : > { %v4515_v41 = vpop.eup %4514 }
 0x598   : > { %v1211_v53 = vmul.f32 %v4515_v41, %v4967_v7  ;;  %v2174_v41 = vld [vmem:[%s5588_s5 + $0x48] sm:$0xff] }
 0x5e0   : > { %v1422_v29 = vpop.xlane.xlu0 %1421 }
 0x5e2   : > { %v1425_v36 = vpop.xlane.xlu1 %1424 }
 0x5e4   : > { %v1428_v31 = vpop.xlane.xlu0 %1427 }
 0x5e5   : > { %v1430_v39 = vadd.f32 %v1428_v31, %v1422_v29 }
 0x5e8   : > { %v1419_v17 = vpop.xlane.xlu0 %1418 }
 0x5e9   : > { %v1429_v37 = vadd.f32 %v1425_v36, %v1419_v17 }
 0x5eb   : > { %4516 = vrcp.f32 %v1429_v37 }
 0x5ec   : > { %4518 = vrcp.f32 %v1430_v39 }
 0x5ed   : > { %4520 = vrcp.f32 %v1040_v40  ;;  %v2173_v40 = vld [vmem:[%s5588_s5 + $0x40] sm:$0xff] }
 0x5f5   : > { %v4517_v46 = vpop.eup %4516 }
 0x5f6   : > { %v4519_v48 = vpop.eup %4518 }
 0x5f7   : > { %v4521_v54 = vpop.eup %4520 }
 0x5f8   : > { %v1212_v20 = vmul.f32 %v4521_v54, %v4965_v6 }
 0x630   : > { %v3886_v42 = vpop.f32.mrb[14].mxu1 }
 0x631   : > { %v1600_v47 = vpop.f32.mrb[15].mxu1  ;;  %v1612_v51 = vmul.f32 %v4519_v48, %v3886_v42  ;;  %v4235_v42 = vpack.c.bf16 %v2174_v41, %v2173_v40 }
 0x632   : > { %v1611_v49 = vmul.f32 %v4517_v46, %v1600_v47  ;;  %v4239_v46 = vpack.c.bf16 %v2176_v45, %v2175_v43  ;;  %v4566_v45 = vld [vmem:[%s4645_s13 + $0x8] sm:$0x1f] }
 0x634   : > { %3895 = vmatprep.mubr.msk.f32.mxu0 %vm830_vm1, %v1611_v49 }
 0x635   : > { %3896 = vmatmul.mubr.msk.f32.vlgmr.msra.gmra.mrb[6].mxu0 %vm830_vm1, %v1612_v51 }
 0x636   : > { %4206 = vmatpush3.bf16.msra.mxu0 %v4203_v25  ;;  %3906 = vmatprep.mubr.msk.f32.mxu0 %vm830_vm1, %v1211_v53 }
 0x637   : > { %4208 = vmatprep.subr.bf16.mxu0 %v4207_v52 }
 0x639   : > { %v3915_v19 = vpop.f32.mrb[16].mxu1 }
 0x63a   : > { %v1861_v55 = vpop.f32.mrb[17].mxu1  ;;  %v1956_v57 = vsel %vm1003_vm6, %v3915_v19, -inf  ;;  %4210 = vmatpush3.bf16.msra.mxu0 %v4207_v52 }
 0x63b   : > { %1957 = vmax.xlane.f32.xlu0 %v1956_v57  ;;  %v1953_v26 = vsel %vm999_vm5, %v1861_v55, -inf }
 0x63d   : > { %3907 = vmatmul.mubr.msk.f32.vlgmr.msra.gmra.mrb[6].mxu0 %vm830_vm1, %v1212_v20 }
 0x63f   : > { %1954 = vmax.xlane.f32.xlu0 %v1953_v26 }
 0x641   : > { %v3922_v7 = vpop.f32.mrb[18].mxu1 }
 0x642   : > { %v1944_v58 = vpop.f32.mrb[19].mxu1  ;;  %v1962_v28 = vsel %vm1003_vm6, %v3922_v7, -inf }
 0x643   : > { %1963 = vmax.xlane.f32.xlu1 %v1962_v28  ;;  %v1959_v59 = vsel %vm999_vm5, %v1944_v58, -inf }
 0x647   : > { %1960 = vmax.xlane.f32.xlu1 %v1959_v59 }
 0x649   : > { %v5071_v60 = vpop.f32.mrb[20].mxu1 }
 0x64a   : > { %v5073_v9 = vpop.f32.mrb[21].mxu1  ;;  %v2437_v62 = vsel %vm1003_vm6, %v5071_v60, -inf }
 0x64b   : > { %v2434_v14 = vsel %vm999_vm5, %v5073_v9, -inf }
 0x651   : > { %v5075_v61 = vpop.f32.mrb[22].mxu1 }
 0x652   : > { %v5077_v6 = vpop.f32.mrb[23].mxu1  ;;  %v2443_v63 = vsel %vm1003_vm6, %v5075_v61, -inf }
 0x653   : > { %v2440_v1 = vsel %vm999_vm5, %v5077_v6, -inf }
 0x655   : > { %4471 = vrot.lane.b32.xlu0 %v4927_v35, %s4579_s18 }
 0x658   : > { %4476 = vrot.lane.b32.xlu1 %v4918_v30, %s4579_s18 }
 0x674   : > { %2438 = vmax.xlane.f32.xlu0 %v2437_v62 }
 0x678   : > { %2435 = vmax.xlane.f32.xlu0 %v2434_v14 }
 0x67c   : > { %2444 = vmax.xlane.f32.xlu1 %v2443_v63 }
 0x680   : > { %2441 = vmax.xlane.f32.xlu1 %v2440_v1 }
 0x6c8   : > { %v1958_v2 = vpop.xlane.xlu0 %1957 }
 0x6cc   : > { %v1955_v38 = vpop.xlane.xlu0 %1954 }
 0x6d0   : > { %v4472_v3 = vpop.permute.xlu0 %4471  ;;  %v1964_v5 = vpop.xlane.xlu1 %1963 }
 0x6d1   : > { %v4474_v44 = vunpack.i.h.bf16 %v4472_v3  ;;  %v4473_v50 = vunpack.i.l.bf16 %v4472_v3  ;;  %v1966_v8 = vmax.f32 %v1958_v2, %v1964_v5 }
 0x6d3   : > { %v4223_v10 = vpack.c.bf16 %v4474_v44, %v4473_v50  ;;  %v1968_v56 = vsub.f32 %v3915_v19, %v1966_v8  ;;  %v1974_v0 = vsub.f32 %v3922_v7, %v1966_v8 }
 0x6d4   : > { %v1961_v11 = vpop.xlane.xlu1 %1960 }
 0x6d5   : > { %v1971_v13 = vmul.f32 1.442695, %v1968_v56  ;;  %v1977_v15 = vmul.f32 1.442695, %v1974_v0  ;;  %v1965_v18 = vmax.f32 %v1955_v38, %v1961_v11  ;;  %4225 = vmatprep.subr.msk.bf16.mxu0 %vm4923_vm4, %v4223_v10 }
 0x6d6   : > { %4228 = vmatpush3.bf16.msk.msra.mxu0 %vm4923_vm4, %v4223_v10 }
 0x6d7   : > { %4522 = vpow2.f32 %v1971_v13  ;;  %v1967_v21 = vsub.f32 %v1861_v55, %v1965_v18  ;;  %v1973_v12 = vsub.f32 %v1944_v58, %v1965_v18 }
 0x6d8   : > { %4524 = vpow2.f32 %v1977_v15  ;;  %v4477_v4 = vpop.permute.xlu1 %4476 }
 0x6d9   : > { %v1969_v22 = vmul.f32 1.442695, %v1967_v21  ;;  %v1975_v25 = vmul.f32 1.442695, %v1973_v12  ;;  %v4479_v16 = vunpack.i.h.bf16 %v4477_v4  ;;  %v4478_v27 = vunpack.i.l.bf16 %v4477_v4  ;;  %v2654_v12 = vld [vmem:[%s5588_s5 + $0x60] sm:$0xff]  ;;  %v2655_v4 = vld [vmem:[%s5588_s5 + $0x68] sm:$0xff] }
 0x6db   : > { %4526 = vpow2.f32 %v1969_v22  ;;  %v4229_v29 = vpack.c.bf16 %v4479_v16, %v4478_v27  ;;  %v2656_v16 = vld [vmem:[%s5588_s5 + $0x70] sm:$0xff]  ;;  %v2657_v27 = vld [vmem:[%s5588_s5 + $0x78] sm:$0xff] }
 0x6dc   : > { %4528 = vpow2.f32 %v1975_v25  ;;  %v4267_v25 = vpack.c.bf16 %v2655_v4, %v2654_v12 }
 0x6dd   : > { %4231 = vmatprep.subr.msk.bf16.mxu0 %vm4923_vm4, %v4229_v29 }
 0x6e1   : > { %v4523_v24 = vpop.eup %4522 }
 0x6e2   : > { %v4525_v31 = vpop.eup %4524  ;;  %v1982_v33 = vsel %vm1003_vm6, %v4523_v24, 0.0 }
 0x6e3   : > { %1983 = vadd.xlane.f32.xlu0 %v1982_v33  ;;  %v1988_v17 = vsel %vm1003_vm6, %v4525_v31, 0.0 }
 0x6e4   : > { %1989 = vadd.xlane.f32.xlu1 %v1988_v17 }
 0x6e5   : > { %v4527_v34 = vpop.eup %4526 }
 0x6e6   : > { %v4529_v36 = vpop.eup %4528  ;;  %v1979_v37 = vsel %vm999_vm5, %v4527_v34, 0.0 }
 0x6e7   : > { %3927 = vmatprep.mubr.msk.f32.mxu0 %vm999_vm5, %v4529_v36  ;;  %v1985_v39 = vsel %vm999_vm5, %v4529_v36, 0.0 }
 0x6e8   : > { %1986 = vadd.xlane.f32.xlu0 %v1985_v39  ;;  %1980 = vadd.xlane.f32.xlu1 %v1979_v37 }
 0x6e9   : > { %3928 = vmatmul.mubr.msk.f32.vlgmr.msra.gmra.mrb[8].mxu0 %vm999_vm5, %v4525_v31 }
 0x6ea   : > { %4234 = vmatpush3.bf16.msk.msra.mxu0 %vm4923_vm4, %v4229_v29  ;;  %3934 = vmatprep.mubr.msk.f32.mxu0 %vm999_vm5, %v4527_v34  ;;  %v4271_v29 = vpack.c.bf16 %v2657_v27, %v2656_v16 }
 0x6eb   : > { %4236 = vmatprep.subr.bf16.mxu0 %v4235_v42 }
 0x6f1   : > { %3935 = vmatmul.mubr.msk.f32.vlgmr.msra.gmra.mrb[8].mxu0 %vm999_vm5, %v4523_v24 }
 0x6f2   : > { %4238 = vmatpush3.bf16.msra.mxu0 %v4235_v42 }
 0x6f3   : > { %4240 = vmatprep.subr.bf16.mxu0 %v4239_v46 }
 0x6f6   : > { %4242 = vmatpush3.bf16.msra.mxu0 %v4239_v46 }
 0x6f9   : > { %4486 = vrot.lane.b32.xlu1 %v4918_v30, %s4580_s19 }
 0x6fe   : > { %4481 = vrot.lane.b32.xlu0 %v4927_v35, %s4580_s19 }
 0x701   : > { %v2439_v47 = vpop.xlane.xlu0 %2438 }
 0x705   : > { %v2436_v30 = vpop.xlane.xlu0 %2435 }
 0x709   : > { %v2445_v48 = vpop.xlane.xlu1 %2444 }
 0x70a   : > { %v2447_v49 = vmax.f32 %v2439_v47, %v2445_v48  ;;  %v4567_v48 = vld [vmem:[%s4645_s13] sm:$0xff] }
 0x70c   : > { %v2455_v52 = vsub.f32 %v5075_v61, %v2447_v49  ;;  %v2449_v54 = vsub.f32 %v5071_v60, %v2447_v49 }
 0x70d   : > { %v2442_v51 = vpop.xlane.xlu1 %2441 }
 0x70e   : > { %v2446_v53 = vmax.f32 %v2436_v30, %v2442_v51  ;;  %v2458_v57 = vmul.f32 1.442695, %v2455_v52  ;;  %v2452_v35 = vmul.f32 1.442695, %v2449_v54  ;;  %v2780_v51 = vld [vmem:[%s5589_s6 + $0x8] sm:$0xff] }
 0x70f   : > { %v2784_v52 = vld [vmem:[%s5589_s6 + $0x28] sm:$0xff] }
 0x710   : > { %v2448_v19 = vsub.f32 %v5073_v9, %v2446_v53  ;;  %v2454_v55 = vsub.f32 %v5077_v6, %v2446_v53  ;;  %v2782_v53 = vld [vmem:[%s5589_s6 + $0x18] sm:$0xff]  ;;  %v4275_v54 = vpack.c.bf16 %v2784_v52, %v2780_v51  ;;  %v2811_v52 = vld [vmem:[%s5589_s6 + $0x100] sm:$0xff] }
 0x711   : > { %v2818_v51 = vld [vmem:[%s5589_s6 + $0x138] sm:$0xff] }
 0x712   : > { %v2450_v20 = vmul.f32 1.442695, %v2448_v19  ;;  %v2456_v26 = vmul.f32 1.442695, %v2454_v55  ;;  %v2786_v19 = vld [vmem:[%s5589_s6 + $0x38] sm:$0xff]  ;;  %v2779_v55 = vld [vmem:[%s5589_s6] sm:$0xff]  ;;  %4276 = vmatprep.subr.bf16.mxu1 %v4275_v54 }
 0x714   : > { %4530 = vpow2.f32 %v2450_v20  ;;  %v4307_v20 = vpack.c.bf16 %v2786_v19, %v2782_v53  ;;  %v2815_v53 = vld [vmem:[%s5589_s6 + $0x120] sm:$0xff] }
 0x715   : > { %4532 = vpow2.f32 %v2456_v26  ;;  %v4293_v19 = vpack.c.bf16 %v2815_v53, %v2811_v52 }
 0x716   : > { %4534 = vpow2.f32 %v2458_v57  ;;  %v2783_v57 = vld [vmem:[%s5589_s6 + $0x20] sm:$0xff] }
 0x717   : > { %4536 = vpow2.f32 %v2452_v35  ;;  %v4277_v26 = vpack.c.bf16 %v2783_v57, %v2779_v55  ;;  %v2781_v35 = vld [vmem:[%s5589_s6 + $0x10] sm:$0xff] }
 0x718   : > { %v2813_v55 = vld [vmem:[%s5589_s6 + $0x110] sm:$0xff] }
 0x719   : > { %4278 = vmatpush1.bf16.msra.mxu1 %v4277_v26  ;;  %v2817_v57 = vld [vmem:[%s5589_s6 + $0x130] sm:$0xff] }
 0x71a   : > { %v4325_v26 = vpack.c.bf16 %v2817_v57, %v2813_v55  ;;  %v3037_v57 = vld [vmem:[%s5590_s7] sm:$0xff] }
 0x71e   : > { %v4531_v7 = vpop.eup %4530 }
 0x71f   : > { %v4533_v58 = vpop.eup %4532  ;;  %v2460_v28 = vsel %vm999_vm5, %v4531_v7, 0.0 }
 0x720   : > { %v4535_v59 = vpop.eup %4534  ;;  %v2466_v61 = vsel %vm999_vm5, %v4533_v58, 0.0  ;;  %2461 = vadd.xlane.f32.xlu1 %v2460_v28 }
 0x721   : > { %v4537_v60 = vpop.eup %4536  ;;  %2467 = vadd.xlane.f32.xlu0 %v2466_v61  ;;  %v2469_v9 = vsel %vm1003_vm6, %v4535_v59, 0.0  ;;  %v2790_v61 = vld [vmem:[%s5589_s6 + $0x58] sm:$0xff] }
 0x722   : > { %v2463_v6 = vsel %vm1003_vm6, %v4537_v60, 0.0 }
 0x724   : > { %2470 = vadd.xlane.f32.xlu1 %v2469_v9 }
 0x725   : > { %2464 = vadd.xlane.f32.xlu0 %v2463_v6 }
 0x770   : > { %v1984_v62 = vpop.xlane.xlu0 %1983 }
 0x771   : > { %v1990_v3 = vpop.xlane.xlu1 %1989 }
 0x772   : > { %v1992_v44 = vadd.f32 %v1990_v3, %v1984_v62  ;;  %v2787_v62 = vld [vmem:[%s5589_s6 + $0x40] sm:$0xff]  ;;  %v2800_v3 = vld [vmem:[%s5589_s6 + $0xa8] sm:$0xff] }
 0x774   : > { %4538 = vrcp.f32 %v1992_v44 }
 0x775   : > { %v1987_v14 = vpop.xlane.xlu0 %1986  ;;  %v1981_v5 = vpop.xlane.xlu1 %1980 }
 0x776   : > { %v1991_v50 = vadd.f32 %v1987_v14, %v1981_v5  ;;  %v2791_v14 = vld [vmem:[%s5589_s6 + $0x60] sm:$0xff] }
 0x778   : > { %4540 = vrcp.f32 %v1991_v50  ;;  %v2798_v50 = vld [vmem:[%s5589_s6 + $0x98] sm:$0xff] }
 0x779   : > { %v4482_v63 = vpop.permute.xlu0 %4481  ;;  %v4487_v8 = vpop.permute.xlu1 %4486 }
 0x77a   : > { %v4484_v1 = vunpack.i.h.bf16 %v4482_v63  ;;  %v4483_v2 = vunpack.i.l.bf16 %v4482_v63  ;;  %v4489_v11 = vunpack.i.h.bf16 %v4487_v8  ;;  %v4488_v13 = vunpack.i.l.bf16 %v4487_v8  ;;  %v2789_v63 = vld [vmem:[%s5589_s6 + $0x50] sm:$0xff]  ;;  %v2802_v8 = vld [vmem:[%s5589_s6 + $0xb8] sm:$0xff] }
 0x77c   : > { %v4255_v38 = vpack.c.bf16 %v4484_v1, %v4483_v2  ;;  %v4261_v22 = vpack.c.bf16 %v4489_v11, %v4488_v13  ;;  %v4281_v1 = vpack.c.bf16 %v2791_v14, %v2787_v62  ;;  %v2793_v2 = vld [vmem:[%s5589_s6 + $0x70] sm:$0xff] }
 0x77d   : > { %v4313_v5 = vpack.c.bf16 %v2793_v2, %v2789_v63  ;;  %v2797_v11 = vld [vmem:[%s5589_s6 + $0x90] sm:$0xff]  ;;  %v2828_v63 = vld [vmem:[%s5589_s6 + $0x188] sm:$0xff] }
 0x77e   : > { %4257 = vmatprep.subr.msk.bf16.mxu0 %vm4923_vm4, %v4255_v38  ;;  %v4539_v10 = vpop.eup %4538  ;;  %v2801_v13 = vld [vmem:[%s5589_s6 + $0xb0] sm:$0xff] }
 0x77f   : > { %v2825_v14 = vld [vmem:[%s5589_s6 + $0x170] sm:$0xff] }
 0x782   : > { %v4541_v0 = vpop.eup %4540 }
 0x7ad   : > { %v2462_v32 = vpop.xlane.xlu1 %2461 }
 0x7ae   : > { %v2468_v24 = vpop.xlane.xlu0 %2467 }
 0x7af   : > { %v2472_v17 = vadd.f32 %v2468_v24, %v2462_v32  ;;  %v2804_v32 = vld [vmem:[%s5589_s6 + $0xc8] sm:$0xff] }
 0x7b1   : > { %v2471_v33 = vpop.xlane.xlu1 %2470  ;;  %4542 = vrcp.f32 %v2472_v17 }
 0x7b2   : > { %v2465_v31 = vpop.xlane.xlu0 %2464 }
 0x7b3   : > { %v2473_v34 = vadd.f32 %v2471_v33, %v2465_v31  ;;  %v2808_v31 = vld [vmem:[%s5589_s6 + $0xe8] sm:$0xff]  ;;  %v2806_v33 = vld [vmem:[%s5589_s6 + $0xd8] sm:$0xff] }
 0x7b4   : > { %v4287_v17 = vpack.c.bf16 %v2808_v31, %v2804_v32 }
 0x7b5   : > { %4544 = vrcp.f32 %v2473_v34  ;;  %v2810_v34 = vld [vmem:[%s5589_s6 + $0xf8] sm:$0xff] }
 0x7bb   : > { %v4543_v37 = vpop.eup %4542 }
 0x7bf   : > { %v4545_v40 = vpop.eup %4544 }
 0x7c4   : > { %v3936_v56 = vpop.f32.mrb[8].mxu0 }
 0x7c5   : > { %v2172_v15 = vmul.f32 %v4539_v10, %v3936_v56  ;;  %v2160_v18 = vpop.f32.mrb[9].mxu0  ;;  %v2795_v10 = vld [vmem:[%s5589_s6 + $0x80] sm:$0xff]  ;;  %v4315_v56 = vpack.c.bf16 %v2802_v8, %v2798_v50 }
 0x7c6   : > { %v2171_v21 = vmul.f32 %v4541_v0, %v2160_v18  ;;  %v2799_v0 = vld [vmem:[%s5589_s6 + $0xa0] sm:$0xff]  ;;  %v4317_v18 = vpack.c.bf16 %v2801_v13, %v2797_v11  ;;  %v2836_v11 = vld [vmem:[%s5589_s6 + $0x1c8] sm:$0xff] }
 0x7c7   : > { %v2831_v8 = vld [vmem:[%s5589_s6 + $0x1a0] sm:$0xff]  ;;  %v2840_v13 = vld [vmem:[%s5589_s6 + $0x1e8] sm:$0xff] }
 0x7c8   : > { %3945 = vmatprep.mubr.msk.f32.mxu0 %vm830_vm1, %v2171_v21 }
 0x7c9   : > { %3946 = vmatmul.mubr.msk.f32.vlgmr.msra.gmra.mrb[6].mxu0 %vm830_vm1, %v2172_v15  ;;  %v4285_v15 = vpack.c.bf16 %v2799_v0, %v2795_v10  ;;  %v2829_v10 = vld [vmem:[%s5589_s6 + $0x190] sm:$0xff] }
 0x7ca   : > { %4260 = vmatpush3.bf16.msk.msra.mxu0 %vm4923_vm4, %v4255_v38  ;;  %3966 = vmatprep.mubr.msk.f32.mxu0 %vm999_vm5, %v4533_v58  ;;  %v2788_v58 = vld [vmem:[%s5589_s6 + $0x48] sm:$0xff] }
 0x7cb   : > { %4263 = vmatprep.subr.msk.bf16.mxu0 %vm4923_vm4, %v4261_v22  ;;  %v2796_v38 = vld [vmem:[%s5589_s6 + $0x88] sm:$0xff] }
 0x7cc   : > { %v4283_v44 = vpack.c.bf16 %v2800_v3, %v2796_v38  ;;  %v2830_v3 = vld [vmem:[%s5589_s6 + $0x198] sm:$0xff] }
 0x7cd   : > { %3967 = vmatmul.mubr.msk.f32.vlgmr.msra.gmra.mrb[10].mxu0 %vm999_vm5, %v4535_v59  ;;  %v2792_v59 = vld [vmem:[%s5589_s6 + $0x68] sm:$0xff] }
 0x7ce   : > { %4266 = vmatpush3.bf16.msk.msra.mxu0 %vm4923_vm4, %v4261_v22  ;;  %3973 = vmatprep.mubr.msk.f32.mxu0 %vm999_vm5, %v4531_v7  ;;  %v2785_v7 = vld [vmem:[%s5589_s6 + $0x30] sm:$0xff]  ;;  %v4279_v9 = vpack.c.bf16 %v2792_v59, %v2788_v58  ;;  %v2826_v58 = vld [vmem:[%s5589_s6 + $0x178] sm:$0xff] }
 0x7cf   : > { %4268 = vmatprep.subr.bf16.mxu0 %v4267_v25  ;;  %v4309_v28 = vpack.c.bf16 %v2785_v7, %v2781_v35  ;;  %v2824_v35 = vld [vmem:[%s5589_s6 + $0x168] sm:$0xff]  ;;  %v2822_v7 = vld [vmem:[%s5589_s6 + $0x158] sm:$0xff] }
 0x7d0   : > { %4280 = vmatprep.subr.bf16.mxu1 %v4279_v9  ;;  %v2823_v9 = vld [vmem:[%s5589_s6 + $0x160] sm:$0xff] }
 0x7d1   : > { %4282 = vmatpush1.bf16.msra.mxu1 %v4281_v1  ;;  %v2832_v1 = vld [vmem:[%s5589_s6 + $0x1a8] sm:$0xff] }
 0x7d2   : > { %4284 = vmatprep.subr.bf16.mxu1 %v4283_v44  ;;  %v4299_v38 = vpack.c.bf16 %v2832_v1, %v2828_v63  ;;  %v2827_v44 = vld [vmem:[%s5589_s6 + $0x180] sm:$0xff] }
 0x7d3   : > { %v4301_v0 = vpack.c.bf16 %v2831_v8, %v2827_v44  ;;  %v3089_v44 = vld [vmem:[%s5590_s7 + $0x1a0] sm:$0xff] }
 0x7d5   : > { %3974 = vmatmul.mubr.msk.f32.vlgmr.msra.gmra.mrb[10].mxu0 %vm999_vm5, %v4537_v60  ;;  %v2794_v60 = vld [vmem:[%s5589_s6 + $0x78] sm:$0xff]  ;;  %4286 = vmatpush1.bf16.msra.mxu1 %v4285_v15 }
 0x7d6   : > { %4270 = vmatpush3.bf16.msra.mxu0 %v4267_v25  ;;  %v4311_v6 = vpack.c.bf16 %v2794_v60, %v2790_v61  ;;  %4288 = vmatprep.subr.bf16.mxu1 %v4287_v17  ;;  %v4327_v61 = vpack.c.bf16 %v2826_v58, %v2822_v7  ;;  %v2819_v60 = vld [vmem:[%s5589_s6 + $0x140] sm:$0xff]  ;;  %v2838_v15 = vld [vmem:[%s5589_s6 + $0x1d8] sm:$0xff]  ;;  %v3054_v17 = vld [vmem:[%s5590_s7 + $0x88] sm:$0xff] }
 0x7d7   : > { %4272 = vmatprep.subr.bf16.mxu0 %v4271_v29  ;;  %v4297_v62 = vpack.c.bf16 %v2823_v9, %v2819_v60  ;;  %v3056_v58 = vld [vmem:[%s5590_s7 + $0x98] sm:$0xff] }
 0x7da   : > { %4274 = vmatpush3.bf16.msra.mxu0 %v4271_v29 }
 0x7db   : > { %4308 = vmatprep.subr.bf16.mxu0 %v4307_v20  ;;  %v2820_v20 = vld [vmem:[%s5589_s6 + $0x148] sm:$0xff] }
 0x7dc   : > { %v4295_v59 = vpack.c.bf16 %v2824_v35, %v2820_v20  ;;  %v3038_v20 = vld [vmem:[%s5590_s7 + $0x8] sm:$0xff] }
 0x7dd   : > { %v3070_v35 = vld [vmem:[%s5590_s7 + $0x108] sm:$0xff]  ;;  %v4341_v9 = vpack.c.bf16 %v3038_v20, %v3037_v57  ;;  %v3096_v20 = vld [vmem:[%s5590_s7 + $0x1d8] sm:$0xff] }
 0x8a8   : > { %v3975_v36 = vpop.f32.mrb[10].mxu0 }
 0x8a9   : > { %v2641_v39 = vpop.f32.mrb[11].mxu0  ;;  %v2653_v42 = vmul.f32 %v4545_v40, %v3975_v36  ;;  %v2803_v36 = vld [vmem:[%s5589_s6 + $0xc0] sm:$0xff] }
 0x8aa   : > { %v2652_v41 = vmul.f32 %v4543_v37, %v2641_v39  ;;  %v2807_v37 = vld [vmem:[%s5589_s6 + $0xe0] sm:$0xff]  ;;  %v4319_v39 = vpack.c.bf16 %v2810_v34, %v2806_v33 }
 0x8ab   : > { %v4289_v40 = vpack.c.bf16 %v2807_v37, %v2803_v36  ;;  %v3053_v33 = vld [vmem:[%s5590_s7 + $0x80] sm:$0xff]  ;;  %v3086_v37 = vld [vmem:[%s5590_s7 + $0x188] sm:$0xff] }
 0x8ac   : > { %3984 = vmatprep.mubr.msk.f32.mxu0 %vm830_vm1, %v2652_v41  ;;  %v2805_v41 = vld [vmem:[%s5589_s6 + $0xd0] sm:$0xff]  ;;  %v3085_v34 = vld [vmem:[%s5590_s7 + $0x180] sm:$0xff]  ;;  %v4339_v36 = vpack.c.bf16 %v3054_v17, %v3053_v33  ;;  %v3044_v33 = vld [vmem:[%s5590_s7 + $0x38] sm:$0xff] }
 0x8ad   : > { %3985 = vmatmul.mubr.msk.f32.vlgmr.msra.gmra.mrb[6].mxu0 %vm830_vm1, %v2653_v42  ;;  %v2809_v42 = vld [vmem:[%s5589_s6 + $0xf0] sm:$0xff]  ;;  %4290 = vmatpush1.bf16.msra.mxu1 %v4289_v40 }
 0x8ae   : > { %4310 = vmatpush1.bf16.msra.mxu0 %v4309_v28  ;;  %v4581_v28 = vmov 0.0   ;;  %v3075_v17 = vld [vmem:[%s5590_s7 + $0x130] sm:$0xff] }
 0x8af   : > { %4312 = vmatprep.subr.bf16.mxu0 %v4311_v6  ;;  %2907 = vmatprep.mubr.f32.mxu1 %v4581_v28  ;;  %v2821_v6 = vld [vmem:[%s5589_s6 + $0x150] sm:$0xff] }
 0x8b0   : > { %2984 = vmatprep.mubr.f32.mxu0 %v4581_v28  ;;  %v4329_v2 = vpack.c.bf16 %v2825_v14, %v2821_v6  ;;  %v3040_v14 = vld [vmem:[%s5590_s7 + $0x18] sm:$0xff] }
 0x8b2   : > { %4314 = vmatpush1.bf16.msra.mxu0 %v4313_v5  ;;  %v2834_v5 = vld [vmem:[%s5589_s6 + $0x1b8] sm:$0xff] }
 0x8b3   : > { %4316 = vmatprep.subr.bf16.mxu0 %v4315_v56  ;;  %v4331_v50 = vpack.c.bf16 %v2834_v5, %v2830_v3  ;;  %v2833_v56 = vld [vmem:[%s5589_s6 + $0x1b0] sm:$0xff]  ;;  %v3057_v3 = vld [vmem:[%s5590_s7 + $0xa0] sm:$0xff]  ;;  %v3058_v5 = vld [vmem:[%s5590_s7 + $0xa8] sm:$0xff] }
 0x8b6   : > { %4318 = vmatpush1.bf16.msra.mxu0 %v4317_v18  ;;  %v4333_v18 = vpack.c.bf16 %v2833_v56, %v2829_v10 }
 0x8b7   : > { %4320 = vmatprep.subr.bf16.mxu0 %v4319_v39  ;;  %v4371_v39 = vpack.c.bf16 %v3086_v37, %v3085_v34 }
 0x980   : > { %v3986_v43 = vpop.f32.mrb[6].mxu0 }
 0x981   : > { %v5160_v46 = vadd.f32 %v4566_v45, %v3986_v43  ;;  %v2730_v47 = vpop.f32.mrb[7].mxu0  ;;  %v4321_v43 = vpack.c.bf16 %v2809_v42, %v2805_v41  ;;  %v2812_v45 = vld [vmem:[%s5589_s6 + $0x108] sm:$0xff] }
 0x982   : > { %v5163_v49 = vadd.f32 %v4567_v48, %v2730_v47  ;;  %v2816_v47 = vld [vmem:[%s5589_s6 + $0x128] sm:$0xff]  ;;  %v2814_v48 = vld [vmem:[%s5589_s6 + $0x118] sm:$0xff] }
 0x983   : > { %v2745_v30 = vsel %vm333_vm0, %v5160_v46, 0.0  ;;  %4322 = vmatpush1.bf16.msra.mxu0 %v4321_v43  ;;  %v4323_v54 = vpack.c.bf16 %v2818_v51, %v2814_v48  ;;  %v2769_v48 = vsub.s32 4, %v4807_v23  ;;  %v4568_v51 = vld [vmem:[%s5585_s2] sm:$0x3f] }
 0x984   : > { %2746 = vadd.xlane.f32.xlu1 %v2745_v30  ;;  %2743 = vadd.xlane.f32.xlu0 %v5163_v49  ;;  %v4291_v30 = vpack.c.bf16 %v2816_v47, %v2812_v45 }
 0x985   : > { %4324 = vmatprep.subr.bf16.mxu0 %v4323_v54  ;;  %v2770_v52 = vrot.slane %v4568_v51, %v2769_v48 }
 0x986   : > { %4292 = vmatprep.subr.bf16.mxu1 %v4291_v30  ;;  %v2775_v30 = vsub.s32 5, %v4807_v23 }
 0x987   : > { %4294 = vmatpush1.bf16.msra.mxu1 %v4293_v19  ;;  %4326 = vmatpush1.bf16.msra.mxu0 %v4325_v26  ;;  %v3069_v26 = vld [vmem:[%s5590_s7 + $0x100] sm:$0xff] }
 0x988   : > { %4296 = vmatprep.subr.bf16.mxu1 %v4295_v59  ;;  %4328 = vmatprep.subr.bf16.mxu0 %v4327_v61  ;;  %v2776_v55 = vrot.slane %v4568_v51, %v2775_v30  ;;  %v3088_v59 = vld [vmem:[%s5590_s7 + $0x198] sm:$0xff]  ;;  %v4373_v6 = vpack.c.bf16 %v3070_v35, %v3069_v26  ;;  %v3077_v51 = vld [vmem:[%s5590_s7 + $0x140] sm:$0xff] }
 0x989   : > { %v3048_v26 = vld [vmem:[%s5590_s7 + $0x58] sm:$0xff] }
 0x98b   : > { %4298 = vmatpush1.bf16.msra.mxu1 %v4297_v62  ;;  %4330 = vmatpush1.bf16.msra.mxu0 %v4329_v2  ;;  %v3039_v62 = vld [vmem:[%s5590_s7 + $0x10] sm:$0xff] }
 0x98c   : > { %4300 = vmatprep.subr.bf16.mxu1 %v4299_v38  ;;  %4332 = vmatprep.subr.bf16.mxu0 %v4331_v50  ;;  %v3071_v2 = vld [vmem:[%s5590_s7 + $0x110] sm:$0xff]  ;;  %v3072_v38 = vld [vmem:[%s5590_s7 + $0x118] sm:$0xff]  ;;  %v3090_v50 = vld [vmem:[%s5590_s7 + $0x1a8] sm:$0xff]  ;;  %v4345_v10 = vpack.c.bf16 %v3040_v14, %v3039_v62 }
 0x98d   : > { %v4377_v56 = vpack.c.bf16 %v3072_v38, %v3071_v2  ;;  %v3049_v62 = vld [vmem:[%s5590_s7 + $0x60] sm:$0xff]  ;;  %v3050_v14 = vld [vmem:[%s5590_s7 + $0x68] sm:$0xff] }
 0x98e   : > { %v3081_v2 = vld [vmem:[%s5590_s7 + $0x160] sm:$0xff]  ;;  %v3082_v38 = vld [vmem:[%s5590_s7 + $0x168] sm:$0xff] }
 0x98f   : > { %4302 = vmatpush1.bf16.msra.mxu1 %v4301_v0  ;;  %4334 = vmatpush1.bf16.msra.mxu0 %v4333_v18  ;;  %v3041_v0 = vld [vmem:[%s5590_s7 + $0x20] sm:$0xff]  ;;  %v3074_v18 = vld [vmem:[%s5590_s7 + $0x128] sm:$0xff] }
 0xa11   : > { %v2747_v21 = vpop.xlane.xlu1 %2746  ;;  %v2744_v12 = vpop.xlane.xlu0 %2743 }
 0xa12   : > { %v2749_v4 = vmul.f32 0.0078125, %v2747_v21  ;;  %v2748_v22 = vmul.f32 0.0078125, %v2744_v12  ;;  %v4303_v21 = vpack.c.bf16 %v2840_v13, %v2836_v11  ;;  %v2842_v12 = vld [vmem:[%s5589_s6 + $0x1f8] sm:$0xff]  ;;  %v4347_v11 = vpack.c.bf16 %v3058_v5, %v3057_v3  ;;  %v3067_v5 = vld [vmem:[%s5590_s7 + $0xf0] sm:$0xff] }
 0xa13   : > { %v4379_v13 = vpack.c.bf16 %v3090_v50, %v3089_v44  ;;  %v4397_v3 = vpack.c.bf16 %v3082_v38, %v3081_v2  ;;  %v3068_v44 = vld [vmem:[%s5590_s7 + $0xf8] sm:$0xff]  ;;  %v3099_v50 = vld [vmem:[%s5590_s7 + $0x1f0] sm:$0xff] }
 0xa14   : > { %v5241_v25 = vsub.f32 %v5160_v46, %v2749_v4  ;;  %v5244_v16 = vsub.f32 %v5163_v49, %v2748_v22  ;;  %v2835_v4 = vld [vmem:[%s5589_s6 + $0x1c0] sm:$0xff]  ;;  %4304 = vmatprep.subr.bf16.mxu1 %v4303_v21 }
 0xa15   : > { %v2839_v22 = vld [vmem:[%s5589_s6 + $0x1e0] sm:$0xff] }
 0xa16   : > { %v2752_v27 = vmul.f32 %v5244_v16, %v5244_v16  ;;  %v2753_v29 = vmul.f32 %v5241_v25, %v5241_v25  ;;  %v4305_v32 = vpack.c.bf16 %v2839_v22, %v2835_v4  ;;  %v3059_v4 = vld [vmem:[%s5590_s7 + $0xb0] sm:$0xff]  ;;  %v3060_v22 = vld [vmem:[%s5590_s7 + $0xb8] sm:$0xff] }
 0xa18   : > { %2754 = vadd.xlane.f32.xlu0 %v2752_v27  ;;  %v2756_v24 = vsel %vm333_vm0, %v2753_v29, 0.0  ;;  %v4335_v27 = vpack.c.bf16 %v2842_v12, %v2838_v15  ;;  %v2837_v29 = vld [vmem:[%s5589_s6 + $0x1d0] sm:$0xff]  ;;  %4306 = vmatpush1.bf16.msra.mxu1 %v4305_v32  ;;  %v3042_v15 = vld [vmem:[%s5590_s7 + $0x28] sm:$0xff] }
 0xa19   : > { %2757 = vadd.xlane.f32.xlu1 %v2756_v24  ;;  %v2841_v24 = vld [vmem:[%s5589_s6 + $0x1f0] sm:$0xff]  ;;  %4340 = vmatprep.subr.bf16.mxu1 %v4339_v36  ;;  %v4349_v21 = vpack.c.bf16 %v3042_v15, %v3041_v0  ;;  %v3076_v36 = vld [vmem:[%s5590_s7 + $0x138] sm:$0xff] }
 0xa1a   : > { %v4337_v31 = vpack.c.bf16 %v2841_v24, %v2837_v29  ;;  %4336 = vmatprep.subr.bf16.mxu0 %v4335_v27  ;;  %v3091_v27 = vld [vmem:[%s5590_s7 + $0x1b0] sm:$0xff]  ;;  %v4351_v29 = vpack.c.bf16 %v3060_v22, %v3059_v4  ;;  %v3092_v24 = vld [vmem:[%s5590_s7 + $0x1b8] sm:$0xff]  ;;  %v4385_v37 = vpack.c.bf16 %v3076_v36, %v3075_v17 }
 0xa1b   : > { %v4383_v32 = vpack.c.bf16 %v3092_v24, %v3091_v27  ;;  %v3052_v0 = vld [vmem:[%s5590_s7 + $0x78] sm:$0xff]  ;;  %v3083_v15 = vld [vmem:[%s5590_s7 + $0x170] sm:$0xff] }
 0xa1c   : > { %4338 = vmatpush1.bf16.msra.mxu0 %v4337_v31  ;;  %v3043_v31 = vld [vmem:[%s5590_s7 + $0x30] sm:$0xff] }
 0xa1d   : > { %4372 = vmatprep.subr.bf16.mxu0 %v4371_v39  ;;  %v4353_v34 = vpack.c.bf16 %v3044_v33, %v3043_v31  ;;  %v3061_v39 = vld [vmem:[%s5590_s7 + $0xc0] sm:$0xff] }
 0xaa5   : > { %v2755_v40 = vpop.xlane.xlu0 %2754 }
 0xaa6   : > { %v2759_v41 = vmul.f32 0.0078125, %v2755_v40  ;;  %v2758_v42 = vpop.xlane.xlu1 %2757  ;;  %v3062_v40 = vld [vmem:[%s5590_s7 + $0xc8] sm:$0xff] }
 0xaa7   : > { %v2760_v43 = vmul.f32 0.0078125, %v2758_v42  ;;  %v4355_v42 = vpack.c.bf16 %v3062_v40, %v3061_v39 }
 0xaa8   : > { %v2761_v45 = vadd.f32 1e-05, %v2759_v41  ;;  %v3093_v41 = vld [vmem:[%s5590_s7 + $0x1c0] sm:$0xff] }
 0xaa9   : > { %v2762_v47 = vadd.f32 1e-05, %v2760_v43  ;;  %v3094_v43 = vld [vmem:[%s5590_s7 + $0x1c8] sm:$0xff] }
 0xaaa   : > { %4546 = vrsqrt.f32 %v2761_v45  ;;  %v3045_v45 = vld [vmem:[%s5590_s7 + $0x40] sm:$0xff]  ;;  %v4387_v48 = vpack.c.bf16 %v3094_v43, %v3093_v41 }
 0xaab   : > { %4548 = vrsqrt.f32 %v2762_v47  ;;  %v3046_v47 = vld [vmem:[%s5590_s7 + $0x48] sm:$0xff] }
 0xaac   : > { %v4357_v30 = vpack.c.bf16 %v3046_v47, %v3045_v45 }
 0xab4   : > { %v4547_v53 = vpop.eup %4546 }
 0xab5   : > { %v4549_v54 = vpop.eup %4548  ;;  %v2765_v19 = vmul.f32 %v4547_v53, %v5244_v16  ;;  %v3055_v16 = vld [vmem:[%s5590_s7 + $0x90] sm:$0xff] }
 0xab6   : > { %v2766_v23 = vmul.f32 %v4549_v54, %v5241_v25  ;;  %v3087_v25 = vld [vmem:[%s5590_s7 + $0x190] sm:$0xff]  ;;  %v4343_v63 = vpack.c.bf16 %v3056_v58, %v3055_v16  ;;  %v3080_v58 = vld [vmem:[%s5590_s7 + $0x158] sm:$0xff] }
 0xab7   : > { %v2771_v7 = vmul.f32 %v2770_v52, %v2765_v19  ;;  %v4375_v1 = vpack.c.bf16 %v3088_v59, %v3087_v25  ;;  %v3063_v54 = vld [vmem:[%s5590_s7 + $0xd0] sm:$0xff]  ;;  %v3064_v19 = vld [vmem:[%s5590_s7 + $0xd8] sm:$0xff]  ;;  %v3065_v59 = vld [vmem:[%s5590_s7 + $0xe0] sm:$0xff] }
 0xab8   : > { %v2772_v60 = vmul.f32 %v2770_v52, %v2766_v23  ;;  %v3078_v52 = vld [vmem:[%s5590_s7 + $0x148] sm:$0xff]  ;;  %v4359_v57 = vpack.c.bf16 %v3064_v19, %v3063_v54  ;;  %v3047_v23 = vld [vmem:[%s5590_s7 + $0x50] sm:$0xff] }
 0xab9   : > { %v2777_v61 = vadd.f32 %v2776_v55, %v2771_v7  ;;  %v4389_v53 = vpack.c.bf16 %v3078_v52, %v3077_v51  ;;  %v4361_v16 = vpack.c.bf16 %v3048_v26, %v3047_v23  ;;  %v3079_v7 = vld [vmem:[%s5590_s7 + $0x150] sm:$0xff] }
 0xaba   : > { %v2778_v8 = vadd.f32 %v2776_v55, %v2772_v60  ;;  %v3095_v55 = vld [vmem:[%s5590_s7 + $0x1d0] sm:$0xff]  ;;  %v4393_v25 = vpack.c.bf16 %v3080_v58, %v3079_v7  ;;  %v3097_v60 = vld [vmem:[%s5590_s7 + $0x1e0] sm:$0xff] }
 0xabb   : > { %2908 = vmatmul.mubr.f32.vlgmr.msra.gmra.mrb[24].mxu1 %v2777_v61  ;;  %2985 = vmatmul.mubr.f32.vlgmr.msra.gmra.mrb[12].mxu0 %v2777_v61  ;;  %v4391_v35 = vpack.c.bf16 %v3096_v20, %v3095_v55  ;;  %v3066_v61 = vld [vmem:[%s5590_s7 + $0xe8] sm:$0xff] }
 0xabc   : > { %2913 = vmatprep.mubr.f32.mxu1 %v4581_v28  ;;  %2990 = vmatprep.mubr.f32.mxu0 %v4581_v28  ;;  %v3073_v28 = vld [vmem:[%s5590_s7 + $0x120] sm:$0xff] }
 0xabd   : > { %4342 = vmatpush3.bf16.msra.mxu1 %v4341_v9  ;;  %4374 = vmatpush3.bf16.msra.mxu0 %v4373_v6  ;;  %v4381_v12 = vpack.c.bf16 %v3074_v18, %v3073_v28  ;;  %v4363_v9 = vpack.c.bf16 %v3066_v61, %v3065_v59  ;;  %v3098_v6 = vld [vmem:[%s5590_s7 + $0x1e8] sm:$0xff]  ;;  %v3084_v28 = vld [vmem:[%s5590_s7 + $0x178] sm:$0xff] }
 0xabe   : > { %4344 = vmatprep.subr.bf16.mxu1 %v4343_v63  ;;  %4376 = vmatprep.subr.bf16.mxu0 %v4375_v1  ;;  %v4395_v63 = vpack.c.bf16 %v3098_v6, %v3097_v60  ;;  %v4365_v1 = vpack.c.bf16 %v3050_v14, %v3049_v62  ;;  %v4401_v18 = vpack.c.bf16 %v3084_v28, %v3083_v15 }
 0xabf   : > { %2914 = vmatmul.mubr.f32.gmra.mrb[26].mxu1 %v2778_v8  ;;  %2991 = vmatmul.mubr.f32.gmra.mrb[14].mxu0 %v2778_v8  ;;  %v4367_v8 = vpack.c.bf16 %v3068_v44, %v3067_v5 }
 0xac1   : > { %4346 = vmatpush3.bf16.msra.mxu1 %v4345_v10  ;;  %4378 = vmatpush3.bf16.msra.mxu0 %v4377_v56  ;;  %v3100_v10 = vld [vmem:[%s5590_s7 + $0x1f8] sm:$0xff]  ;;  %v3051_v56 = vld [vmem:[%s5590_s7 + $0x70] sm:$0xff] }
 0xac2   : > { %4348 = vmatprep.subr.bf16.mxu1 %v4347_v11  ;;  %4380 = vmatprep.subr.bf16.mxu0 %v4379_v13  ;;  %v4399_v11 = vpack.c.bf16 %v3100_v10, %v3099_v50  ;;  %v4369_v13 = vpack.c.bf16 %v3052_v0, %v3051_v56 }
 0xac5   : > { %4350 = vmatpush3.bf16.msra.mxu1 %v4349_v21  ;;  %4382 = vmatpush3.bf16.msra.mxu0 %v4381_v12 }
 0xac6   : > { %4352 = vmatprep.subr.bf16.mxu1 %v4351_v29  ;;  %4384 = vmatprep.subr.bf16.mxu0 %v4383_v32 }
 0xac9   : > { %4354 = vmatpush3.bf16.msra.mxu1 %v4353_v34  ;;  %4386 = vmatpush3.bf16.msra.mxu0 %v4385_v37 }
 0xaca   : > { %4356 = vmatprep.subr.bf16.mxu1 %v4355_v42  ;;  %4388 = vmatprep.subr.bf16.mxu0 %v4387_v48 }
 0xacd   : > { %4358 = vmatpush3.bf16.msra.mxu1 %v4357_v30  ;;  %4390 = vmatpush3.bf16.msra.mxu0 %v4389_v53 }
 0xace   : > { %4360 = vmatprep.subr.bf16.mxu1 %v4359_v57  ;;  %4392 = vmatprep.subr.bf16.mxu0 %v4391_v35 }
 0xad1   : > { %4362 = vmatpush3.bf16.msra.mxu1 %v4361_v16  ;;  %4394 = vmatpush3.bf16.msra.mxu0 %v4393_v25 }
 0xad2   : > { %4364 = vmatprep.subr.bf16.mxu1 %v4363_v9  ;;  %4396 = vmatprep.subr.bf16.mxu0 %v4395_v63 }
 0xad5   : > { %4366 = vmatpush3.bf16.msra.mxu1 %v4365_v1  ;;  %4398 = vmatpush3.bf16.msra.mxu0 %v4397_v3 }
 0xad6   : > { %4368 = vmatprep.subr.bf16.mxu1 %v4367_v8  ;;  %4400 = vmatprep.subr.bf16.mxu0 %v4399_v11 }
 0xad9   : > { %4370 = vmatpush3.bf16.msra.mxu1 %v4369_v13  ;;  %4402 = vmatpush3.bf16.msra.mxu0 %v4401_v18 }
 0xb8e   : > { %v2909_v21 = vpop.f32.mrb[24].mxu1  ;;  %v2986_v12 = vpop.f32.mrb[12].mxu0 }
 0xb8f   : > { %v3005_v4 = vmul.f32 0.70710677, %v2909_v21  ;;  %v3007_v22 = vmul.f32 0.70710677, %v2986_v12  ;;  %v2911_v27 = vpop.f32.mrb[25].mxu1  ;;  %v2988_v29 = vpop.f32.mrb[13].mxu0 }
 0xb90   : > { %v3006_v24 = vmul.f32 0.70710677, %v2911_v27  ;;  %v3008_v32 = vmul.f32 0.70710677, %v2988_v29  ;;  %v2998_v30 = vmul.f32 0.5, %v2911_v27  ;;  %v2997_v53 = vmul.f32 0.5, %v2909_v21 }
 0xb91   : > { %4550 = verf.f32 %v3005_v4  ;;  %v3000_v54 = vmul.f32 0.5, %v2988_v29  ;;  %v2999_v57 = vmul.f32 0.5, %v2986_v12 }
 0xb92   : > { %4552 = verf.f32 %v3007_v22  ;;  %v2915_v31 = vpop.f32.mrb[26].mxu1  ;;  %v2992_v33 = vpop.f32.mrb[14].mxu0 }
 0xb93   : > { %4554 = verf.f32 %v3006_v24  ;;  %v3009_v17 = vmul.f32 0.70710677, %v2915_v31  ;;  %v2917_v34 = vpop.f32.mrb[27].mxu1  ;;  %v2994_v36 = vpop.f32.mrb[15].mxu0  ;;  %v3011_v37 = vmul.f32 0.70710677, %v2992_v33 }
 0xb94   : > { %4556 = verf.f32 %v3008_v32  ;;  %v3010_v39 = vmul.f32 0.70710677, %v2917_v34  ;;  %v3012_v40 = vmul.f32 0.70710677, %v2994_v36  ;;  %v3002_v59 = vmul.f32 0.5, %v2917_v34 }
 0xb95   : > { %4558 = verf.f32 %v3009_v17  ;;  %v3001_v60 = vmul.f32 0.5, %v2915_v31  ;;  %v3004_v9 = vmul.f32 0.5, %v2994_v36  ;;  %v3003_v62 = vmul.f32 0.5, %v2992_v33 }
 0xb96   : > { %4560 = verf.f32 %v3011_v37 }
 0xb97   : > { %4562 = verf.f32 %v3010_v39 }
 0xb98   : > { %4564 = verf.f32 %v3012_v40 }
 0xb9b   : > { %v4551_v41 = vpop.eup %4550 }
 0xb9c   : > { %v4553_v42 = vpop.eup %4552  ;;  %v3021_v45 = vadd.f32 1.0, %v4551_v41 }
 0xb9d   : > { %v4555_v43 = vpop.eup %4554  ;;  %v3023_v48 = vadd.f32 1.0, %v4553_v42 }
 0xb9e   : > { %v4557_v47 = vpop.eup %4556  ;;  %v3022_v51 = vadd.f32 1.0, %v4555_v43  ;;  %v3029_v26 = vmul.f32 %v3021_v45, %v2997_v53 }
 0xb9f   : > { %v4559_v52 = vpop.eup %4558  ;;  %v3024_v19 = vadd.f32 1.0, %v4557_v47  ;;  %v3031_v58 = vmul.f32 %v3023_v48, %v2999_v57 }
 0xba0   : > { %v4561_v55 = vpop.eup %4560  ;;  %v3030_v20 = vmul.f32 %v3022_v51, %v2998_v30  ;;  %v3025_v16 = vadd.f32 1.0, %v4559_v52 }
 0xba1   : > { %v4563_v23 = vpop.eup %4562  ;;  %v3032_v35 = vmul.f32 %v3024_v19, %v3000_v54  ;;  %v3027_v25 = vadd.f32 1.0, %v4561_v55 }
 0xba2   : > { %v4565_v7 = vpop.eup %4564  ;;  %v3026_v61 = vadd.f32 1.0, %v4563_v23  ;;  %3165 = vmatprep.mubr.f32.mxu1 %v3030_v20  ;;  %v3033_v63 = vmul.f32 %v3025_v16, %v3001_v60 }
 0xba3   : > { %v3028_v6 = vadd.f32 1.0, %v4565_v7  ;;  %3240 = vmatprep.mubr.f32.mxu0 %v3032_v35  ;;  %3166 = vmatmul.mubr.f32.vlgmr.msra.gmra.mrb[28].mxu1 %v3029_v26  ;;  %v3035_v2 = vmul.f32 %v3027_v25, %v3003_v62 }
 0xba4   : > { %v3034_v14 = vmul.f32 %v3026_v61, %v3002_v59  ;;  %3241 = vmatmul.mubr.f32.vlgmr.msra.gmra.mrb[16].mxu0 %v3031_v58 }
 0xba5   : > { %v3036_v1 = vmul.f32 %v3028_v6, %v3004_v9 }
 0xba6   : > { %3170 = vmatprep.mubr.f32.mxu1 %v3034_v14 }
 0xba7   : > { %3245 = vmatprep.mubr.f32.mxu0 %v3036_v1  ;;  %3171 = vmatmul.mubr.f32.gmra.mrb[30].mxu1 %v3033_v63 }
 0xba8   : > { %3246 = vmatmul.mubr.f32.gmra.mrb[18].mxu0 %v3035_v2 }
 0xc76   : > { %v3612_v38 = vpop.f32.mrb[28].mxu1 }
 0xc77   : > { %v3650_v3 = vpop.f32.mrb[16].mxu0  ;;  %v3613_v5 = vpop.f32.mrb[29].mxu1 }
 0xc78   : > { %v3614_v44 = vadd.f32 %v3613_v5, %v3612_v38  ;;  %v3651_v50 = vpop.f32.mrb[17].mxu0 }
 0xc79   : > { %v3652_v8 = vadd.f32 %v3651_v50, %v3650_v3 }
 0xc7a   : > { %v3615_v10 = vpop.f32.mrb[30].mxu1 }
 0xc7b   : > { %v3243_v56 = vadd.f32 %v3652_v8, %v3614_v44  ;;  %v3653_v0 = vpop.f32.mrb[18].mxu0  ;;  %v3616_v11 = vpop.f32.mrb[31].mxu1 }
 0xc7c   : > { %v3617_v13 = vadd.f32 %v3616_v11, %v3615_v10  ;;  %v3654_v15 = vpop.f32.mrb[19].mxu0 }
 0xc7d   : > { %v3251_v28 = vadd.f32 %v3243_v56, %v5163_v49  ;;  %v3655_v18 = vadd.f32 %v3654_v15, %v3653_v0 }
 0xc7f   : > { %3253 = vst [vmem:[%s325_s14] sm:$0xff] %v3251_v28  ;;  %v3248_v21 = vadd.f32 %v3655_v18, %v3617_v13 }
 0xc81   : > { %v3252_v12 = vadd.f32 %v3248_v21, %v5160_v46 }
 0xc83   : > { %3254 = vst [vmem:[%s325_s14 + $0x8] sm:$0x1f] %v3252_v12 }
 0xc84 PF: > { %s18_s27 = sadd.s32 1, %s4575_s27  }
 0xc85   : > { %p15_p4 = scmp.ge.s32.totalorder %s18_s27, 4  }
 0xc87   :  { %17 = sbr.rel (!%p15_p4) target bundleno = 1 (0x1), region = 85 }

</bundles_post_ra>
